<compile_context>
chip_gen: v7x
topology: tpu7x:2x2x1
jax: 0.10.0
libtpu: 0.0.40
codegen_flags: <defaults>
</compile_context>

<pallas_src>
import jax
import jax.numpy as jnp
from jax.experimental import pallas as pl
from jax.experimental.pallas import tpu as pltpu


def _shift2d(p, sy, sx):
    """q[h, w] = p[h + sy, w + sx], zero-filled outside the array (static sy, sx in {-1,0,1}).

    Built from slice + concat so the zero 'same'-padding border is exact; Mosaic lowers this
    to the same lane/sublane rotate + select that a pltpu.roll + wrap-mask scheme would use,
    with no (W+2)-wide misaligned scratch anywhere.
    """
    H, W = p.shape
    if sy:
        zr = jnp.zeros((1, W), p.dtype)
        p = (jnp.concatenate([p[1:, :], zr], axis=0) if sy > 0
             else jnp.concatenate([zr, p[:-1, :]], axis=0))
    if sx:
        zc = jnp.zeros((H, 1), p.dtype)
        p = (jnp.concatenate([p[:, 1:], zc], axis=1) if sx > 0
             else jnp.concatenate([zc, p[:, :-1]], axis=1))
    return p


def _make_kernel(H, W, C_in, C_out):
    """Fused 3x3 'same' conv (no bias) + PixelShuffle(2) for one batch element, NCHW."""
    C_ps = C_out // 4  # channels after PixelShuffle(2)

    def kernel(x_ref, w_ref, o_ref):
        # x_ref : (1, C_in, H, W)     bf16 activations (one batch element)
        # w_ref : (C_out*C_in*9,)     f32 conv weights, OIHW row-major flat, in SMEM
        # o_ref : (1, C_ps, 2H, 2W)   bf16 fused conv+PixelShuffle output
        x = x_ref[0].astype(jnp.float32)                       # (C_in, H, W)

        # ---- 9*C_in zero-padded shifted views of the input ('same' conv taps), hoisted
        # out of the channel-group loop.  No padded scratch, no zero-fill pass.
        patches = []
        for ci in range(C_in):
            plane = x[ci]
            for dy in range(3):
                for dx in range(3):
                    patches.append(_shift2d(plane, dy - 1, dx - 1))

        # ---- PixelShuffle(2) permutation matrices (exact 0/1 values, built from iota).
        #   E_j : (W, 2W)   scatters input column w  -> output column 2w + j
        #   P_i : (2H, H)   scatters input row    h  -> output row    2h + i
        wi = jax.lax.broadcasted_iota(jnp.int32, (W, 2 * W), 0)
        cw = jax.lax.broadcasted_iota(jnp.int32, (W, 2 * W), 1)
        E0 = (cw == 2 * wi).astype(jnp.bfloat16)
        E1 = (cw == 2 * wi + 1).astype(jnp.bfloat16)
        rh = jax.lax.broadcasted_iota(jnp.int32, (2 * H, H), 0)
        ch = jax.lax.broadcasted_iota(jnp.int32, (2 * H, H), 1)
        P0 = (rh == 2 * ch).astype(jnp.bfloat16)
        P1 = (rh == 2 * ch + 1).astype(jnp.bfloat16)

        # ---- One PixelShuffle group (= 4 conv output channels) at a time, so only
        # 4 accumulators are live.  n_feat is tiny -> VPU broadcast-MAC conv (the MXU
        # would be <4% utilized on a K=C_in contraction and is used for the shuffle instead).
        for c in range(C_ps):
            accs = [jnp.zeros((H, W), jnp.float32) for _ in range(4)]
            pidx = 0
            for ci in range(C_in):
                for dy in range(3):
                    for dx in range(3):
                        patch = patches[pidx]
                        pidx += 1
                        for q in range(4):          # q = 2*i + j of PixelShuffle
                            co = 4 * c + q
                            wv = w_ref[(co * C_in + ci) * 9 + dy * 3 + dx]
                            accs[q] = accs[q] + wv * patch

            # Fused PixelShuffle epilogue on the MXU:  out[2h+i, 2w+j] = acc_{2i+j}[h, w].
            # Casting the accumulators to bf16 first is exact w.r.t. the bf16 output
            # (the permutation matmuls move values unchanged, accumulation is f32).
            a = [v.astype(jnp.bfloat16) for v in accs]
            top = (jnp.dot(a[0], E0, preferred_element_type=jnp.float32)
                   + jnp.dot(a[1], E1, preferred_element_type=jnp.float32))
            bot = (jnp.dot(a[2], E0, preferred_element_type=jnp.float32)
                   + jnp.dot(a[3], E1, preferred_element_type=jnp.float32))
            full = (jnp.dot(P0, top.astype(jnp.bfloat16), preferred_element_type=jnp.float32)
                    + jnp.dot(P1, bot.astype(jnp.bfloat16), preferred_element_type=jnp.float32))
            o_ref[0, c] = full.astype(o_ref.dtype)             # dense (2H, 2W) bf16 store

    return kernel


def upsample_pallas(x_nchw, w_oihw):
    """Fused Conv2d(C, 2C, 3, pad=1, bias=False) + PixelShuffle(2).

    x_nchw: (N, C, H, W) float ;  w_oihw: (2C, C, 3, 3) float
    returns: (N, C//2, 2H, 2W) bf16   (activations quantized to bf16 at the HBM boundary;
    accumulation is f32 -- documented deviation from the f32 torch output dtype).
    """
    N, C_in, H, W = x_nchw.shape
    C_out = w_oihw.shape[0]
    assert C_out == 2 * C_in and C_out % 4 == 0, (C_in, C_out)
    C_ps = C_out // 4

    x_bf16 = x_nchw.astype(jnp.bfloat16)               # halve HBM->VMEM activation traffic
    w_flat = w_oihw.astype(jnp.float32).reshape(-1)    # (C_out*C_in*9,) SMEM scalars

    kernel = _make_kernel(H, W, C_in, C_out)

    return pl.pallas_call(
        kernel,
        out_shape=jax.ShapeDtypeStruct((N, C_ps, 2 * H, 2 * W), jnp.bfloat16),
        grid=(N,),
        in_specs=[
            pl.BlockSpec((1, C_in, H, W), lambda n: (n, 0, 0, 0)),
            pl.BlockSpec(memory_space=pltpu.MemorySpace.SMEM),   # scalar conv weights
        ],
        out_specs=pl.BlockSpec((1, C_ps, 2 * H, 2 * W), lambda n: (n, 0, 0, 0)),
        compiler_params=pltpu.CompilerParams(
            dimension_semantics=("parallel",),                   # batch over megacore/TCs
            vmem_limit_bytes=48 * 1024 * 1024,                   # safe on v5e/v6e/v7x
        ),
    )(x_bf16, w_flat)


upsample_forward = jax.jit(upsample_pallas)


def pixel_shuffle_nchw(y, r=2):
    """torch.nn.PixelShuffle: out[n, c, h*r+i, w*r+j] = y[n, c*r*r + i*r + j, h, w]."""
    N, Crr, H, W = y.shape
    C = Crr // (r * r)
    y = y.reshape(N, C, r, r, H, W)
    y = jnp.transpose(y, (0, 1, 4, 2, 5, 3))
    return y.reshape(N, C, H * r, W * r)


def upsample_reference(x_nchw, w_oihw):
    """Pure-JAX f32 reference (lax conv + pixel shuffle) for validation."""
    y = jax.lax.conv_general_dilated(
        x_nchw, w_oihw, window_strides=(1, 1), padding="SAME",
        dimension_numbers=("NCHW", "OIHW", "NCHW"))
    return pixel_shuffle_nchw(y, r=2)


if __name__ == "__main__":
    key = jax.random.PRNGKey(0)
    k_x, k_w = jax.random.split(key)

    N, n_feat, H, W = 2, 4, 16, 16
    x = jax.random.normal(k_x, (N, n_feat, H, W), dtype=jnp.float32)
    # Conv2d(n_feat, 2*n_feat, 3, padding=1, bias=False) weight, OIHW.
    w = jax.random.normal(k_w, (2 * n_feat, n_feat, 3, 3), dtype=jnp.float32) * 0.1

    out = jax.block_until_ready(upsample_forward(x, w))

    # Like-for-like reference: the kernel quantizes activations to bf16 at the HBM
    # boundary, so the reference uses the same quantized input; remaining error is the
    # bf16 output quantization (~0.2% relative), so the tolerance can be tight.
    x_q = x.astype(jnp.bfloat16).astype(jnp.float32)
    ref = jax.block_until_ready(upsample_reference(x_q, w))

    assert out.shape == (N, n_feat // 2, 2 * H, 2 * W), out.shape
    assert out.dtype == jnp.bfloat16, out.dtype
    out_f32 = out.astype(jnp.float32)
    max_err = float(jnp.max(jnp.abs(out_f32 - ref)))
    assert jnp.allclose(out_f32, ref, atol=1e-2, rtol=1e-2), f"mismatch vs reference (max err {max_err})"
    print("KERNEL_OK")
</pallas_src>

<mosaic_0001>
module attributes {stable_mosaic.version = 11 : i64} {
  func.func @kernel(%arg0: i32, %arg1: memref<1x4x16x16xbf16, #tpu.memory_space<vmem>>, %arg2: memref<288xf32, #tpu.memory_space<smem>>, %arg3: memref<1x2x32x32xbf16, #tpu.memory_space<vmem>>) attributes {dimension_semantics = [#tpu.dimension_semantics<parallel>], iteration_bounds = array<i64: 2>, scalar_prefetch = 0 : i64, scratch_operands = 0 : i64, tpu.core_type = #tpu.core_type<tc>, window_params = [{transform_indices = @transform_0, window_bounds = array<i64: 1, 4, 16, 16>}, {transform_indices = @transform_1, window_bounds = array<i64: 288>}, {transform_indices = @transform_2, window_bounds = array<i64: 1, 2, 32, 32>}]} {
    %c0 = arith.constant 0 : index
    %c0_0 = arith.constant 0 : index
    %c0_1 = arith.constant 0 : index
    %c0_2 = arith.constant 0 : index
    %0 = vector.load %arg1[%c0, %c0_0, %c0_1, %c0_2] : memref<1x4x16x16xbf16, #tpu.memory_space<vmem>>, vector<1x4x16x16xbf16>
    %1 = vector.shape_cast %0 : vector<1x4x16x16xbf16> to vector<4x16x16xbf16>
    %2 = arith.extf %1 : vector<4x16x16xbf16> to vector<4x16x16xf32>
    %3 = vector.extract_strided_slice %2 {offsets = [0, 0, 0], sizes = [1, 16, 16], strides = [1, 1, 1]} : vector<4x16x16xf32> to vector<1x16x16xf32>
    %4 = vector.shape_cast %3 : vector<1x16x16xf32> to vector<16x16xf32>
    %cst = arith.constant 0.000000e+00 : f32
    %5 = vector.broadcast %cst : f32 to vector<1x16xf32>
    %6 = vector.extract_strided_slice %4 {offsets = [0, 0], sizes = [15, 16], strides = [1, 1]} : vector<16x16xf32> to vector<15x16xf32>
    %7 = tpu.concatenate %5, %6 in 0 : vector<1x16xf32>, vector<15x16xf32> -> vector<16x16xf32>
    %cst_3 = arith.constant 0.000000e+00 : f32
    %8 = vector.broadcast %cst_3 : f32 to vector<16x1xf32>
    %9 = vector.extract_strided_slice %7 {offsets = [0, 0], sizes = [16, 15], strides = [1, 1]} : vector<16x16xf32> to vector<16x15xf32>
    %10 = tpu.concatenate %8, %9 in 1 : vector<16x1xf32>, vector<16x15xf32> -> vector<16x16xf32>
    %cst_4 = arith.constant 0.000000e+00 : f32
    %11 = vector.broadcast %cst_4 : f32 to vector<1x16xf32>
    %12 = vector.extract_strided_slice %4 {offsets = [0, 0], sizes = [15, 16], strides = [1, 1]} : vector<16x16xf32> to vector<15x16xf32>
    %13 = tpu.concatenate %11, %12 in 0 : vector<1x16xf32>, vector<15x16xf32> -> vector<16x16xf32>
    %cst_5 = arith.constant 0.000000e+00 : f32
    %14 = vector.broadcast %cst_5 : f32 to vector<1x16xf32>
    %15 = vector.extract_strided_slice %4 {offsets = [0, 0], sizes = [15, 16], strides = [1, 1]} : vector<16x16xf32> to vector<15x16xf32>
    %16 = tpu.concatenate %14, %15 in 0 : vector<1x16xf32>, vector<15x16xf32> -> vector<16x16xf32>
    %cst_6 = arith.constant 0.000000e+00 : f32
    %17 = vector.broadcast %cst_6 : f32 to vector<16x1xf32>
    %18 = vector.extract_strided_slice %16 {offsets = [0, 1], sizes = [16, 15], strides = [1, 1]} : vector<16x16xf32> to vector<16x15xf32>
    %19 = tpu.concatenate %18, %17 in 1 : vector<16x15xf32>, vector<16x1xf32> -> vector<16x16xf32>
    %cst_7 = arith.constant 0.000000e+00 : f32
    %20 = vector.broadcast %cst_7 : f32 to vector<16x1xf32>
    %21 = vector.extract_strided_slice %4 {offsets = [0, 0], sizes = [16, 15], strides = [1, 1]} : vector<16x16xf32> to vector<16x15xf32>
    %22 = tpu.concatenate %20, %21 in 1 : vector<16x1xf32>, vector<16x15xf32> -> vector<16x16xf32>
    %cst_8 = arith.constant 0.000000e+00 : f32
    %23 = vector.broadcast %cst_8 : f32 to vector<16x1xf32>
    %24 = vector.extract_strided_slice %4 {offsets = [0, 1], sizes = [16, 15], strides = [1, 1]} : vector<16x16xf32> to vector<16x15xf32>
    %25 = tpu.concatenate %24, %23 in 1 : vector<16x15xf32>, vector<16x1xf32> -> vector<16x16xf32>
    %cst_9 = arith.constant 0.000000e+00 : f32
    %26 = vector.broadcast %cst_9 : f32 to vector<1x16xf32>
    %27 = vector.extract_strided_slice %4 {offsets = [1, 0], sizes = [15, 16], strides = [1, 1]} : vector<16x16xf32> to vector<15x16xf32>
    %28 = tpu.concatenate %27, %26 in 0 : vector<15x16xf32>, vector<1x16xf32> -> vector<16x16xf32>
    %cst_10 = arith.constant 0.000000e+00 : f32
    %29 = vector.broadcast %cst_10 : f32 to vector<16x1xf32>
    %30 = vector.extract_strided_slice %28 {offsets = [0, 0], sizes = [16, 15], strides = [1, 1]} : vector<16x16xf32> to vector<16x15xf32>
    %31 = tpu.concatenate %29, %30 in 1 : vector<16x1xf32>, vector<16x15xf32> -> vector<16x16xf32>
    %cst_11 = arith.constant 0.000000e+00 : f32
    %32 = vector.broadcast %cst_11 : f32 to vector<1x16xf32>
    %33 = vector.extract_strided_slice %4 {offsets = [1, 0], sizes = [15, 16], strides = [1, 1]} : vector<16x16xf32> to vector<15x16xf32>
    %34 = tpu.concatenate %33, %32 in 0 : vector<15x16xf32>, vector<1x16xf32> -> vector<16x16xf32>
    %cst_12 = arith.constant 0.000000e+00 : f32
    %35 = vector.broadcast %cst_12 : f32 to vector<1x16xf32>
    %36 = vector.extract_strided_slice %4 {offsets = [1, 0], sizes = [15, 16], strides = [1, 1]} : vector<16x16xf32> to vector<15x16xf32>
    %37 = tpu.concatenate %36, %35 in 0 : vector<15x16xf32>, vector<1x16xf32> -> vector<16x16xf32>
    %cst_13 = arith.constant 0.000000e+00 : f32
    %38 = vector.broadcast %cst_13 : f32 to vector<16x1xf32>
    %39 = vector.extract_strided_slice %37 {offsets = [0, 1], sizes = [16, 15], strides = [1, 1]} : vector<16x16xf32> to vector<16x15xf32>
    %40 = tpu.concatenate %39, %38 in 1 : vector<16x15xf32>, vector<16x1xf32> -> vector<16x16xf32>
    %41 = vector.extract_strided_slice %2 {offsets = [1, 0, 0], sizes = [1, 16, 16], strides = [1, 1, 1]} : vector<4x16x16xf32> to vector<1x16x16xf32>
    %42 = vector.shape_cast %41 : vector<1x16x16xf32> to vector<16x16xf32>
    %cst_14 = arith.constant 0.000000e+00 : f32
    %43 = vector.broadcast %cst_14 : f32 to vector<1x16xf32>
    %44 = vector.extract_strided_slice %42 {offsets = [0, 0], sizes = [15, 16], strides = [1, 1]} : vector<16x16xf32> to vector<15x16xf32>
    %45 = tpu.concatenate %43, %44 in 0 : vector<1x16xf32>, vector<15x16xf32> -> vector<16x16xf32>
    %cst_15 = arith.constant 0.000000e+00 : f32
    %46 = vector.broadcast %cst_15 : f32 to vector<16x1xf32>
    %47 = vector.extract_strided_slice %45 {offsets = [0, 0], sizes = [16, 15], strides = [1, 1]} : vector<16x16xf32> to vector<16x15xf32>
    %48 = tpu.concatenate %46, %47 in 1 : vector<16x1xf32>, vector<16x15xf32> -> vector<16x16xf32>
    %cst_16 = arith.constant 0.000000e+00 : f32
    %49 = vector.broadcast %cst_16 : f32 to vector<1x16xf32>
    %50 = vector.extract_strided_slice %42 {offsets = [0, 0], sizes = [15, 16], strides = [1, 1]} : vector<16x16xf32> to vector<15x16xf32>
    %51 = tpu.concatenate %49, %50 in 0 : vector<1x16xf32>, vector<15x16xf32> -> vector<16x16xf32>
    %cst_17 = arith.constant 0.000000e+00 : f32
    %52 = vector.broadcast %cst_17 : f32 to vector<1x16xf32>
    %53 = vector.extract_strided_slice %42 {offsets = [0, 0], sizes = [15, 16], strides = [1, 1]} : vector<16x16xf32> to vector<15x16xf32>
    %54 = tpu.concatenate %52, %53 in 0 : vector<1x16xf32>, vector<15x16xf32> -> vector<16x16xf32>
    %cst_18 = arith.constant 0.000000e+00 : f32
    %55 = vector.broadcast %cst_18 : f32 to vector<16x1xf32>
    %56 = vector.extract_strided_slice %54 {offsets = [0, 1], sizes = [16, 15], strides = [1, 1]} : vector<16x16xf32> to vector<16x15xf32>
    %57 = tpu.concatenate %56, %55 in 1 : vector<16x15xf32>, vector<16x1xf32> -> vector<16x16xf32>
    %cst_19 = arith.constant 0.000000e+00 : f32
    %58 = vector.broadcast %cst_19 : f32 to vector<16x1xf32>
    %59 = vector.extract_strided_slice %42 {offsets = [0, 0], sizes = [16, 15], strides = [1, 1]} : vector<16x16xf32> to vector<16x15xf32>
    %60 = tpu.concatenate %58, %59 in 1 : vector<16x1xf32>, vector<16x15xf32> -> vector<16x16xf32>
    %cst_20 = arith.constant 0.000000e+00 : f32
    %61 = vector.broadcast %cst_20 : f32 to vector<16x1xf32>
    %62 = vector.extract_strided_slice %42 {offsets = [0, 1], sizes = [16, 15], strides = [1, 1]} : vector<16x16xf32> to vector<16x15xf32>
    %63 = tpu.concatenate %62, %61 in 1 : vector<16x15xf32>, vector<16x1xf32> -> vector<16x16xf32>
    %cst_21 = arith.constant 0.000000e+00 : f32
    %64 = vector.broadcast %cst_21 : f32 to vector<1x16xf32>
    %65 = vector.extract_strided_slice %42 {offsets = [1, 0], sizes = [15, 16], strides = [1, 1]} : vector<16x16xf32> to vector<15x16xf32>
    %66 = tpu.concatenate %65, %64 in 0 : vector<15x16xf32>, vector<1x16xf32> -> vector<16x16xf32>
    %cst_22 = arith.constant 0.000000e+00 : f32
    %67 = vector.broadcast %cst_22 : f32 to vector<16x1xf32>
    %68 = vector.extract_strided_slice %66 {offsets = [0, 0], sizes = [16, 15], strides = [1, 1]} : vector<16x16xf32> to vector<16x15xf32>
    %69 = tpu.concatenate %67, %68 in 1 : vector<16x1xf32>, vector<16x15xf32> -> vector<16x16xf32>
    %cst_23 = arith.constant 0.000000e+00 : f32
    %70 = vector.broadcast %cst_23 : f32 to vector<1x16xf32>
    %71 = vector.extract_strided_slice %42 {offsets = [1, 0], sizes = [15, 16], strides = [1, 1]} : vector<16x16xf32> to vector<15x16xf32>
    %72 = tpu.concatenate %71, %70 in 0 : vector<15x16xf32>, vector<1x16xf32> -> vector<16x16xf32>
    %cst_24 = arith.constant 0.000000e+00 : f32
    %73 = vector.broadcast %cst_24 : f32 to vector<1x16xf32>
    %74 = vector.extract_strided_slice %42 {offsets = [1, 0], sizes = [15, 16], strides = [1, 1]} : vector<16x16xf32> to vector<15x16xf32>
    %75 = tpu.concatenate %74, %73 in 0 : vector<15x16xf32>, vector<1x16xf32> -> vector<16x16xf32>
    %cst_25 = arith.constant 0.000000e+00 : f32
    %76 = vector.broadcast %cst_25 : f32 to vector<16x1xf32>
    %77 = vector.extract_strided_slice %75 {offsets = [0, 1], sizes = [16, 15], strides = [1, 1]} : vector<16x16xf32> to vector<16x15xf32>
    %78 = tpu.concatenate %77, %76 in 1 : vector<16x15xf32>, vector<16x1xf32> -> vector<16x16xf32>
    %79 = vector.extract_strided_slice %2 {offsets = [2, 0, 0], sizes = [1, 16, 16], strides = [1, 1, 1]} : vector<4x16x16xf32> to vector<1x16x16xf32>
    %80 = vector.shape_cast %79 : vector<1x16x16xf32> to vector<16x16xf32>
    %cst_26 = arith.constant 0.000000e+00 : f32
    %81 = vector.broadcast %cst_26 : f32 to vector<1x16xf32>
    %82 = vector.extract_strided_slice %80 {offsets = [0, 0], sizes = [15, 16], strides = [1, 1]} : vector<16x16xf32> to vector<15x16xf32>
    %83 = tpu.concatenate %81, %82 in 0 : vector<1x16xf32>, vector<15x16xf32> -> vector<16x16xf32>
    %cst_27 = arith.constant 0.000000e+00 : f32
    %84 = vector.broadcast %cst_27 : f32 to vector<16x1xf32>
    %85 = vector.extract_strided_slice %83 {offsets = [0, 0], sizes = [16, 15], strides = [1, 1]} : vector<16x16xf32> to vector<16x15xf32>
    %86 = tpu.concatenate %84, %85 in 1 : vector<16x1xf32>, vector<16x15xf32> -> vector<16x16xf32>
    %cst_28 = arith.constant 0.000000e+00 : f32
    %87 = vector.broadcast %cst_28 : f32 to vector<1x16xf32>
    %88 = vector.extract_strided_slice %80 {offsets = [0, 0], sizes = [15, 16], strides = [1, 1]} : vector<16x16xf32> to vector<15x16xf32>
    %89 = tpu.concatenate %87, %88 in 0 : vector<1x16xf32>, vector<15x16xf32> -> vector<16x16xf32>
    %cst_29 = arith.constant 0.000000e+00 : f32
    %90 = vector.broadcast %cst_29 : f32 to vector<1x16xf32>
    %91 = vector.extract_strided_slice %80 {offsets = [0, 0], sizes = [15, 16], strides = [1, 1]} : vector<16x16xf32> to vector<15x16xf32>
    %92 = tpu.concatenate %90, %91 in 0 : vector<1x16xf32>, vector<15x16xf32> -> vector<16x16xf32>
    %cst_30 = arith.constant 0.000000e+00 : f32
    %93 = vector.broadcast %cst_30 : f32 to vector<16x1xf32>
    %94 = vector.extract_strided_slice %92 {offsets = [0, 1], sizes = [16, 15], strides = [1, 1]} : vector<16x16xf32> to vector<16x15xf32>
    %95 = tpu.concatenate %94, %93 in 1 : vector<16x15xf32>, vector<16x1xf32> -> vector<16x16xf32>
    %cst_31 = arith.constant 0.000000e+00 : f32
    %96 = vector.broadcast %cst_31 : f32 to vector<16x1xf32>
    %97 = vector.extract_strided_slice %80 {offsets = [0, 0], sizes = [16, 15], strides = [1, 1]} : vector<16x16xf32> to vector<16x15xf32>
    %98 = tpu.concatenate %96, %97 in 1 : vector<16x1xf32>, vector<16x15xf32> -> vector<16x16xf32>
    %cst_32 = arith.constant 0.000000e+00 : f32
    %99 = vector.broadcast %cst_32 : f32 to vector<16x1xf32>
    %100 = vector.extract_strided_slice %80 {offsets = [0, 1], sizes = [16, 15], strides = [1, 1]} : vector<16x16xf32> to vector<16x15xf32>
    %101 = tpu.concatenate %100, %99 in 1 : vector<16x15xf32>, vector<16x1xf32> -> vector<16x16xf32>
    %cst_33 = arith.constant 0.000000e+00 : f32
    %102 = vector.broadcast %cst_33 : f32 to vector<1x16xf32>
    %103 = vector.extract_strided_slice %80 {offsets = [1, 0], sizes = [15, 16], strides = [1, 1]} : vector<16x16xf32> to vector<15x16xf32>
    %104 = tpu.concatenate %103, %102 in 0 : vector<15x16xf32>, vector<1x16xf32> -> vector<16x16xf32>
    %cst_34 = arith.constant 0.000000e+00 : f32
    %105 = vector.broadcast %cst_34 : f32 to vector<16x1xf32>
    %106 = vector.extract_strided_slice %104 {offsets = [0, 0], sizes = [16, 15], strides = [1, 1]} : vector<16x16xf32> to vector<16x15xf32>
    %107 = tpu.concatenate %105, %106 in 1 : vector<16x1xf32>, vector<16x15xf32> -> vector<16x16xf32>
    %cst_35 = arith.constant 0.000000e+00 : f32
    %108 = vector.broadcast %cst_35 : f32 to vector<1x16xf32>
    %109 = vector.extract_strided_slice %80 {offsets = [1, 0], sizes = [15, 16], strides = [1, 1]} : vector<16x16xf32> to vector<15x16xf32>
    %110 = tpu.concatenate %109, %108 in 0 : vector<15x16xf32>, vector<1x16xf32> -> vector<16x16xf32>
    %cst_36 = arith.constant 0.000000e+00 : f32
    %111 = vector.broadcast %cst_36 : f32 to vector<1x16xf32>
    %112 = vector.extract_strided_slice %80 {offsets = [1, 0], sizes = [15, 16], strides = [1, 1]} : vector<16x16xf32> to vector<15x16xf32>
    %113 = tpu.concatenate %112, %111 in 0 : vector<15x16xf32>, vector<1x16xf32> -> vector<16x16xf32>
    %cst_37 = arith.constant 0.000000e+00 : f32
    %114 = vector.broadcast %cst_37 : f32 to vector<16x1xf32>
    %115 = vector.extract_strided_slice %113 {offsets = [0, 1], sizes = [16, 15], strides = [1, 1]} : vector<16x16xf32> to vector<16x15xf32>
    %116 = tpu.concatenate %115, %114 in 1 : vector<16x15xf32>, vector<16x1xf32> -> vector<16x16xf32>
    %117 = vector.extract_strided_slice %2 {offsets = [3, 0, 0], sizes = [1, 16, 16], strides = [1, 1, 1]} : vector<4x16x16xf32> to vector<1x16x16xf32>
    %118 = vector.shape_cast %117 : vector<1x16x16xf32> to vector<16x16xf32>
    %cst_38 = arith.constant 0.000000e+00 : f32
    %119 = vector.broadcast %cst_38 : f32 to vector<1x16xf32>
    %120 = vector.extract_strided_slice %118 {offsets = [0, 0], sizes = [15, 16], strides = [1, 1]} : vector<16x16xf32> to vector<15x16xf32>
    %121 = tpu.concatenate %119, %120 in 0 : vector<1x16xf32>, vector<15x16xf32> -> vector<16x16xf32>
    %cst_39 = arith.constant 0.000000e+00 : f32
    %122 = vector.broadcast %cst_39 : f32 to vector<16x1xf32>
    %123 = vector.extract_strided_slice %121 {offsets = [0, 0], sizes = [16, 15], strides = [1, 1]} : vector<16x16xf32> to vector<16x15xf32>
    %124 = tpu.concatenate %122, %123 in 1 : vector<16x1xf32>, vector<16x15xf32> -> vector<16x16xf32>
    %cst_40 = arith.constant 0.000000e+00 : f32
    %125 = vector.broadcast %cst_40 : f32 to vector<1x16xf32>
    %126 = vector.extract_strided_slice %118 {offsets = [0, 0], sizes = [15, 16], strides = [1, 1]} : vector<16x16xf32> to vector<15x16xf32>
    %127 = tpu.concatenate %125, %126 in 0 : vector<1x16xf32>, vector<15x16xf32> -> vector<16x16xf32>
    %cst_41 = arith.constant 0.000000e+00 : f32
    %128 = vector.broadcast %cst_41 : f32 to vector<1x16xf32>
    %129 = vector.extract_strided_slice %118 {offsets = [0, 0], sizes = [15, 16], strides = [1, 1]} : vector<16x16xf32> to vector<15x16xf32>
    %130 = tpu.concatenate %128, %129 in 0 : vector<1x16xf32>, vector<15x16xf32> -> vector<16x16xf32>
    %cst_42 = arith.constant 0.000000e+00 : f32
    %131 = vector.broadcast %cst_42 : f32 to vector<16x1xf32>
    %132 = vector.extract_strided_slice %130 {offsets = [0, 1], sizes = [16, 15], strides = [1, 1]} : vector<16x16xf32> to vector<16x15xf32>
    %133 = tpu.concatenate %132, %131 in 1 : vector<16x15xf32>, vector<16x1xf32> -> vector<16x16xf32>
    %cst_43 = arith.constant 0.000000e+00 : f32
    %134 = vector.broadcast %cst_43 : f32 to vector<16x1xf32>
    %135 = vector.extract_strided_slice %118 {offsets = [0, 0], sizes = [16, 15], strides = [1, 1]} : vector<16x16xf32> to vector<16x15xf32>
    %136 = tpu.concatenate %134, %135 in 1 : vector<16x1xf32>, vector<16x15xf32> -> vector<16x16xf32>
    %cst_44 = arith.constant 0.000000e+00 : f32
    %137 = vector.broadcast %cst_44 : f32 to vector<16x1xf32>
    %138 = vector.extract_strided_slice %118 {offsets = [0, 1], sizes = [16, 15], strides = [1, 1]} : vector<16x16xf32> to vector<16x15xf32>
    %139 = tpu.concatenate %138, %137 in 1 : vector<16x15xf32>, vector<16x1xf32> -> vector<16x16xf32>
    %cst_45 = arith.constant 0.000000e+00 : f32
    %140 = vector.broadcast %cst_45 : f32 to vector<1x16xf32>
    %141 = vector.extract_strided_slice %118 {offsets = [1, 0], sizes = [15, 16], strides = [1, 1]} : vector<16x16xf32> to vector<15x16xf32>
    %142 = tpu.concatenate %141, %140 in 0 : vector<15x16xf32>, vector<1x16xf32> -> vector<16x16xf32>
    %cst_46 = arith.constant 0.000000e+00 : f32
    %143 = vector.broadcast %cst_46 : f32 to vector<16x1xf32>
    %144 = vector.extract_strided_slice %142 {offsets = [0, 0], sizes = [16, 15], strides = [1, 1]} : vector<16x16xf32> to vector<16x15xf32>
    %145 = tpu.concatenate %143, %144 in 1 : vector<16x1xf32>, vector<16x15xf32> -> vector<16x16xf32>
    %cst_47 = arith.constant 0.000000e+00 : f32
    %146 = vector.broadcast %cst_47 : f32 to vector<1x16xf32>
    %147 = vector.extract_strided_slice %118 {offsets = [1, 0], sizes = [15, 16], strides = [1, 1]} : vector<16x16xf32> to vector<15x16xf32>
    %148 = tpu.concatenate %147, %146 in 0 : vector<15x16xf32>, vector<1x16xf32> -> vector<16x16xf32>
    %cst_48 = arith.constant 0.000000e+00 : f32
    %149 = vector.broadcast %cst_48 : f32 to vector<1x16xf32>
    %150 = vector.extract_strided_slice %118 {offsets = [1, 0], sizes = [15, 16], strides = [1, 1]} : vector<16x16xf32> to vector<15x16xf32>
    %151 = tpu.concatenate %150, %149 in 0 : vector<15x16xf32>, vector<1x16xf32> -> vector<16x16xf32>
    %cst_49 = arith.constant 0.000000e+00 : f32
    %152 = vector.broadcast %cst_49 : f32 to vector<16x1xf32>
    %153 = vector.extract_strided_slice %151 {offsets = [0, 1], sizes = [16, 15], strides = [1, 1]} : vector<16x16xf32> to vector<16x15xf32>
    %154 = tpu.concatenate %153, %152 in 1 : vector<16x15xf32>, vector<16x1xf32> -> vector<16x16xf32>
    %155 = tpu.iota {dimensions = array<i32: 0>} : vector<16x32xi32>
    %156 = tpu.iota {dimensions = array<i32: 1>} : vector<16x32xi32>
    %c2_i32 = arith.constant 2 : i32
    %157 = vector.broadcast %c2_i32 : i32 to vector<16x32xi32>
    %158 = arith.muli %157, %155 : vector<16x32xi32>
    %159 = arith.cmpi eq, %156, %158 : vector<16x32xi32>
    %160 = arith.extui %159 : vector<16x32xi1> to vector<16x32xi32>
    %161 = arith.sitofp %160 : vector<16x32xi32> to vector<16x32xf32>
    %162 = arith.truncf %161 : vector<16x32xf32> to vector<16x32xbf16>
    %c2_i32_50 = arith.constant 2 : i32
    %163 = vector.broadcast %c2_i32_50 : i32 to vector<16x32xi32>
    %164 = arith.muli %163, %155 : vector<16x32xi32>
    %c1_i32 = arith.constant 1 : i32
    %165 = vector.broadcast %c1_i32 : i32 to vector<16x32xi32>
    %166 = arith.addi %164, %165 : vector<16x32xi32>
    %167 = arith.cmpi eq, %156, %166 : vector<16x32xi32>
    %168 = arith.extui %167 : vector<16x32xi1> to vector<16x32xi32>
    %169 = arith.sitofp %168 : vector<16x32xi32> to vector<16x32xf32>
    %170 = arith.truncf %169 : vector<16x32xf32> to vector<16x32xbf16>
    %171 = tpu.iota {dimensions = array<i32: 0>} : vector<32x16xi32>
    %172 = tpu.iota {dimensions = array<i32: 1>} : vector<32x16xi32>
    %c2_i32_51 = arith.constant 2 : i32
    %173 = vector.broadcast %c2_i32_51 : i32 to vector<32x16xi32>
    %174 = arith.muli %173, %172 : vector<32x16xi32>
    %175 = arith.cmpi eq, %171, %174 : vector<32x16xi32>
    %176 = arith.extui %175 : vector<32x16xi1> to vector<32x16xi32>
    %177 = arith.sitofp %176 : vector<32x16xi32> to vector<32x16xf32>
    %178 = arith.truncf %177 : vector<32x16xf32> to vector<32x16xbf16>
    %c2_i32_52 = arith.constant 2 : i32
    %179 = vector.broadcast %c2_i32_52 : i32 to vector<32x16xi32>
    %180 = arith.muli %179, %172 : vector<32x16xi32>
    %c1_i32_53 = arith.constant 1 : i32
    %181 = vector.broadcast %c1_i32_53 : i32 to vector<32x16xi32>
    %182 = arith.addi %180, %181 : vector<32x16xi32>
    %183 = arith.cmpi eq, %171, %182 : vector<32x16xi32>
    %184 = arith.extui %183 : vector<32x16xi1> to vector<32x16xi32>
    %185 = arith.sitofp %184 : vector<32x16xi32> to vector<32x16xf32>
    %186 = arith.truncf %185 : vector<32x16xf32> to vector<32x16xbf16>
    %cst_54 = arith.constant 0.000000e+00 : f32
    %187 = vector.broadcast %cst_54 : f32 to vector<16x16xf32>
    %cst_55 = arith.constant 0.000000e+00 : f32
    %188 = vector.broadcast %cst_55 : f32 to vector<16x16xf32>
    %cst_56 = arith.constant 0.000000e+00 : f32
    %189 = vector.broadcast %cst_56 : f32 to vector<16x16xf32>
    %cst_57 = arith.constant 0.000000e+00 : f32
    %190 = vector.broadcast %cst_57 : f32 to vector<16x16xf32>
    %c0_58 = arith.constant 0 : index
    %191 = memref.load %arg2[%c0_58] : memref<288xf32, #tpu.memory_space<smem>>
    %192 = vector.broadcast %191 : f32 to vector<16x16xf32>
    %193 = arith.mulf %192, %10 : vector<16x16xf32>
    %194 = arith.addf %187, %193 : vector<16x16xf32>
    %c36 = arith.constant 36 : index
    %195 = memref.load %arg2[%c36] : memref<288xf32, #tpu.memory_space<smem>>
    %196 = vector.broadcast %195 : f32 to vector<16x16xf32>
    %197 = arith.mulf %196, %10 : vector<16x16xf32>
    %198 = arith.addf %188, %197 : vector<16x16xf32>
    %c72 = arith.constant 72 : index
    %199 = memref.load %arg2[%c72] : memref<288xf32, #tpu.memory_space<smem>>
    %200 = vector.broadcast %199 : f32 to vector<16x16xf32>
    %201 = arith.mulf %200, %10 : vector<16x16xf32>
    %202 = arith.addf %189, %201 : vector<16x16xf32>
    %c108 = arith.constant 108 : index
    %203 = memref.load %arg2[%c108] : memref<288xf32, #tpu.memory_space<smem>>
    %204 = vector.broadcast %203 : f32 to vector<16x16xf32>
    %205 = arith.mulf %204, %10 : vector<16x16xf32>
    %206 = arith.addf %190, %205 : vector<16x16xf32>
    %c1 = arith.constant 1 : index
    %207 = memref.load %arg2[%c1] : memref<288xf32, #tpu.memory_space<smem>>
    %208 = vector.broadcast %207 : f32 to vector<16x16xf32>
    %209 = arith.mulf %208, %13 : vector<16x16xf32>
    %210 = arith.addf %194, %209 : vector<16x16xf32>
    %c37 = arith.constant 37 : index
    %211 = memref.load %arg2[%c37] : memref<288xf32, #tpu.memory_space<smem>>
    %212 = vector.broadcast %211 : f32 to vector<16x16xf32>
    %213 = arith.mulf %212, %13 : vector<16x16xf32>
    %214 = arith.addf %198, %213 : vector<16x16xf32>
    %c73 = arith.constant 73 : index
    %215 = memref.load %arg2[%c73] : memref<288xf32, #tpu.memory_space<smem>>
    %216 = vector.broadcast %215 : f32 to vector<16x16xf32>
    %217 = arith.mulf %216, %13 : vector<16x16xf32>
    %218 = arith.addf %202, %217 : vector<16x16xf32>
    %c109 = arith.constant 109 : index
    %219 = memref.load %arg2[%c109] : memref<288xf32, #tpu.memory_space<smem>>
    %220 = vector.broadcast %219 : f32 to vector<16x16xf32>
    %221 = arith.mulf %220, %13 : vector<16x16xf32>
    %222 = arith.addf %206, %221 : vector<16x16xf32>
    %c2 = arith.constant 2 : index
    %223 = memref.load %arg2[%c2] : memref<288xf32, #tpu.memory_space<smem>>
    %224 = vector.broadcast %223 : f32 to vector<16x16xf32>
    %225 = arith.mulf %224, %19 : vector<16x16xf32>
    %226 = arith.addf %210, %225 : vector<16x16xf32>
    %c38 = arith.constant 38 : index
    %227 = memref.load %arg2[%c38] : memref<288xf32, #tpu.memory_space<smem>>
    %228 = vector.broadcast %227 : f32 to vector<16x16xf32>
    %229 = arith.mulf %228, %19 : vector<16x16xf32>
    %230 = arith.addf %214, %229 : vector<16x16xf32>
    %c74 = arith.constant 74 : index
    %231 = memref.load %arg2[%c74] : memref<288xf32, #tpu.memory_space<smem>>
    %232 = vector.broadcast %231 : f32 to vector<16x16xf32>
    %233 = arith.mulf %232, %19 : vector<16x16xf32>
    %234 = arith.addf %218, %233 : vector<16x16xf32>
    %c110 = arith.constant 110 : index
    %235 = memref.load %arg2[%c110] : memref<288xf32, #tpu.memory_space<smem>>
    %236 = vector.broadcast %235 : f32 to vector<16x16xf32>
    %237 = arith.mulf %236, %19 : vector<16x16xf32>
    %238 = arith.addf %222, %237 : vector<16x16xf32>
    %c3 = arith.constant 3 : index
    %239 = memref.load %arg2[%c3] : memref<288xf32, #tpu.memory_space<smem>>
    %240 = vector.broadcast %239 : f32 to vector<16x16xf32>
    %241 = arith.mulf %240, %22 : vector<16x16xf32>
    %242 = arith.addf %226, %241 : vector<16x16xf32>
    %c39 = arith.constant 39 : index
    %243 = memref.load %arg2[%c39] : memref<288xf32, #tpu.memory_space<smem>>
    %244 = vector.broadcast %243 : f32 to vector<16x16xf32>
    %245 = arith.mulf %244, %22 : vector<16x16xf32>
    %246 = arith.addf %230, %245 : vector<16x16xf32>
    %c75 = arith.constant 75 : index
    %247 = memref.load %arg2[%c75] : memref<288xf32, #tpu.memory_space<smem>>
    %248 = vector.broadcast %247 : f32 to vector<16x16xf32>
    %249 = arith.mulf %248, %22 : vector<16x16xf32>
    %250 = arith.addf %234, %249 : vector<16x16xf32>
    %c111 = arith.constant 111 : index
    %251 = memref.load %arg2[%c111] : memref<288xf32, #tpu.memory_space<smem>>
    %252 = vector.broadcast %251 : f32 to vector<16x16xf32>
    %253 = arith.mulf %252, %22 : vector<16x16xf32>
    %254 = arith.addf %238, %253 : vector<16x16xf32>
    %c4 = arith.constant 4 : index
    %255 = memref.load %arg2[%c4] : memref<288xf32, #tpu.memory_space<smem>>
    %256 = vector.broadcast %255 : f32 to vector<16x16xf32>
    %257 = arith.mulf %256, %4 : vector<16x16xf32>
    %258 = arith.addf %242, %257 : vector<16x16xf32>
    %c40 = arith.constant 40 : index
    %259 = memref.load %arg2[%c40] : memref<288xf32, #tpu.memory_space<smem>>
    %260 = vector.broadcast %259 : f32 to vector<16x16xf32>
    %261 = arith.mulf %260, %4 : vector<16x16xf32>
    %262 = arith.addf %246, %261 : vector<16x16xf32>
    %c76 = arith.constant 76 : index
    %263 = memref.load %arg2[%c76] : memref<288xf32, #tpu.memory_space<smem>>
    %264 = vector.broadcast %263 : f32 to vector<16x16xf32>
    %265 = arith.mulf %264, %4 : vector<16x16xf32>
    %266 = arith.addf %250, %265 : vector<16x16xf32>
    %c112 = arith.constant 112 : index
    %267 = memref.load %arg2[%c112] : memref<288xf32, #tpu.memory_space<smem>>
    %268 = vector.broadcast %267 : f32 to vector<16x16xf32>
    %269 = arith.mulf %268, %4 : vector<16x16xf32>
    %270 = arith.addf %254, %269 : vector<16x16xf32>
    %c5 = arith.constant 5 : index
    %271 = memref.load %arg2[%c5] : memref<288xf32, #tpu.memory_space<smem>>
    %272 = vector.broadcast %271 : f32 to vector<16x16xf32>
    %273 = arith.mulf %272, %25 : vector<16x16xf32>
    %274 = arith.addf %258, %273 : vector<16x16xf32>
    %c41 = arith.constant 41 : index
    %275 = memref.load %arg2[%c41] : memref<288xf32, #tpu.memory_space<smem>>
    %276 = vector.broadcast %275 : f32 to vector<16x16xf32>
    %277 = arith.mulf %276, %25 : vector<16x16xf32>
    %278 = arith.addf %262, %277 : vector<16x16xf32>
    %c77 = arith.constant 77 : index
    %279 = memref.load %arg2[%c77] : memref<288xf32, #tpu.memory_space<smem>>
    %280 = vector.broadcast %279 : f32 to vector<16x16xf32>
    %281 = arith.mulf %280, %25 : vector<16x16xf32>
    %282 = arith.addf %266, %281 : vector<16x16xf32>
    %c113 = arith.constant 113 : index
    %283 = memref.load %arg2[%c113] : memref<288xf32, #tpu.memory_space<smem>>
    %284 = vector.broadcast %283 : f32 to vector<16x16xf32>
    %285 = arith.mulf %284, %25 : vector<16x16xf32>
    %286 = arith.addf %270, %285 : vector<16x16xf32>
    %c6 = arith.constant 6 : index
    %287 = memref.load %arg2[%c6] : memref<288xf32, #tpu.memory_space<smem>>
    %288 = vector.broadcast %287 : f32 to vector<16x16xf32>
    %289 = arith.mulf %288, %31 : vector<16x16xf32>
    %290 = arith.addf %274, %289 : vector<16x16xf32>
    %c42 = arith.constant 42 : index
    %291 = memref.load %arg2[%c42] : memref<288xf32, #tpu.memory_space<smem>>
    %292 = vector.broadcast %291 : f32 to vector<16x16xf32>
    %293 = arith.mulf %292, %31 : vector<16x16xf32>
    %294 = arith.addf %278, %293 : vector<16x16xf32>
    %c78 = arith.constant 78 : index
    %295 = memref.load %arg2[%c78] : memref<288xf32, #tpu.memory_space<smem>>
    %296 = vector.broadcast %295 : f32 to vector<16x16xf32>
    %297 = arith.mulf %296, %31 : vector<16x16xf32>
    %298 = arith.addf %282, %297 : vector<16x16xf32>
    %c114 = arith.constant 114 : index
    %299 = memref.load %arg2[%c114] : memref<288xf32, #tpu.memory_space<smem>>
    %300 = vector.broadcast %299 : f32 to vector<16x16xf32>
    %301 = arith.mulf %300, %31 : vector<16x16xf32>
    %302 = arith.addf %286, %301 : vector<16x16xf32>
    %c7 = arith.constant 7 : index
    %303 = memref.load %arg2[%c7] : memref<288xf32, #tpu.memory_space<smem>>
    %304 = vector.broadcast %303 : f32 to vector<16x16xf32>
    %305 = arith.mulf %304, %34 : vector<16x16xf32>
    %306 = arith.addf %290, %305 : vector<16x16xf32>
    %c43 = arith.constant 43 : index
    %307 = memref.load %arg2[%c43] : memref<288xf32, #tpu.memory_space<smem>>
    %308 = vector.broadcast %307 : f32 to vector<16x16xf32>
    %309 = arith.mulf %308, %34 : vector<16x16xf32>
    %310 = arith.addf %294, %309 : vector<16x16xf32>
    %c79 = arith.constant 79 : index
    %311 = memref.load %arg2[%c79] : memref<288xf32, #tpu.memory_space<smem>>
    %312 = vector.broadcast %311 : f32 to vector<16x16xf32>
    %313 = arith.mulf %312, %34 : vector<16x16xf32>
    %314 = arith.addf %298, %313 : vector<16x16xf32>
    %c115 = arith.constant 115 : index
    %315 = memref.load %arg2[%c115] : memref<288xf32, #tpu.memory_space<smem>>
    %316 = vector.broadcast %315 : f32 to vector<16x16xf32>
    %317 = arith.mulf %316, %34 : vector<16x16xf32>
    %318 = arith.addf %302, %317 : vector<16x16xf32>
    %c8 = arith.constant 8 : index
    %319 = memref.load %arg2[%c8] : memref<288xf32, #tpu.memory_space<smem>>
    %320 = vector.broadcast %319 : f32 to vector<16x16xf32>
    %321 = arith.mulf %320, %40 : vector<16x16xf32>
    %322 = arith.addf %306, %321 : vector<16x16xf32>
    %c44 = arith.constant 44 : index
    %323 = memref.load %arg2[%c44] : memref<288xf32, #tpu.memory_space<smem>>
    %324 = vector.broadcast %323 : f32 to vector<16x16xf32>
    %325 = arith.mulf %324, %40 : vector<16x16xf32>
    %326 = arith.addf %310, %325 : vector<16x16xf32>
    %c80 = arith.constant 80 : index
    %327 = memref.load %arg2[%c80] : memref<288xf32, #tpu.memory_space<smem>>
    %328 = vector.broadcast %327 : f32 to vector<16x16xf32>
    %329 = arith.mulf %328, %40 : vector<16x16xf32>
    %330 = arith.addf %314, %329 : vector<16x16xf32>
    %c116 = arith.constant 116 : index
    %331 = memref.load %arg2[%c116] : memref<288xf32, #tpu.memory_space<smem>>
    %332 = vector.broadcast %331 : f32 to vector<16x16xf32>
    %333 = arith.mulf %332, %40 : vector<16x16xf32>
    %334 = arith.addf %318, %333 : vector<16x16xf32>
    %c9 = arith.constant 9 : index
    %335 = memref.load %arg2[%c9] : memref<288xf32, #tpu.memory_space<smem>>
    %336 = vector.broadcast %335 : f32 to vector<16x16xf32>
    %337 = arith.mulf %336, %48 : vector<16x16xf32>
    %338 = arith.addf %322, %337 : vector<16x16xf32>
    %c45 = arith.constant 45 : index
    %339 = memref.load %arg2[%c45] : memref<288xf32, #tpu.memory_space<smem>>
    %340 = vector.broadcast %339 : f32 to vector<16x16xf32>
    %341 = arith.mulf %340, %48 : vector<16x16xf32>
    %342 = arith.addf %326, %341 : vector<16x16xf32>
    %c81 = arith.constant 81 : index
    %343 = memref.load %arg2[%c81] : memref<288xf32, #tpu.memory_space<smem>>
    %344 = vector.broadcast %343 : f32 to vector<16x16xf32>
    %345 = arith.mulf %344, %48 : vector<16x16xf32>
    %346 = arith.addf %330, %345 : vector<16x16xf32>
    %c117 = arith.constant 117 : index
    %347 = memref.load %arg2[%c117] : memref<288xf32, #tpu.memory_space<smem>>
    %348 = vector.broadcast %347 : f32 to vector<16x16xf32>
    %349 = arith.mulf %348, %48 : vector<16x16xf32>
    %350 = arith.addf %334, %349 : vector<16x16xf32>
    %c10 = arith.constant 10 : index
    %351 = memref.load %arg2[%c10] : memref<288xf32, #tpu.memory_space<smem>>
    %352 = vector.broadcast %351 : f32 to vector<16x16xf32>
    %353 = arith.mulf %352, %51 : vector<16x16xf32>
    %354 = arith.addf %338, %353 : vector<16x16xf32>
    %c46 = arith.constant 46 : index
    %355 = memref.load %arg2[%c46] : memref<288xf32, #tpu.memory_space<smem>>
    %356 = vector.broadcast %355 : f32 to vector<16x16xf32>
    %357 = arith.mulf %356, %51 : vector<16x16xf32>
    %358 = arith.addf %342, %357 : vector<16x16xf32>
    %c82 = arith.constant 82 : index
    %359 = memref.load %arg2[%c82] : memref<288xf32, #tpu.memory_space<smem>>
    %360 = vector.broadcast %359 : f32 to vector<16x16xf32>
    %361 = arith.mulf %360, %51 : vector<16x16xf32>
    %362 = arith.addf %346, %361 : vector<16x16xf32>
    %c118 = arith.constant 118 : index
    %363 = memref.load %arg2[%c118] : memref<288xf32, #tpu.memory_space<smem>>
    %364 = vector.broadcast %363 : f32 to vector<16x16xf32>
    %365 = arith.mulf %364, %51 : vector<16x16xf32>
    %366 = arith.addf %350, %365 : vector<16x16xf32>
    %c11 = arith.constant 11 : index
    %367 = memref.load %arg2[%c11] : memref<288xf32, #tpu.memory_space<smem>>
    %368 = vector.broadcast %367 : f32 to vector<16x16xf32>
    %369 = arith.mulf %368, %57 : vector<16x16xf32>
    %370 = arith.addf %354, %369 : vector<16x16xf32>
    %c47 = arith.constant 47 : index
    %371 = memref.load %arg2[%c47] : memref<288xf32, #tpu.memory_space<smem>>
    %372 = vector.broadcast %371 : f32 to vector<16x16xf32>
    %373 = arith.mulf %372, %57 : vector<16x16xf32>
    %374 = arith.addf %358, %373 : vector<16x16xf32>
    %c83 = arith.constant 83 : index
    %375 = memref.load %arg2[%c83] : memref<288xf32, #tpu.memory_space<smem>>
    %376 = vector.broadcast %375 : f32 to vector<16x16xf32>
    %377 = arith.mulf %376, %57 : vector<16x16xf32>
    %378 = arith.addf %362, %377 : vector<16x16xf32>
    %c119 = arith.constant 119 : index
    %379 = memref.load %arg2[%c119] : memref<288xf32, #tpu.memory_space<smem>>
    %380 = vector.broadcast %379 : f32 to vector<16x16xf32>
    %381 = arith.mulf %380, %57 : vector<16x16xf32>
    %382 = arith.addf %366, %381 : vector<16x16xf32>
    %c12 = arith.constant 12 : index
    %383 = memref.load %arg2[%c12] : memref<288xf32, #tpu.memory_space<smem>>
    %384 = vector.broadcast %383 : f32 to vector<16x16xf32>
    %385 = arith.mulf %384, %60 : vector<16x16xf32>
    %386 = arith.addf %370, %385 : vector<16x16xf32>
    %c48 = arith.constant 48 : index
    %387 = memref.load %arg2[%c48] : memref<288xf32, #tpu.memory_space<smem>>
    %388 = vector.broadcast %387 : f32 to vector<16x16xf32>
    %389 = arith.mulf %388, %60 : vector<16x16xf32>
    %390 = arith.addf %374, %389 : vector<16x16xf32>
    %c84 = arith.constant 84 : index
    %391 = memref.load %arg2[%c84] : memref<288xf32, #tpu.memory_space<smem>>
    %392 = vector.broadcast %391 : f32 to vector<16x16xf32>
    %393 = arith.mulf %392, %60 : vector<16x16xf32>
    %394 = arith.addf %378, %393 : vector<16x16xf32>
    %c120 = arith.constant 120 : index
    %395 = memref.load %arg2[%c120] : memref<288xf32, #tpu.memory_space<smem>>
    %396 = vector.broadcast %395 : f32 to vector<16x16xf32>
    %397 = arith.mulf %396, %60 : vector<16x16xf32>
    %398 = arith.addf %382, %397 : vector<16x16xf32>
    %c13 = arith.constant 13 : index
    %399 = memref.load %arg2[%c13] : memref<288xf32, #tpu.memory_space<smem>>
    %400 = vector.broadcast %399 : f32 to vector<16x16xf32>
    %401 = arith.mulf %400, %42 : vector<16x16xf32>
    %402 = arith.addf %386, %401 : vector<16x16xf32>
    %c49 = arith.constant 49 : index
    %403 = memref.load %arg2[%c49] : memref<288xf32, #tpu.memory_space<smem>>
    %404 = vector.broadcast %403 : f32 to vector<16x16xf32>
    %405 = arith.mulf %404, %42 : vector<16x16xf32>
    %406 = arith.addf %390, %405 : vector<16x16xf32>
    %c85 = arith.constant 85 : index
    %407 = memref.load %arg2[%c85] : memref<288xf32, #tpu.memory_space<smem>>
    %408 = vector.broadcast %407 : f32 to vector<16x16xf32>
    %409 = arith.mulf %408, %42 : vector<16x16xf32>
    %410 = arith.addf %394, %409 : vector<16x16xf32>
    %c121 = arith.constant 121 : index
    %411 = memref.load %arg2[%c121] : memref<288xf32, #tpu.memory_space<smem>>
    %412 = vector.broadcast %411 : f32 to vector<16x16xf32>
    %413 = arith.mulf %412, %42 : vector<16x16xf32>
    %414 = arith.addf %398, %413 : vector<16x16xf32>
    %c14 = arith.constant 14 : index
    %415 = memref.load %arg2[%c14] : memref<288xf32, #tpu.memory_space<smem>>
    %416 = vector.broadcast %415 : f32 to vector<16x16xf32>
    %417 = arith.mulf %416, %63 : vector<16x16xf32>
    %418 = arith.addf %402, %417 : vector<16x16xf32>
    %c50 = arith.constant 50 : index
    %419 = memref.load %arg2[%c50] : memref<288xf32, #tpu.memory_space<smem>>
    %420 = vector.broadcast %419 : f32 to vector<16x16xf32>
    %421 = arith.mulf %420, %63 : vector<16x16xf32>
    %422 = arith.addf %406, %421 : vector<16x16xf32>
    %c86 = arith.constant 86 : index
    %423 = memref.load %arg2[%c86] : memref<288xf32, #tpu.memory_space<smem>>
    %424 = vector.broadcast %423 : f32 to vector<16x16xf32>
    %425 = arith.mulf %424, %63 : vector<16x16xf32>
    %426 = arith.addf %410, %425 : vector<16x16xf32>
    %c122 = arith.constant 122 : index
    %427 = memref.load %arg2[%c122] : memref<288xf32, #tpu.memory_space<smem>>
    %428 = vector.broadcast %427 : f32 to vector<16x16xf32>
    %429 = arith.mulf %428, %63 : vector<16x16xf32>
    %430 = arith.addf %414, %429 : vector<16x16xf32>
    %c15 = arith.constant 15 : index
    %431 = memref.load %arg2[%c15] : memref<288xf32, #tpu.memory_space<smem>>
    %432 = vector.broadcast %431 : f32 to vector<16x16xf32>
    %433 = arith.mulf %432, %69 : vector<16x16xf32>
    %434 = arith.addf %418, %433 : vector<16x16xf32>
    %c51 = arith.constant 51 : index
    %435 = memref.load %arg2[%c51] : memref<288xf32, #tpu.memory_space<smem>>
    %436 = vector.broadcast %435 : f32 to vector<16x16xf32>
    %437 = arith.mulf %436, %69 : vector<16x16xf32>
    %438 = arith.addf %422, %437 : vector<16x16xf32>
    %c87 = arith.constant 87 : index
    %439 = memref.load %arg2[%c87] : memref<288xf32, #tpu.memory_space<smem>>
    %440 = vector.broadcast %439 : f32 to vector<16x16xf32>
    %441 = arith.mulf %440, %69 : vector<16x16xf32>
    %442 = arith.addf %426, %441 : vector<16x16xf32>
    %c123 = arith.constant 123 : index
    %443 = memref.load %arg2[%c123] : memref<288xf32, #tpu.memory_space<smem>>
    %444 = vector.broadcast %443 : f32 to vector<16x16xf32>
    %445 = arith.mulf %444, %69 : vector<16x16xf32>
    %446 = arith.addf %430, %445 : vector<16x16xf32>
    %c16 = arith.constant 16 : index
    %447 = memref.load %arg2[%c16] : memref<288xf32, #tpu.memory_space<smem>>
    %448 = vector.broadcast %447 : f32 to vector<16x16xf32>
    %449 = arith.mulf %448, %72 : vector<16x16xf32>
    %450 = arith.addf %434, %449 : vector<16x16xf32>
    %c52 = arith.constant 52 : index
    %451 = memref.load %arg2[%c52] : memref<288xf32, #tpu.memory_space<smem>>
    %452 = vector.broadcast %451 : f32 to vector<16x16xf32>
    %453 = arith.mulf %452, %72 : vector<16x16xf32>
    %454 = arith.addf %438, %453 : vector<16x16xf32>
    %c88 = arith.constant 88 : index
    %455 = memref.load %arg2[%c88] : memref<288xf32, #tpu.memory_space<smem>>
    %456 = vector.broadcast %455 : f32 to vector<16x16xf32>
    %457 = arith.mulf %456, %72 : vector<16x16xf32>
    %458 = arith.addf %442, %457 : vector<16x16xf32>
    %c124 = arith.constant 124 : index
    %459 = memref.load %arg2[%c124] : memref<288xf32, #tpu.memory_space<smem>>
    %460 = vector.broadcast %459 : f32 to vector<16x16xf32>
    %461 = arith.mulf %460, %72 : vector<16x16xf32>
    %462 = arith.addf %446, %461 : vector<16x16xf32>
    %c17 = arith.constant 17 : index
    %463 = memref.load %arg2[%c17] : memref<288xf32, #tpu.memory_space<smem>>
    %464 = vector.broadcast %463 : f32 to vector<16x16xf32>
    %465 = arith.mulf %464, %78 : vector<16x16xf32>
    %466 = arith.addf %450, %465 : vector<16x16xf32>
    %c53 = arith.constant 53 : index
    %467 = memref.load %arg2[%c53] : memref<288xf32, #tpu.memory_space<smem>>
    %468 = vector.broadcast %467 : f32 to vector<16x16xf32>
    %469 = arith.mulf %468, %78 : vector<16x16xf32>
    %470 = arith.addf %454, %469 : vector<16x16xf32>
    %c89 = arith.constant 89 : index
    %471 = memref.load %arg2[%c89] : memref<288xf32, #tpu.memory_space<smem>>
    %472 = vector.broadcast %471 : f32 to vector<16x16xf32>
    %473 = arith.mulf %472, %78 : vector<16x16xf32>
    %474 = arith.addf %458, %473 : vector<16x16xf32>
    %c125 = arith.constant 125 : index
    %475 = memref.load %arg2[%c125] : memref<288xf32, #tpu.memory_space<smem>>
    %476 = vector.broadcast %475 : f32 to vector<16x16xf32>
    %477 = arith.mulf %476, %78 : vector<16x16xf32>
    %478 = arith.addf %462, %477 : vector<16x16xf32>
    %c18 = arith.constant 18 : index
    %479 = memref.load %arg2[%c18] : memref<288xf32, #tpu.memory_space<smem>>
    %480 = vector.broadcast %479 : f32 to vector<16x16xf32>
    %481 = arith.mulf %480, %86 : vector<16x16xf32>
    %482 = arith.addf %466, %481 : vector<16x16xf32>
    %c54 = arith.constant 54 : index
    %483 = memref.load %arg2[%c54] : memref<288xf32, #tpu.memory_space<smem>>
    %484 = vector.broadcast %483 : f32 to vector<16x16xf32>
    %485 = arith.mulf %484, %86 : vector<16x16xf32>
    %486 = arith.addf %470, %485 : vector<16x16xf32>
    %c90 = arith.constant 90 : index
    %487 = memref.load %arg2[%c90] : memref<288xf32, #tpu.memory_space<smem>>
    %488 = vector.broadcast %487 : f32 to vector<16x16xf32>
    %489 = arith.mulf %488, %86 : vector<16x16xf32>
    %490 = arith.addf %474, %489 : vector<16x16xf32>
    %c126 = arith.constant 126 : index
    %491 = memref.load %arg2[%c126] : memref<288xf32, #tpu.memory_space<smem>>
    %492 = vector.broadcast %491 : f32 to vector<16x16xf32>
    %493 = arith.mulf %492, %86 : vector<16x16xf32>
    %494 = arith.addf %478, %493 : vector<16x16xf32>
    %c19 = arith.constant 19 : index
    %495 = memref.load %arg2[%c19] : memref<288xf32, #tpu.memory_space<smem>>
    %496 = vector.broadcast %495 : f32 to vector<16x16xf32>
    %497 = arith.mulf %496, %89 : vector<16x16xf32>
    %498 = arith.addf %482, %497 : vector<16x16xf32>
    %c55 = arith.constant 55 : index
    %499 = memref.load %arg2[%c55] : memref<288xf32, #tpu.memory_space<smem>>
    %500 = vector.broadcast %499 : f32 to vector<16x16xf32>
    %501 = arith.mulf %500, %89 : vector<16x16xf32>
    %502 = arith.addf %486, %501 : vector<16x16xf32>
    %c91 = arith.constant 91 : index
    %503 = memref.load %arg2[%c91] : memref<288xf32, #tpu.memory_space<smem>>
    %504 = vector.broadcast %503 : f32 to vector<16x16xf32>
    %505 = arith.mulf %504, %89 : vector<16x16xf32>
    %506 = arith.addf %490, %505 : vector<16x16xf32>
    %c127 = arith.constant 127 : index
    %507 = memref.load %arg2[%c127] : memref<288xf32, #tpu.memory_space<smem>>
    %508 = vector.broadcast %507 : f32 to vector<16x16xf32>
    %509 = arith.mulf %508, %89 : vector<16x16xf32>
    %510 = arith.addf %494, %509 : vector<16x16xf32>
    %c20 = arith.constant 20 : index
    %511 = memref.load %arg2[%c20] : memref<288xf32, #tpu.memory_space<smem>>
    %512 = vector.broadcast %511 : f32 to vector<16x16xf32>
    %513 = arith.mulf %512, %95 : vector<16x16xf32>
    %514 = arith.addf %498, %513 : vector<16x16xf32>
    %c56 = arith.constant 56 : index
    %515 = memref.load %arg2[%c56] : memref<288xf32, #tpu.memory_space<smem>>
    %516 = vector.broadcast %515 : f32 to vector<16x16xf32>
    %517 = arith.mulf %516, %95 : vector<16x16xf32>
    %518 = arith.addf %502, %517 : vector<16x16xf32>
    %c92 = arith.constant 92 : index
    %519 = memref.load %arg2[%c92] : memref<288xf32, #tpu.memory_space<smem>>
    %520 = vector.broadcast %519 : f32 to vector<16x16xf32>
    %521 = arith.mulf %520, %95 : vector<16x16xf32>
    %522 = arith.addf %506, %521 : vector<16x16xf32>
    %c128 = arith.constant 128 : index
    %523 = memref.load %arg2[%c128] : memref<288xf32, #tpu.memory_space<smem>>
    %524 = vector.broadcast %523 : f32 to vector<16x16xf32>
    %525 = arith.mulf %524, %95 : vector<16x16xf32>
    %526 = arith.addf %510, %525 : vector<16x16xf32>
    %c21 = arith.constant 21 : index
    %527 = memref.load %arg2[%c21] : memref<288xf32, #tpu.memory_space<smem>>
    %528 = vector.broadcast %527 : f32 to vector<16x16xf32>
    %529 = arith.mulf %528, %98 : vector<16x16xf32>
    %530 = arith.addf %514, %529 : vector<16x16xf32>
    %c57 = arith.constant 57 : index
    %531 = memref.load %arg2[%c57] : memref<288xf32, #tpu.memory_space<smem>>
    %532 = vector.broadcast %531 : f32 to vector<16x16xf32>
    %533 = arith.mulf %532, %98 : vector<16x16xf32>
    %534 = arith.addf %518, %533 : vector<16x16xf32>
    %c93 = arith.constant 93 : index
    %535 = memref.load %arg2[%c93] : memref<288xf32, #tpu.memory_space<smem>>
    %536 = vector.broadcast %535 : f32 to vector<16x16xf32>
    %537 = arith.mulf %536, %98 : vector<16x16xf32>
    %538 = arith.addf %522, %537 : vector<16x16xf32>
    %c129 = arith.constant 129 : index
    %539 = memref.load %arg2[%c129] : memref<288xf32, #tpu.memory_space<smem>>
    %540 = vector.broadcast %539 : f32 to vector<16x16xf32>
    %541 = arith.mulf %540, %98 : vector<16x16xf32>
    %542 = arith.addf %526, %541 : vector<16x16xf32>
    %c22 = arith.constant 22 : index
    %543 = memref.load %arg2[%c22] : memref<288xf32, #tpu.memory_space<smem>>
    %544 = vector.broadcast %543 : f32 to vector<16x16xf32>
    %545 = arith.mulf %544, %80 : vector<16x16xf32>
    %546 = arith.addf %530, %545 : vector<16x16xf32>
    %c58 = arith.constant 58 : index
    %547 = memref.load %arg2[%c58] : memref<288xf32, #tpu.memory_space<smem>>
    %548 = vector.broadcast %547 : f32 to vector<16x16xf32>
    %549 = arith.mulf %548, %80 : vector<16x16xf32>
    %550 = arith.addf %534, %549 : vector<16x16xf32>
    %c94 = arith.constant 94 : index
    %551 = memref.load %arg2[%c94] : memref<288xf32, #tpu.memory_space<smem>>
    %552 = vector.broadcast %551 : f32 to vector<16x16xf32>
    %553 = arith.mulf %552, %80 : vector<16x16xf32>
    %554 = arith.addf %538, %553 : vector<16x16xf32>
    %c130 = arith.constant 130 : index
    %555 = memref.load %arg2[%c130] : memref<288xf32, #tpu.memory_space<smem>>
    %556 = vector.broadcast %555 : f32 to vector<16x16xf32>
    %557 = arith.mulf %556, %80 : vector<16x16xf32>
    %558 = arith.addf %542, %557 : vector<16x16xf32>
    %c23 = arith.constant 23 : index
    %559 = memref.load %arg2[%c23] : memref<288xf32, #tpu.memory_space<smem>>
    %560 = vector.broadcast %559 : f32 to vector<16x16xf32>
    %561 = arith.mulf %560, %101 : vector<16x16xf32>
    %562 = arith.addf %546, %561 : vector<16x16xf32>
    %c59 = arith.constant 59 : index
    %563 = memref.load %arg2[%c59] : memref<288xf32, #tpu.memory_space<smem>>
    %564 = vector.broadcast %563 : f32 to vector<16x16xf32>
    %565 = arith.mulf %564, %101 : vector<16x16xf32>
    %566 = arith.addf %550, %565 : vector<16x16xf32>
    %c95 = arith.constant 95 : index
    %567 = memref.load %arg2[%c95] : memref<288xf32, #tpu.memory_space<smem>>
    %568 = vector.broadcast %567 : f32 to vector<16x16xf32>
    %569 = arith.mulf %568, %101 : vector<16x16xf32>
    %570 = arith.addf %554, %569 : vector<16x16xf32>
    %c131 = arith.constant 131 : index
    %571 = memref.load %arg2[%c131] : memref<288xf32, #tpu.memory_space<smem>>
    %572 = vector.broadcast %571 : f32 to vector<16x16xf32>
    %573 = arith.mulf %572, %101 : vector<16x16xf32>
    %574 = arith.addf %558, %573 : vector<16x16xf32>
    %c24 = arith.constant 24 : index
    %575 = memref.load %arg2[%c24] : memref<288xf32, #tpu.memory_space<smem>>
    %576 = vector.broadcast %575 : f32 to vector<16x16xf32>
    %577 = arith.mulf %576, %107 : vector<16x16xf32>
    %578 = arith.addf %562, %577 : vector<16x16xf32>
    %c60 = arith.constant 60 : index
    %579 = memref.load %arg2[%c60] : memref<288xf32, #tpu.memory_space<smem>>
    %580 = vector.broadcast %579 : f32 to vector<16x16xf32>
    %581 = arith.mulf %580, %107 : vector<16x16xf32>
    %582 = arith.addf %566, %581 : vector<16x16xf32>
    %c96 = arith.constant 96 : index
    %583 = memref.load %arg2[%c96] : memref<288xf32, #tpu.memory_space<smem>>
    %584 = vector.broadcast %583 : f32 to vector<16x16xf32>
    %585 = arith.mulf %584, %107 : vector<16x16xf32>
    %586 = arith.addf %570, %585 : vector<16x16xf32>
    %c132 = arith.constant 132 : index
    %587 = memref.load %arg2[%c132] : memref<288xf32, #tpu.memory_space<smem>>
    %588 = vector.broadcast %587 : f32 to vector<16x16xf32>
    %589 = arith.mulf %588, %107 : vector<16x16xf32>
    %590 = arith.addf %574, %589 : vector<16x16xf32>
    %c25 = arith.constant 25 : index
    %591 = memref.load %arg2[%c25] : memref<288xf32, #tpu.memory_space<smem>>
    %592 = vector.broadcast %591 : f32 to vector<16x16xf32>
    %593 = arith.mulf %592, %110 : vector<16x16xf32>
    %594 = arith.addf %578, %593 : vector<16x16xf32>
    %c61 = arith.constant 61 : index
    %595 = memref.load %arg2[%c61] : memref<288xf32, #tpu.memory_space<smem>>
    %596 = vector.broadcast %595 : f32 to vector<16x16xf32>
    %597 = arith.mulf %596, %110 : vector<16x16xf32>
    %598 = arith.addf %582, %597 : vector<16x16xf32>
    %c97 = arith.constant 97 : index
    %599 = memref.load %arg2[%c97] : memref<288xf32, #tpu.memory_space<smem>>
    %600 = vector.broadcast %599 : f32 to vector<16x16xf32>
    %601 = arith.mulf %600, %110 : vector<16x16xf32>
    %602 = arith.addf %586, %601 : vector<16x16xf32>
    %c133 = arith.constant 133 : index
    %603 = memref.load %arg2[%c133] : memref<288xf32, #tpu.memory_space<smem>>
    %604 = vector.broadcast %603 : f32 to vector<16x16xf32>
    %605 = arith.mulf %604, %110 : vector<16x16xf32>
    %606 = arith.addf %590, %605 : vector<16x16xf32>
    %c26 = arith.constant 26 : index
    %607 = memref.load %arg2[%c26] : memref<288xf32, #tpu.memory_space<smem>>
    %608 = vector.broadcast %607 : f32 to vector<16x16xf32>
    %609 = arith.mulf %608, %116 : vector<16x16xf32>
    %610 = arith.addf %594, %609 : vector<16x16xf32>
    %c62 = arith.constant 62 : index
    %611 = memref.load %arg2[%c62] : memref<288xf32, #tpu.memory_space<smem>>
    %612 = vector.broadcast %611 : f32 to vector<16x16xf32>
    %613 = arith.mulf %612, %116 : vector<16x16xf32>
    %614 = arith.addf %598, %613 : vector<16x16xf32>
    %c98 = arith.constant 98 : index
    %615 = memref.load %arg2[%c98] : memref<288xf32, #tpu.memory_space<smem>>
    %616 = vector.broadcast %615 : f32 to vector<16x16xf32>
    %617 = arith.mulf %616, %116 : vector<16x16xf32>
    %618 = arith.addf %602, %617 : vector<16x16xf32>
    %c134 = arith.constant 134 : index
    %619 = memref.load %arg2[%c134] : memref<288xf32, #tpu.memory_space<smem>>
    %620 = vector.broadcast %619 : f32 to vector<16x16xf32>
    %621 = arith.mulf %620, %116 : vector<16x16xf32>
    %622 = arith.addf %606, %621 : vector<16x16xf32>
    %c27 = arith.constant 27 : index
    %623 = memref.load %arg2[%c27] : memref<288xf32, #tpu.memory_space<smem>>
    %624 = vector.broadcast %623 : f32 to vector<16x16xf32>
    %625 = arith.mulf %624, %124 : vector<16x16xf32>
    %626 = arith.addf %610, %625 : vector<16x16xf32>
    %c63 = arith.constant 63 : index
    %627 = memref.load %arg2[%c63] : memref<288xf32, #tpu.memory_space<smem>>
    %628 = vector.broadcast %627 : f32 to vector<16x16xf32>
    %629 = arith.mulf %628, %124 : vector<16x16xf32>
    %630 = arith.addf %614, %629 : vector<16x16xf32>
    %c99 = arith.constant 99 : index
    %631 = memref.load %arg2[%c99] : memref<288xf32, #tpu.memory_space<smem>>
    %632 = vector.broadcast %631 : f32 to vector<16x16xf32>
    %633 = arith.mulf %632, %124 : vector<16x16xf32>
    %634 = arith.addf %618, %633 : vector<16x16xf32>
    %c135 = arith.constant 135 : index
    %635 = memref.load %arg2[%c135] : memref<288xf32, #tpu.memory_space<smem>>
    %636 = vector.broadcast %635 : f32 to vector<16x16xf32>
    %637 = arith.mulf %636, %124 : vector<16x16xf32>
    %638 = arith.addf %622, %637 : vector<16x16xf32>
    %c28 = arith.constant 28 : index
    %639 = memref.load %arg2[%c28] : memref<288xf32, #tpu.memory_space<smem>>
    %640 = vector.broadcast %639 : f32 to vector<16x16xf32>
    %641 = arith.mulf %640, %127 : vector<16x16xf32>
    %642 = arith.addf %626, %641 : vector<16x16xf32>
    %c64 = arith.constant 64 : index
    %643 = memref.load %arg2[%c64] : memref<288xf32, #tpu.memory_space<smem>>
    %644 = vector.broadcast %643 : f32 to vector<16x16xf32>
    %645 = arith.mulf %644, %127 : vector<16x16xf32>
    %646 = arith.addf %630, %645 : vector<16x16xf32>
    %c100 = arith.constant 100 : index
    %647 = memref.load %arg2[%c100] : memref<288xf32, #tpu.memory_space<smem>>
    %648 = vector.broadcast %647 : f32 to vector<16x16xf32>
    %649 = arith.mulf %648, %127 : vector<16x16xf32>
    %650 = arith.addf %634, %649 : vector<16x16xf32>
    %c136 = arith.constant 136 : index
    %651 = memref.load %arg2[%c136] : memref<288xf32, #tpu.memory_space<smem>>
    %652 = vector.broadcast %651 : f32 to vector<16x16xf32>
    %653 = arith.mulf %652, %127 : vector<16x16xf32>
    %654 = arith.addf %638, %653 : vector<16x16xf32>
    %c29 = arith.constant 29 : index
    %655 = memref.load %arg2[%c29] : memref<288xf32, #tpu.memory_space<smem>>
    %656 = vector.broadcast %655 : f32 to vector<16x16xf32>
    %657 = arith.mulf %656, %133 : vector<16x16xf32>
    %658 = arith.addf %642, %657 : vector<16x16xf32>
    %c65 = arith.constant 65 : index
    %659 = memref.load %arg2[%c65] : memref<288xf32, #tpu.memory_space<smem>>
    %660 = vector.broadcast %659 : f32 to vector<16x16xf32>
    %661 = arith.mulf %660, %133 : vector<16x16xf32>
    %662 = arith.addf %646, %661 : vector<16x16xf32>
    %c101 = arith.constant 101 : index
    %663 = memref.load %arg2[%c101] : memref<288xf32, #tpu.memory_space<smem>>
    %664 = vector.broadcast %663 : f32 to vector<16x16xf32>
    %665 = arith.mulf %664, %133 : vector<16x16xf32>
    %666 = arith.addf %650, %665 : vector<16x16xf32>
    %c137 = arith.constant 137 : index
    %667 = memref.load %arg2[%c137] : memref<288xf32, #tpu.memory_space<smem>>
    %668 = vector.broadcast %667 : f32 to vector<16x16xf32>
    %669 = arith.mulf %668, %133 : vector<16x16xf32>
    %670 = arith.addf %654, %669 : vector<16x16xf32>
    %c30 = arith.constant 30 : index
    %671 = memref.load %arg2[%c30] : memref<288xf32, #tpu.memory_space<smem>>
    %672 = vector.broadcast %671 : f32 to vector<16x16xf32>
    %673 = arith.mulf %672, %136 : vector<16x16xf32>
    %674 = arith.addf %658, %673 : vector<16x16xf32>
    %c66 = arith.constant 66 : index
    %675 = memref.load %arg2[%c66] : memref<288xf32, #tpu.memory_space<smem>>
    %676 = vector.broadcast %675 : f32 to vector<16x16xf32>
    %677 = arith.mulf %676, %136 : vector<16x16xf32>
    %678 = arith.addf %662, %677 : vector<16x16xf32>
    %c102 = arith.constant 102 : index
    %679 = memref.load %arg2[%c102] : memref<288xf32, #tpu.memory_space<smem>>
    %680 = vector.broadcast %679 : f32 to vector<16x16xf32>
    %681 = arith.mulf %680, %136 : vector<16x16xf32>
    %682 = arith.addf %666, %681 : vector<16x16xf32>
    %c138 = arith.constant 138 : index
    %683 = memref.load %arg2[%c138] : memref<288xf32, #tpu.memory_space<smem>>
    %684 = vector.broadcast %683 : f32 to vector<16x16xf32>
    %685 = arith.mulf %684, %136 : vector<16x16xf32>
    %686 = arith.addf %670, %685 : vector<16x16xf32>
    %c31 = arith.constant 31 : index
    %687 = memref.load %arg2[%c31] : memref<288xf32, #tpu.memory_space<smem>>
    %688 = vector.broadcast %687 : f32 to vector<16x16xf32>
    %689 = arith.mulf %688, %118 : vector<16x16xf32>
    %690 = arith.addf %674, %689 : vector<16x16xf32>
    %c67 = arith.constant 67 : index
    %691 = memref.load %arg2[%c67] : memref<288xf32, #tpu.memory_space<smem>>
    %692 = vector.broadcast %691 : f32 to vector<16x16xf32>
    %693 = arith.mulf %692, %118 : vector<16x16xf32>
    %694 = arith.addf %678, %693 : vector<16x16xf32>
    %c103 = arith.constant 103 : index
    %695 = memref.load %arg2[%c103] : memref<288xf32, #tpu.memory_space<smem>>
    %696 = vector.broadcast %695 : f32 to vector<16x16xf32>
    %697 = arith.mulf %696, %118 : vector<16x16xf32>
    %698 = arith.addf %682, %697 : vector<16x16xf32>
    %c139 = arith.constant 139 : index
    %699 = memref.load %arg2[%c139] : memref<288xf32, #tpu.memory_space<smem>>
    %700 = vector.broadcast %699 : f32 to vector<16x16xf32>
    %701 = arith.mulf %700, %118 : vector<16x16xf32>
    %702 = arith.addf %686, %701 : vector<16x16xf32>
    %c32 = arith.constant 32 : index
    %703 = memref.load %arg2[%c32] : memref<288xf32, #tpu.memory_space<smem>>
    %704 = vector.broadcast %703 : f32 to vector<16x16xf32>
    %705 = arith.mulf %704, %139 : vector<16x16xf32>
    %706 = arith.addf %690, %705 : vector<16x16xf32>
    %c68 = arith.constant 68 : index
    %707 = memref.load %arg2[%c68] : memref<288xf32, #tpu.memory_space<smem>>
    %708 = vector.broadcast %707 : f32 to vector<16x16xf32>
    %709 = arith.mulf %708, %139 : vector<16x16xf32>
    %710 = arith.addf %694, %709 : vector<16x16xf32>
    %c104 = arith.constant 104 : index
    %711 = memref.load %arg2[%c104] : memref<288xf32, #tpu.memory_space<smem>>
    %712 = vector.broadcast %711 : f32 to vector<16x16xf32>
    %713 = arith.mulf %712, %139 : vector<16x16xf32>
    %714 = arith.addf %698, %713 : vector<16x16xf32>
    %c140 = arith.constant 140 : index
    %715 = memref.load %arg2[%c140] : memref<288xf32, #tpu.memory_space<smem>>
    %716 = vector.broadcast %715 : f32 to vector<16x16xf32>
    %717 = arith.mulf %716, %139 : vector<16x16xf32>
    %718 = arith.addf %702, %717 : vector<16x16xf32>
    %c33 = arith.constant 33 : index
    %719 = memref.load %arg2[%c33] : memref<288xf32, #tpu.memory_space<smem>>
    %720 = vector.broadcast %719 : f32 to vector<16x16xf32>
    %721 = arith.mulf %720, %145 : vector<16x16xf32>
    %722 = arith.addf %706, %721 : vector<16x16xf32>
    %c69 = arith.constant 69 : index
    %723 = memref.load %arg2[%c69] : memref<288xf32, #tpu.memory_space<smem>>
    %724 = vector.broadcast %723 : f32 to vector<16x16xf32>
    %725 = arith.mulf %724, %145 : vector<16x16xf32>
    %726 = arith.addf %710, %725 : vector<16x16xf32>
    %c105 = arith.constant 105 : index
    %727 = memref.load %arg2[%c105] : memref<288xf32, #tpu.memory_space<smem>>
    %728 = vector.broadcast %727 : f32 to vector<16x16xf32>
    %729 = arith.mulf %728, %145 : vector<16x16xf32>
    %730 = arith.addf %714, %729 : vector<16x16xf32>
    %c141 = arith.constant 141 : index
    %731 = memref.load %arg2[%c141] : memref<288xf32, #tpu.memory_space<smem>>
    %732 = vector.broadcast %731 : f32 to vector<16x16xf32>
    %733 = arith.mulf %732, %145 : vector<16x16xf32>
    %734 = arith.addf %718, %733 : vector<16x16xf32>
    %c34 = arith.constant 34 : index
    %735 = memref.load %arg2[%c34] : memref<288xf32, #tpu.memory_space<smem>>
    %736 = vector.broadcast %735 : f32 to vector<16x16xf32>
    %737 = arith.mulf %736, %148 : vector<16x16xf32>
    %738 = arith.addf %722, %737 : vector<16x16xf32>
    %c70 = arith.constant 70 : index
    %739 = memref.load %arg2[%c70] : memref<288xf32, #tpu.memory_space<smem>>
    %740 = vector.broadcast %739 : f32 to vector<16x16xf32>
    %741 = arith.mulf %740, %148 : vector<16x16xf32>
    %742 = arith.addf %726, %741 : vector<16x16xf32>
    %c106 = arith.constant 106 : index
    %743 = memref.load %arg2[%c106] : memref<288xf32, #tpu.memory_space<smem>>
    %744 = vector.broadcast %743 : f32 to vector<16x16xf32>
    %745 = arith.mulf %744, %148 : vector<16x16xf32>
    %746 = arith.addf %730, %745 : vector<16x16xf32>
    %c142 = arith.constant 142 : index
    %747 = memref.load %arg2[%c142] : memref<288xf32, #tpu.memory_space<smem>>
    %748 = vector.broadcast %747 : f32 to vector<16x16xf32>
    %749 = arith.mulf %748, %148 : vector<16x16xf32>
    %750 = arith.addf %734, %749 : vector<16x16xf32>
    %c35 = arith.constant 35 : index
    %751 = memref.load %arg2[%c35] : memref<288xf32, #tpu.memory_space<smem>>
    %752 = vector.broadcast %751 : f32 to vector<16x16xf32>
    %753 = arith.mulf %752, %154 : vector<16x16xf32>
    %754 = arith.addf %738, %753 : vector<16x16xf32>
    %c71 = arith.constant 71 : index
    %755 = memref.load %arg2[%c71] : memref<288xf32, #tpu.memory_space<smem>>
    %756 = vector.broadcast %755 : f32 to vector<16x16xf32>
    %757 = arith.mulf %756, %154 : vector<16x16xf32>
    %758 = arith.addf %742, %757 : vector<16x16xf32>
    %c107 = arith.constant 107 : index
    %759 = memref.load %arg2[%c107] : memref<288xf32, #tpu.memory_space<smem>>
    %760 = vector.broadcast %759 : f32 to vector<16x16xf32>
    %761 = arith.mulf %760, %154 : vector<16x16xf32>
    %762 = arith.addf %746, %761 : vector<16x16xf32>
    %c143 = arith.constant 143 : index
    %763 = memref.load %arg2[%c143] : memref<288xf32, #tpu.memory_space<smem>>
    %764 = vector.broadcast %763 : f32 to vector<16x16xf32>
    %765 = arith.mulf %764, %154 : vector<16x16xf32>
    %766 = arith.addf %750, %765 : vector<16x16xf32>
    %767 = arith.truncf %754 : vector<16x16xf32> to vector<16x16xbf16>
    %768 = arith.truncf %758 : vector<16x16xf32> to vector<16x16xbf16>
    %769 = arith.truncf %762 : vector<16x16xf32> to vector<16x16xbf16>
    %770 = arith.truncf %766 : vector<16x16xf32> to vector<16x16xbf16>
    %cst_59 = arith.constant dense<0.000000e+00> : vector<16x32xf32>
    %771 = tpu.matmul %767, %162, %cst_59 {dimension_numbers = #tpu.dot_dimension_numbers<[1], [0], [0], [1], [0, 0, 1, 1], [], []>} : vector<16x16xbf16>, vector<16x32xbf16>, vector<16x32xf32> -> vector<16x32xf32>
    %cst_60 = arith.constant dense<0.000000e+00> : vector<16x32xf32>
    %772 = tpu.matmul %768, %170, %cst_60 {dimension_numbers = #tpu.dot_dimension_numbers<[1], [0], [0], [1], [0, 0, 1, 1], [], []>} : vector<16x16xbf16>, vector<16x32xbf16>, vector<16x32xf32> -> vector<16x32xf32>
    %773 = arith.addf %771, %772 : vector<16x32xf32>
    %cst_61 = arith.constant dense<0.000000e+00> : vector<16x32xf32>
    %774 = tpu.matmul %769, %162, %cst_61 {dimension_numbers = #tpu.dot_dimension_numbers<[1], [0], [0], [1], [0, 0, 1, 1], [], []>} : vector<16x16xbf16>, vector<16x32xbf16>, vector<16x32xf32> -> vector<16x32xf32>
    %cst_62 = arith.constant dense<0.000000e+00> : vector<16x32xf32>
    %775 = tpu.matmul %770, %170, %cst_62 {dimension_numbers = #tpu.dot_dimension_numbers<[1], [0], [0], [1], [0, 0, 1, 1], [], []>} : vector<16x16xbf16>, vector<16x32xbf16>, vector<16x32xf32> -> vector<16x32xf32>
    %776 = arith.addf %774, %775 : vector<16x32xf32>
    %777 = arith.truncf %773 : vector<16x32xf32> to vector<16x32xbf16>
    %cst_63 = arith.constant dense<0.000000e+00> : vector<32x32xf32>
    %778 = tpu.matmul %178, %777, %cst_63 {dimension_numbers = #tpu.dot_dimension_numbers<[1], [0], [0], [1], [0, 0, 1, 1], [], []>} : vector<32x16xbf16>, vector<16x32xbf16>, vector<32x32xf32> -> vector<32x32xf32>
    %779 = arith.truncf %776 : vector<16x32xf32> to vector<16x32xbf16>
    %cst_64 = arith.constant dense<0.000000e+00> : vector<32x32xf32>
    %780 = tpu.matmul %186, %779, %cst_64 {dimension_numbers = #tpu.dot_dimension_numbers<[1], [0], [0], [1], [0, 0, 1, 1], [], []>} : vector<32x16xbf16>, vector<16x32xbf16>, vector<32x32xf32> -> vector<32x32xf32>
    %781 = arith.addf %778, %780 : vector<32x32xf32>
    %782 = arith.truncf %781 : vector<32x32xf32> to vector<32x32xbf16>
    %c0_65 = arith.constant 0 : index
    %c0_66 = arith.constant 0 : index
    %c0_67 = arith.constant 0 : index
    %c0_68 = arith.constant 0 : index
    %783 = vector.load %arg3[%c0_65, %c0_66, %c0_67, %c0_68] : memref<1x2x32x32xbf16, #tpu.memory_space<vmem>>, vector<1x1x32x32xbf16>
    %784 = vector.shape_cast %783 : vector<1x1x32x32xbf16> to vector<32x32xbf16>
    %785 = vector.shape_cast %782 : vector<32x32xbf16> to vector<1x1x32x32xbf16>
    tpu.vector_store %arg3[%c0_65, %c0_66, %c0_67, %c0_68], %785 {strides = array<i32>} : memref<1x2x32x32xbf16, #tpu.memory_space<vmem>>, vector<1x1x32x32xbf16>,
    %cst_69 = arith.constant 0.000000e+00 : f32
    %786 = vector.broadcast %cst_69 : f32 to vector<16x16xf32>
    %cst_70 = arith.constant 0.000000e+00 : f32
    %787 = vector.broadcast %cst_70 : f32 to vector<16x16xf32>
    %cst_71 = arith.constant 0.000000e+00 : f32
    %788 = vector.broadcast %cst_71 : f32 to vector<16x16xf32>
    %cst_72 = arith.constant 0.000000e+00 : f32
    %789 = vector.broadcast %cst_72 : f32 to vector<16x16xf32>
    %c144 = arith.constant 144 : index
    %790 = memref.load %arg2[%c144] : memref<288xf32, #tpu.memory_space<smem>>
    %791 = vector.broadcast %790 : f32 to vector<16x16xf32>
    %792 = arith.mulf %791, %10 : vector<16x16xf32>
    %793 = arith.addf %786, %792 : vector<16x16xf32>
    %c180 = arith.constant 180 : index
    %794 = memref.load %arg2[%c180] : memref<288xf32, #tpu.memory_space<smem>>
    %795 = vector.broadcast %794 : f32 to vector<16x16xf32>
    %796 = arith.mulf %795, %10 : vector<16x16xf32>
    %797 = arith.addf %787, %796 : vector<16x16xf32>
    %c216 = arith.constant 216 : index
    %798 = memref.load %arg2[%c216] : memref<288xf32, #tpu.memory_space<smem>>
    %799 = vector.broadcast %798 : f32 to vector<16x16xf32>
    %800 = arith.mulf %799, %10 : vector<16x16xf32>
    %801 = arith.addf %788, %800 : vector<16x16xf32>
    %c252 = arith.constant 252 : index
    %802 = memref.load %arg2[%c252] : memref<288xf32, #tpu.memory_space<smem>>
    %803 = vector.broadcast %802 : f32 to vector<16x16xf32>
    %804 = arith.mulf %803, %10 : vector<16x16xf32>
    %805 = arith.addf %789, %804 : vector<16x16xf32>
    %c145 = arith.constant 145 : index
    %806 = memref.load %arg2[%c145] : memref<288xf32, #tpu.memory_space<smem>>
    %807 = vector.broadcast %806 : f32 to vector<16x16xf32>
    %808 = arith.mulf %807, %13 : vector<16x16xf32>
    %809 = arith.addf %793, %808 : vector<16x16xf32>
    %c181 = arith.constant 181 : index
    %810 = memref.load %arg2[%c181] : memref<288xf32, #tpu.memory_space<smem>>
    %811 = vector.broadcast %810 : f32 to vector<16x16xf32>
    %812 = arith.mulf %811, %13 : vector<16x16xf32>
    %813 = arith.addf %797, %812 : vector<16x16xf32>
    %c217 = arith.constant 217 : index
    %814 = memref.load %arg2[%c217] : memref<288xf32, #tpu.memory_space<smem>>
    %815 = vector.broadcast %814 : f32 to vector<16x16xf32>
    %816 = arith.mulf %815, %13 : vector<16x16xf32>
    %817 = arith.addf %801, %816 : vector<16x16xf32>
    %c253 = arith.constant 253 : index
    %818 = memref.load %arg2[%c253] : memref<288xf32, #tpu.memory_space<smem>>
    %819 = vector.broadcast %818 : f32 to vector<16x16xf32>
    %820 = arith.mulf %819, %13 : vector<16x16xf32>
    %821 = arith.addf %805, %820 : vector<16x16xf32>
    %c146 = arith.constant 146 : index
    %822 = memref.load %arg2[%c146] : memref<288xf32, #tpu.memory_space<smem>>
    %823 = vector.broadcast %822 : f32 to vector<16x16xf32>
    %824 = arith.mulf %823, %19 : vector<16x16xf32>
    %825 = arith.addf %809, %824 : vector<16x16xf32>
    %c182 = arith.constant 182 : index
    %826 = memref.load %arg2[%c182] : memref<288xf32, #tpu.memory_space<smem>>
    %827 = vector.broadcast %826 : f32 to vector<16x16xf32>
    %828 = arith.mulf %827, %19 : vector<16x16xf32>
    %829 = arith.addf %813, %828 : vector<16x16xf32>
    %c218 = arith.constant 218 : index
    %830 = memref.load %arg2[%c218] : memref<288xf32, #tpu.memory_space<smem>>
    %831 = vector.broadcast %830 : f32 to vector<16x16xf32>
    %832 = arith.mulf %831, %19 : vector<16x16xf32>
    %833 = arith.addf %817, %832 : vector<16x16xf32>
    %c254 = arith.constant 254 : index
    %834 = memref.load %arg2[%c254] : memref<288xf32, #tpu.memory_space<smem>>
    %835 = vector.broadcast %834 : f32 to vector<16x16xf32>
    %836 = arith.mulf %835, %19 : vector<16x16xf32>
    %837 = arith.addf %821, %836 : vector<16x16xf32>
    %c147 = arith.constant 147 : index
    %838 = memref.load %arg2[%c147] : memref<288xf32, #tpu.memory_space<smem>>
    %839 = vector.broadcast %838 : f32 to vector<16x16xf32>
    %840 = arith.mulf %839, %22 : vector<16x16xf32>
    %841 = arith.addf %825, %840 : vector<16x16xf32>
    %c183 = arith.constant 183 : index
    %842 = memref.load %arg2[%c183] : memref<288xf32, #tpu.memory_space<smem>>
    %843 = vector.broadcast %842 : f32 to vector<16x16xf32>
    %844 = arith.mulf %843, %22 : vector<16x16xf32>
    %845 = arith.addf %829, %844 : vector<16x16xf32>
    %c219 = arith.constant 219 : index
    %846 = memref.load %arg2[%c219] : memref<288xf32, #tpu.memory_space<smem>>
    %847 = vector.broadcast %846 : f32 to vector<16x16xf32>
    %848 = arith.mulf %847, %22 : vector<16x16xf32>
    %849 = arith.addf %833, %848 : vector<16x16xf32>
    %c255 = arith.constant 255 : index
    %850 = memref.load %arg2[%c255] : memref<288xf32, #tpu.memory_space<smem>>
    %851 = vector.broadcast %850 : f32 to vector<16x16xf32>
    %852 = arith.mulf %851, %22 : vector<16x16xf32>
    %853 = arith.addf %837, %852 : vector<16x16xf32>
    %c148 = arith.constant 148 : index
    %854 = memref.load %arg2[%c148] : memref<288xf32, #tpu.memory_space<smem>>
    %855 = vector.broadcast %854 : f32 to vector<16x16xf32>
    %856 = arith.mulf %855, %4 : vector<16x16xf32>
    %857 = arith.addf %841, %856 : vector<16x16xf32>
    %c184 = arith.constant 184 : index
    %858 = memref.load %arg2[%c184] : memref<288xf32, #tpu.memory_space<smem>>
    %859 = vector.broadcast %858 : f32 to vector<16x16xf32>
    %860 = arith.mulf %859, %4 : vector<16x16xf32>
    %861 = arith.addf %845, %860 : vector<16x16xf32>
    %c220 = arith.constant 220 : index
    %862 = memref.load %arg2[%c220] : memref<288xf32, #tpu.memory_space<smem>>
    %863 = vector.broadcast %862 : f32 to vector<16x16xf32>
    %864 = arith.mulf %863, %4 : vector<16x16xf32>
    %865 = arith.addf %849, %864 : vector<16x16xf32>
    %c256 = arith.constant 256 : index
    %866 = memref.load %arg2[%c256] : memref<288xf32, #tpu.memory_space<smem>>
    %867 = vector.broadcast %866 : f32 to vector<16x16xf32>
    %868 = arith.mulf %867, %4 : vector<16x16xf32>
    %869 = arith.addf %853, %868 : vector<16x16xf32>
    %c149 = arith.constant 149 : index
    %870 = memref.load %arg2[%c149] : memref<288xf32, #tpu.memory_space<smem>>
    %871 = vector.broadcast %870 : f32 to vector<16x16xf32>
    %872 = arith.mulf %871, %25 : vector<16x16xf32>
    %873 = arith.addf %857, %872 : vector<16x16xf32>
    %c185 = arith.constant 185 : index
    %874 = memref.load %arg2[%c185] : memref<288xf32, #tpu.memory_space<smem>>
    %875 = vector.broadcast %874 : f32 to vector<16x16xf32>
    %876 = arith.mulf %875, %25 : vector<16x16xf32>
    %877 = arith.addf %861, %876 : vector<16x16xf32>
    %c221 = arith.constant 221 : index
    %878 = memref.load %arg2[%c221] : memref<288xf32, #tpu.memory_space<smem>>
    %879 = vector.broadcast %878 : f32 to vector<16x16xf32>
    %880 = arith.mulf %879, %25 : vector<16x16xf32>
    %881 = arith.addf %865, %880 : vector<16x16xf32>
    %c257 = arith.constant 257 : index
    %882 = memref.load %arg2[%c257] : memref<288xf32, #tpu.memory_space<smem>>
    %883 = vector.broadcast %882 : f32 to vector<16x16xf32>
    %884 = arith.mulf %883, %25 : vector<16x16xf32>
    %885 = arith.addf %869, %884 : vector<16x16xf32>
    %c150 = arith.constant 150 : index
    %886 = memref.load %arg2[%c150] : memref<288xf32, #tpu.memory_space<smem>>
    %887 = vector.broadcast %886 : f32 to vector<16x16xf32>
    %888 = arith.mulf %887, %31 : vector<16x16xf32>
    %889 = arith.addf %873, %888 : vector<16x16xf32>
    %c186 = arith.constant 186 : index
    %890 = memref.load %arg2[%c186] : memref<288xf32, #tpu.memory_space<smem>>
    %891 = vector.broadcast %890 : f32 to vector<16x16xf32>
    %892 = arith.mulf %891, %31 : vector<16x16xf32>
    %893 = arith.addf %877, %892 : vector<16x16xf32>
    %c222 = arith.constant 222 : index
    %894 = memref.load %arg2[%c222] : memref<288xf32, #tpu.memory_space<smem>>
    %895 = vector.broadcast %894 : f32 to vector<16x16xf32>
    %896 = arith.mulf %895, %31 : vector<16x16xf32>
    %897 = arith.addf %881, %896 : vector<16x16xf32>
    %c258 = arith.constant 258 : index
    %898 = memref.load %arg2[%c258] : memref<288xf32, #tpu.memory_space<smem>>
    %899 = vector.broadcast %898 : f32 to vector<16x16xf32>
    %900 = arith.mulf %899, %31 : vector<16x16xf32>
    %901 = arith.addf %885, %900 : vector<16x16xf32>
    %c151 = arith.constant 151 : index
    %902 = memref.load %arg2[%c151] : memref<288xf32, #tpu.memory_space<smem>>
    %903 = vector.broadcast %902 : f32 to vector<16x16xf32>
    %904 = arith.mulf %903, %34 : vector<16x16xf32>
    %905 = arith.addf %889, %904 : vector<16x16xf32>
    %c187 = arith.constant 187 : index
    %906 = memref.load %arg2[%c187] : memref<288xf32, #tpu.memory_space<smem>>
    %907 = vector.broadcast %906 : f32 to vector<16x16xf32>
    %908 = arith.mulf %907, %34 : vector<16x16xf32>
    %909 = arith.addf %893, %908 : vector<16x16xf32>
    %c223 = arith.constant 223 : index
    %910 = memref.load %arg2[%c223] : memref<288xf32, #tpu.memory_space<smem>>
    %911 = vector.broadcast %910 : f32 to vector<16x16xf32>
    %912 = arith.mulf %911, %34 : vector<16x16xf32>
    %913 = arith.addf %897, %912 : vector<16x16xf32>
    %c259 = arith.constant 259 : index
    %914 = memref.load %arg2[%c259] : memref<288xf32, #tpu.memory_space<smem>>
    %915 = vector.broadcast %914 : f32 to vector<16x16xf32>
    %916 = arith.mulf %915, %34 : vector<16x16xf32>
    %917 = arith.addf %901, %916 : vector<16x16xf32>
    %c152 = arith.constant 152 : index
    %918 = memref.load %arg2[%c152] : memref<288xf32, #tpu.memory_space<smem>>
    %919 = vector.broadcast %918 : f32 to vector<16x16xf32>
    %920 = arith.mulf %919, %40 : vector<16x16xf32>
    %921 = arith.addf %905, %920 : vector<16x16xf32>
    %c188 = arith.constant 188 : index
    %922 = memref.load %arg2[%c188] : memref<288xf32, #tpu.memory_space<smem>>
    %923 = vector.broadcast %922 : f32 to vector<16x16xf32>
    %924 = arith.mulf %923, %40 : vector<16x16xf32>
    %925 = arith.addf %909, %924 : vector<16x16xf32>
    %c224 = arith.constant 224 : index
    %926 = memref.load %arg2[%c224] : memref<288xf32, #tpu.memory_space<smem>>
    %927 = vector.broadcast %926 : f32 to vector<16x16xf32>
    %928 = arith.mulf %927, %40 : vector<16x16xf32>
    %929 = arith.addf %913, %928 : vector<16x16xf32>
    %c260 = arith.constant 260 : index
    %930 = memref.load %arg2[%c260] : memref<288xf32, #tpu.memory_space<smem>>
    %931 = vector.broadcast %930 : f32 to vector<16x16xf32>
    %932 = arith.mulf %931, %40 : vector<16x16xf32>
    %933 = arith.addf %917, %932 : vector<16x16xf32>
    %c153 = arith.constant 153 : index
    %934 = memref.load %arg2[%c153] : memref<288xf32, #tpu.memory_space<smem>>
    %935 = vector.broadcast %934 : f32 to vector<16x16xf32>
    %936 = arith.mulf %935, %48 : vector<16x16xf32>
    %937 = arith.addf %921, %936 : vector<16x16xf32>
    %c189 = arith.constant 189 : index
    %938 = memref.load %arg2[%c189] : memref<288xf32, #tpu.memory_space<smem>>
    %939 = vector.broadcast %938 : f32 to vector<16x16xf32>
    %940 = arith.mulf %939, %48 : vector<16x16xf32>
    %941 = arith.addf %925, %940 : vector<16x16xf32>
    %c225 = arith.constant 225 : index
    %942 = memref.load %arg2[%c225] : memref<288xf32, #tpu.memory_space<smem>>
    %943 = vector.broadcast %942 : f32 to vector<16x16xf32>
    %944 = arith.mulf %943, %48 : vector<16x16xf32>
    %945 = arith.addf %929, %944 : vector<16x16xf32>
    %c261 = arith.constant 261 : index
    %946 = memref.load %arg2[%c261] : memref<288xf32, #tpu.memory_space<smem>>
    %947 = vector.broadcast %946 : f32 to vector<16x16xf32>
    %948 = arith.mulf %947, %48 : vector<16x16xf32>
    %949 = arith.addf %933, %948 : vector<16x16xf32>
    %c154 = arith.constant 154 : index
    %950 = memref.load %arg2[%c154] : memref<288xf32, #tpu.memory_space<smem>>
    %951 = vector.broadcast %950 : f32 to vector<16x16xf32>
    %952 = arith.mulf %951, %51 : vector<16x16xf32>
    %953 = arith.addf %937, %952 : vector<16x16xf32>
    %c190 = arith.constant 190 : index
    %954 = memref.load %arg2[%c190] : memref<288xf32, #tpu.memory_space<smem>>
    %955 = vector.broadcast %954 : f32 to vector<16x16xf32>
    %956 = arith.mulf %955, %51 : vector<16x16xf32>
    %957 = arith.addf %941, %956 : vector<16x16xf32>
    %c226 = arith.constant 226 : index
    %958 = memref.load %arg2[%c226] : memref<288xf32, #tpu.memory_space<smem>>
    %959 = vector.broadcast %958 : f32 to vector<16x16xf32>
    %960 = arith.mulf %959, %51 : vector<16x16xf32>
    %961 = arith.addf %945, %960 : vector<16x16xf32>
    %c262 = arith.constant 262 : index
    %962 = memref.load %arg2[%c262] : memref<288xf32, #tpu.memory_space<smem>>
    %963 = vector.broadcast %962 : f32 to vector<16x16xf32>
    %964 = arith.mulf %963, %51 : vector<16x16xf32>
    %965 = arith.addf %949, %964 : vector<16x16xf32>
    %c155 = arith.constant 155 : index
    %966 = memref.load %arg2[%c155] : memref<288xf32, #tpu.memory_space<smem>>
    %967 = vector.broadcast %966 : f32 to vector<16x16xf32>
    %968 = arith.mulf %967, %57 : vector<16x16xf32>
    %969 = arith.addf %953, %968 : vector<16x16xf32>
    %c191 = arith.constant 191 : index
    %970 = memref.load %arg2[%c191] : memref<288xf32, #tpu.memory_space<smem>>
    %971 = vector.broadcast %970 : f32 to vector<16x16xf32>
    %972 = arith.mulf %971, %57 : vector<16x16xf32>
    %973 = arith.addf %957, %972 : vector<16x16xf32>
    %c227 = arith.constant 227 : index
    %974 = memref.load %arg2[%c227] : memref<288xf32, #tpu.memory_space<smem>>
    %975 = vector.broadcast %974 : f32 to vector<16x16xf32>
    %976 = arith.mulf %975, %57 : vector<16x16xf32>
    %977 = arith.addf %961, %976 : vector<16x16xf32>
    %c263 = arith.constant 263 : index
    %978 = memref.load %arg2[%c263] : memref<288xf32, #tpu.memory_space<smem>>
    %979 = vector.broadcast %978 : f32 to vector<16x16xf32>
    %980 = arith.mulf %979, %57 : vector<16x16xf32>
    %981 = arith.addf %965, %980 : vector<16x16xf32>
    %c156 = arith.constant 156 : index
    %982 = memref.load %arg2[%c156] : memref<288xf32, #tpu.memory_space<smem>>
    %983 = vector.broadcast %982 : f32 to vector<16x16xf32>
    %984 = arith.mulf %983, %60 : vector<16x16xf32>
    %985 = arith.addf %969, %984 : vector<16x16xf32>
    %c192 = arith.constant 192 : index
    %986 = memref.load %arg2[%c192] : memref<288xf32, #tpu.memory_space<smem>>
    %987 = vector.broadcast %986 : f32 to vector<16x16xf32>
    %988 = arith.mulf %987, %60 : vector<16x16xf32>
    %989 = arith.addf %973, %988 : vector<16x16xf32>
    %c228 = arith.constant 228 : index
    %990 = memref.load %arg2[%c228] : memref<288xf32, #tpu.memory_space<smem>>
    %991 = vector.broadcast %990 : f32 to vector<16x16xf32>
    %992 = arith.mulf %991, %60 : vector<16x16xf32>
    %993 = arith.addf %977, %992 : vector<16x16xf32>
    %c264 = arith.constant 264 : index
    %994 = memref.load %arg2[%c264] : memref<288xf32, #tpu.memory_space<smem>>
    %995 = vector.broadcast %994 : f32 to vector<16x16xf32>
    %996 = arith.mulf %995, %60 : vector<16x16xf32>
    %997 = arith.addf %981, %996 : vector<16x16xf32>
    %c157 = arith.constant 157 : index
    %998 = memref.load %arg2[%c157] : memref<288xf32, #tpu.memory_space<smem>>
    %999 = vector.broadcast %998 : f32 to vector<16x16xf32>
    %1000 = arith.mulf %999, %42 : vector<16x16xf32>
    %1001 = arith.addf %985, %1000 : vector<16x16xf32>
    %c193 = arith.constant 193 : index
    %1002 = memref.load %arg2[%c193] : memref<288xf32, #tpu.memory_space<smem>>
    %1003 = vector.broadcast %1002 : f32 to vector<16x16xf32>
    %1004 = arith.mulf %1003, %42 : vector<16x16xf32>
    %1005 = arith.addf %989, %1004 : vector<16x16xf32>
    %c229 = arith.constant 229 : index
    %1006 = memref.load %arg2[%c229] : memref<288xf32, #tpu.memory_space<smem>>
    %1007 = vector.broadcast %1006 : f32 to vector<16x16xf32>
    %1008 = arith.mulf %1007, %42 : vector<16x16xf32>
    %1009 = arith.addf %993, %1008 : vector<16x16xf32>
    %c265 = arith.constant 265 : index
    %1010 = memref.load %arg2[%c265] : memref<288xf32, #tpu.memory_space<smem>>
    %1011 = vector.broadcast %1010 : f32 to vector<16x16xf32>
    %1012 = arith.mulf %1011, %42 : vector<16x16xf32>
    %1013 = arith.addf %997, %1012 : vector<16x16xf32>
    %c158 = arith.constant 158 : index
    %1014 = memref.load %arg2[%c158] : memref<288xf32, #tpu.memory_space<smem>>
    %1015 = vector.broadcast %1014 : f32 to vector<16x16xf32>
    %1016 = arith.mulf %1015, %63 : vector<16x16xf32>
    %1017 = arith.addf %1001, %1016 : vector<16x16xf32>
    %c194 = arith.constant 194 : index
    %1018 = memref.load %arg2[%c194] : memref<288xf32, #tpu.memory_space<smem>>
    %1019 = vector.broadcast %1018 : f32 to vector<16x16xf32>
    %1020 = arith.mulf %1019, %63 : vector<16x16xf32>
    %1021 = arith.addf %1005, %1020 : vector<16x16xf32>
    %c230 = arith.constant 230 : index
    %1022 = memref.load %arg2[%c230] : memref<288xf32, #tpu.memory_space<smem>>
    %1023 = vector.broadcast %1022 : f32 to vector<16x16xf32>
    %1024 = arith.mulf %1023, %63 : vector<16x16xf32>
    %1025 = arith.addf %1009, %1024 : vector<16x16xf32>
    %c266 = arith.constant 266 : index
    %1026 = memref.load %arg2[%c266] : memref<288xf32, #tpu.memory_space<smem>>
    %1027 = vector.broadcast %1026 : f32 to vector<16x16xf32>
    %1028 = arith.mulf %1027, %63 : vector<16x16xf32>
    %1029 = arith.addf %1013, %1028 : vector<16x16xf32>
    %c159 = arith.constant 159 : index
    %1030 = memref.load %arg2[%c159] : memref<288xf32, #tpu.memory_space<smem>>
    %1031 = vector.broadcast %1030 : f32 to vector<16x16xf32>
    %1032 = arith.mulf %1031, %69 : vector<16x16xf32>
    %1033 = arith.addf %1017, %1032 : vector<16x16xf32>
    %c195 = arith.constant 195 : index
    %1034 = memref.load %arg2[%c195] : memref<288xf32, #tpu.memory_space<smem>>
    %1035 = vector.broadcast %1034 : f32 to vector<16x16xf32>
    %1036 = arith.mulf %1035, %69 : vector<16x16xf32>
    %1037 = arith.addf %1021, %1036 : vector<16x16xf32>
    %c231 = arith.constant 231 : index
    %1038 = memref.load %arg2[%c231] : memref<288xf32, #tpu.memory_space<smem>>
    %1039 = vector.broadcast %1038 : f32 to vector<16x16xf32>
    %1040 = arith.mulf %1039, %69 : vector<16x16xf32>
    %1041 = arith.addf %1025, %1040 : vector<16x16xf32>
    %c267 = arith.constant 267 : index
    %1042 = memref.load %arg2[%c267] : memref<288xf32, #tpu.memory_space<smem>>
    %1043 = vector.broadcast %1042 : f32 to vector<16x16xf32>
    %1044 = arith.mulf %1043, %69 : vector<16x16xf32>
    %1045 = arith.addf %1029, %1044 : vector<16x16xf32>
    %c160 = arith.constant 160 : index
    %1046 = memref.load %arg2[%c160] : memref<288xf32, #tpu.memory_space<smem>>
    %1047 = vector.broadcast %1046 : f32 to vector<16x16xf32>
    %1048 = arith.mulf %1047, %72 : vector<16x16xf32>
    %1049 = arith.addf %1033, %1048 : vector<16x16xf32>
    %c196 = arith.constant 196 : index
    %1050 = memref.load %arg2[%c196] : memref<288xf32, #tpu.memory_space<smem>>
    %1051 = vector.broadcast %1050 : f32 to vector<16x16xf32>
    %1052 = arith.mulf %1051, %72 : vector<16x16xf32>
    %1053 = arith.addf %1037, %1052 : vector<16x16xf32>
    %c232 = arith.constant 232 : index
    %1054 = memref.load %arg2[%c232] : memref<288xf32, #tpu.memory_space<smem>>
    %1055 = vector.broadcast %1054 : f32 to vector<16x16xf32>
    %1056 = arith.mulf %1055, %72 : vector<16x16xf32>
    %1057 = arith.addf %1041, %1056 : vector<16x16xf32>
    %c268 = arith.constant 268 : index
    %1058 = memref.load %arg2[%c268] : memref<288xf32, #tpu.memory_space<smem>>
    %1059 = vector.broadcast %1058 : f32 to vector<16x16xf32>
    %1060 = arith.mulf %1059, %72 : vector<16x16xf32>
    %1061 = arith.addf %1045, %1060 : vector<16x16xf32>
    %c161 = arith.constant 161 : index
    %1062 = memref.load %arg2[%c161] : memref<288xf32, #tpu.memory_space<smem>>
    %1063 = vector.broadcast %1062 : f32 to vector<16x16xf32>
    %1064 = arith.mulf %1063, %78 : vector<16x16xf32>
    %1065 = arith.addf %1049, %1064 : vector<16x16xf32>
    %c197 = arith.constant 197 : index
    %1066 = memref.load %arg2[%c197] : memref<288xf32, #tpu.memory_space<smem>>
    %1067 = vector.broadcast %1066 : f32 to vector<16x16xf32>
    %1068 = arith.mulf %1067, %78 : vector<16x16xf32>
    %1069 = arith.addf %1053, %1068 : vector<16x16xf32>
    %c233 = arith.constant 233 : index
    %1070 = memref.load %arg2[%c233] : memref<288xf32, #tpu.memory_space<smem>>
    %1071 = vector.broadcast %1070 : f32 to vector<16x16xf32>
    %1072 = arith.mulf %1071, %78 : vector<16x16xf32>
    %1073 = arith.addf %1057, %1072 : vector<16x16xf32>
    %c269 = arith.constant 269 : index
    %1074 = memref.load %arg2[%c269] : memref<288xf32, #tpu.memory_space<smem>>
    %1075 = vector.broadcast %1074 : f32 to vector<16x16xf32>
    %1076 = arith.mulf %1075, %78 : vector<16x16xf32>
    %1077 = arith.addf %1061, %1076 : vector<16x16xf32>
    %c162 = arith.constant 162 : index
    %1078 = memref.load %arg2[%c162] : memref<288xf32, #tpu.memory_space<smem>>
    %1079 = vector.broadcast %1078 : f32 to vector<16x16xf32>
    %1080 = arith.mulf %1079, %86 : vector<16x16xf32>
    %1081 = arith.addf %1065, %1080 : vector<16x16xf32>
    %c198 = arith.constant 198 : index
    %1082 = memref.load %arg2[%c198] : memref<288xf32, #tpu.memory_space<smem>>
    %1083 = vector.broadcast %1082 : f32 to vector<16x16xf32>
    %1084 = arith.mulf %1083, %86 : vector<16x16xf32>
    %1085 = arith.addf %1069, %1084 : vector<16x16xf32>
    %c234 = arith.constant 234 : index
    %1086 = memref.load %arg2[%c234] : memref<288xf32, #tpu.memory_space<smem>>
    %1087 = vector.broadcast %1086 : f32 to vector<16x16xf32>
    %1088 = arith.mulf %1087, %86 : vector<16x16xf32>
    %1089 = arith.addf %1073, %1088 : vector<16x16xf32>
    %c270 = arith.constant 270 : index
    %1090 = memref.load %arg2[%c270] : memref<288xf32, #tpu.memory_space<smem>>
    %1091 = vector.broadcast %1090 : f32 to vector<16x16xf32>
    %1092 = arith.mulf %1091, %86 : vector<16x16xf32>
    %1093 = arith.addf %1077, %1092 : vector<16x16xf32>
    %c163 = arith.constant 163 : index
    %1094 = memref.load %arg2[%c163] : memref<288xf32, #tpu.memory_space<smem>>
    %1095 = vector.broadcast %1094 : f32 to vector<16x16xf32>
    %1096 = arith.mulf %1095, %89 : vector<16x16xf32>
    %1097 = arith.addf %1081, %1096 : vector<16x16xf32>
    %c199 = arith.constant 199 : index
    %1098 = memref.load %arg2[%c199] : memref<288xf32, #tpu.memory_space<smem>>
    %1099 = vector.broadcast %1098 : f32 to vector<16x16xf32>
    %1100 = arith.mulf %1099, %89 : vector<16x16xf32>
    %1101 = arith.addf %1085, %1100 : vector<16x16xf32>
    %c235 = arith.constant 235 : index
    %1102 = memref.load %arg2[%c235] : memref<288xf32, #tpu.memory_space<smem>>
    %1103 = vector.broadcast %1102 : f32 to vector<16x16xf32>
    %1104 = arith.mulf %1103, %89 : vector<16x16xf32>
    %1105 = arith.addf %1089, %1104 : vector<16x16xf32>
    %c271 = arith.constant 271 : index
    %1106 = memref.load %arg2[%c271] : memref<288xf32, #tpu.memory_space<smem>>
    %1107 = vector.broadcast %1106 : f32 to vector<16x16xf32>
    %1108 = arith.mulf %1107, %89 : vector<16x16xf32>
    %1109 = arith.addf %1093, %1108 : vector<16x16xf32>
    %c164 = arith.constant 164 : index
    %1110 = memref.load %arg2[%c164] : memref<288xf32, #tpu.memory_space<smem>>
    %1111 = vector.broadcast %1110 : f32 to vector<16x16xf32>
    %1112 = arith.mulf %1111, %95 : vector<16x16xf32>
    %1113 = arith.addf %1097, %1112 : vector<16x16xf32>
    %c200 = arith.constant 200 : index
    %1114 = memref.load %arg2[%c200] : memref<288xf32, #tpu.memory_space<smem>>
    %1115 = vector.broadcast %1114 : f32 to vector<16x16xf32>
    %1116 = arith.mulf %1115, %95 : vector<16x16xf32>
    %1117 = arith.addf %1101, %1116 : vector<16x16xf32>
    %c236 = arith.constant 236 : index
    %1118 = memref.load %arg2[%c236] : memref<288xf32, #tpu.memory_space<smem>>
    %1119 = vector.broadcast %1118 : f32 to vector<16x16xf32>
    %1120 = arith.mulf %1119, %95 : vector<16x16xf32>
    %1121 = arith.addf %1105, %1120 : vector<16x16xf32>
    %c272 = arith.constant 272 : index
    %1122 = memref.load %arg2[%c272] : memref<288xf32, #tpu.memory_space<smem>>
    %1123 = vector.broadcast %1122 : f32 to vector<16x16xf32>
    %1124 = arith.mulf %1123, %95 : vector<16x16xf32>
    %1125 = arith.addf %1109, %1124 : vector<16x16xf32>
    %c165 = arith.constant 165 : index
    %1126 = memref.load %arg2[%c165] : memref<288xf32, #tpu.memory_space<smem>>
    %1127 = vector.broadcast %1126 : f32 to vector<16x16xf32>
    %1128 = arith.mulf %1127, %98 : vector<16x16xf32>
    %1129 = arith.addf %1113, %1128 : vector<16x16xf32>
    %c201 = arith.constant 201 : index
    %1130 = memref.load %arg2[%c201] : memref<288xf32, #tpu.memory_space<smem>>
    %1131 = vector.broadcast %1130 : f32 to vector<16x16xf32>
    %1132 = arith.mulf %1131, %98 : vector<16x16xf32>
    %1133 = arith.addf %1117, %1132 : vector<16x16xf32>
    %c237 = arith.constant 237 : index
    %1134 = memref.load %arg2[%c237] : memref<288xf32, #tpu.memory_space<smem>>
    %1135 = vector.broadcast %1134 : f32 to vector<16x16xf32>
    %1136 = arith.mulf %1135, %98 : vector<16x16xf32>
    %1137 = arith.addf %1121, %1136 : vector<16x16xf32>
    %c273 = arith.constant 273 : index
    %1138 = memref.load %arg2[%c273] : memref<288xf32, #tpu.memory_space<smem>>
    %1139 = vector.broadcast %1138 : f32 to vector<16x16xf32>
    %1140 = arith.mulf %1139, %98 : vector<16x16xf32>
    %1141 = arith.addf %1125, %1140 : vector<16x16xf32>
    %c166 = arith.constant 166 : index
    %1142 = memref.load %arg2[%c166] : memref<288xf32, #tpu.memory_space<smem>>
    %1143 = vector.broadcast %1142 : f32 to vector<16x16xf32>
    %1144 = arith.mulf %1143, %80 : vector<16x16xf32>
    %1145 = arith.addf %1129, %1144 : vector<16x16xf32>
    %c202 = arith.constant 202 : index
    %1146 = memref.load %arg2[%c202] : memref<288xf32, #tpu.memory_space<smem>>
    %1147 = vector.broadcast %1146 : f32 to vector<16x16xf32>
    %1148 = arith.mulf %1147, %80 : vector<16x16xf32>
    %1149 = arith.addf %1133, %1148 : vector<16x16xf32>
    %c238 = arith.constant 238 : index
    %1150 = memref.load %arg2[%c238] : memref<288xf32, #tpu.memory_space<smem>>
    %1151 = vector.broadcast %1150 : f32 to vector<16x16xf32>
    %1152 = arith.mulf %1151, %80 : vector<16x16xf32>
    %1153 = arith.addf %1137, %1152 : vector<16x16xf32>
    %c274 = arith.constant 274 : index
    %1154 = memref.load %arg2[%c274] : memref<288xf32, #tpu.memory_space<smem>>
    %1155 = vector.broadcast %1154 : f32 to vector<16x16xf32>
    %1156 = arith.mulf %1155, %80 : vector<16x16xf32>
    %1157 = arith.addf %1141, %1156 : vector<16x16xf32>
    %c167 = arith.constant 167 : index
    %1158 = memref.load %arg2[%c167] : memref<288xf32, #tpu.memory_space<smem>>
    %1159 = vector.broadcast %1158 : f32 to vector<16x16xf32>
    %1160 = arith.mulf %1159, %101 : vector<16x16xf32>
    %1161 = arith.addf %1145, %1160 : vector<16x16xf32>
    %c203 = arith.constant 203 : index
    %1162 = memref.load %arg2[%c203] : memref<288xf32, #tpu.memory_space<smem>>
    %1163 = vector.broadcast %1162 : f32 to vector<16x16xf32>
    %1164 = arith.mulf %1163, %101 : vector<16x16xf32>
    %1165 = arith.addf %1149, %1164 : vector<16x16xf32>
    %c239 = arith.constant 239 : index
    %1166 = memref.load %arg2[%c239] : memref<288xf32, #tpu.memory_space<smem>>
    %1167 = vector.broadcast %1166 : f32 to vector<16x16xf32>
    %1168 = arith.mulf %1167, %101 : vector<16x16xf32>
    %1169 = arith.addf %1153, %1168 : vector<16x16xf32>
    %c275 = arith.constant 275 : index
    %1170 = memref.load %arg2[%c275] : memref<288xf32, #tpu.memory_space<smem>>
    %1171 = vector.broadcast %1170 : f32 to vector<16x16xf32>
    %1172 = arith.mulf %1171, %101 : vector<16x16xf32>
    %1173 = arith.addf %1157, %1172 : vector<16x16xf32>
    %c168 = arith.constant 168 : index
    %1174 = memref.load %arg2[%c168] : memref<288xf32, #tpu.memory_space<smem>>
    %1175 = vector.broadcast %1174 : f32 to vector<16x16xf32>
    %1176 = arith.mulf %1175, %107 : vector<16x16xf32>
    %1177 = arith.addf %1161, %1176 : vector<16x16xf32>
    %c204 = arith.constant 204 : index
    %1178 = memref.load %arg2[%c204] : memref<288xf32, #tpu.memory_space<smem>>
    %1179 = vector.broadcast %1178 : f32 to vector<16x16xf32>
    %1180 = arith.mulf %1179, %107 : vector<16x16xf32>
    %1181 = arith.addf %1165, %1180 : vector<16x16xf32>
    %c240 = arith.constant 240 : index
    %1182 = memref.load %arg2[%c240] : memref<288xf32, #tpu.memory_space<smem>>
    %1183 = vector.broadcast %1182 : f32 to vector<16x16xf32>
    %1184 = arith.mulf %1183, %107 : vector<16x16xf32>
    %1185 = arith.addf %1169, %1184 : vector<16x16xf32>
    %c276 = arith.constant 276 : index
    %1186 = memref.load %arg2[%c276] : memref<288xf32, #tpu.memory_space<smem>>
    %1187 = vector.broadcast %1186 : f32 to vector<16x16xf32>
    %1188 = arith.mulf %1187, %107 : vector<16x16xf32>
    %1189 = arith.addf %1173, %1188 : vector<16x16xf32>
    %c169 = arith.constant 169 : index
    %1190 = memref.load %arg2[%c169] : memref<288xf32, #tpu.memory_space<smem>>
    %1191 = vector.broadcast %1190 : f32 to vector<16x16xf32>
    %1192 = arith.mulf %1191, %110 : vector<16x16xf32>
    %1193 = arith.addf %1177, %1192 : vector<16x16xf32>
    %c205 = arith.constant 205 : index
    %1194 = memref.load %arg2[%c205] : memref<288xf32, #tpu.memory_space<smem>>
    %1195 = vector.broadcast %1194 : f32 to vector<16x16xf32>
    %1196 = arith.mulf %1195, %110 : vector<16x16xf32>
    %1197 = arith.addf %1181, %1196 : vector<16x16xf32>
    %c241 = arith.constant 241 : index
    %1198 = memref.load %arg2[%c241] : memref<288xf32, #tpu.memory_space<smem>>
    %1199 = vector.broadcast %1198 : f32 to vector<16x16xf32>
    %1200 = arith.mulf %1199, %110 : vector<16x16xf32>
    %1201 = arith.addf %1185, %1200 : vector<16x16xf32>
    %c277 = arith.constant 277 : index
    %1202 = memref.load %arg2[%c277] : memref<288xf32, #tpu.memory_space<smem>>
    %1203 = vector.broadcast %1202 : f32 to vector<16x16xf32>
    %1204 = arith.mulf %1203, %110 : vector<16x16xf32>
    %1205 = arith.addf %1189, %1204 : vector<16x16xf32>
    %c170 = arith.constant 170 : index
    %1206 = memref.load %arg2[%c170] : memref<288xf32, #tpu.memory_space<smem>>
    %1207 = vector.broadcast %1206 : f32 to vector<16x16xf32>
    %1208 = arith.mulf %1207, %116 : vector<16x16xf32>
    %1209 = arith.addf %1193, %1208 : vector<16x16xf32>
    %c206 = arith.constant 206 : index
    %1210 = memref.load %arg2[%c206] : memref<288xf32, #tpu.memory_space<smem>>
    %1211 = vector.broadcast %1210 : f32 to vector<16x16xf32>
    %1212 = arith.mulf %1211, %116 : vector<16x16xf32>
    %1213 = arith.addf %1197, %1212 : vector<16x16xf32>
    %c242 = arith.constant 242 : index
    %1214 = memref.load %arg2[%c242] : memref<288xf32, #tpu.memory_space<smem>>
    %1215 = vector.broadcast %1214 : f32 to vector<16x16xf32>
    %1216 = arith.mulf %1215, %116 : vector<16x16xf32>
    %1217 = arith.addf %1201, %1216 : vector<16x16xf32>
    %c278 = arith.constant 278 : index
    %1218 = memref.load %arg2[%c278] : memref<288xf32, #tpu.memory_space<smem>>
    %1219 = vector.broadcast %1218 : f32 to vector<16x16xf32>
    %1220 = arith.mulf %1219, %116 : vector<16x16xf32>
    %1221 = arith.addf %1205, %1220 : vector<16x16xf32>
    %c171 = arith.constant 171 : index
    %1222 = memref.load %arg2[%c171] : memref<288xf32, #tpu.memory_space<smem>>
    %1223 = vector.broadcast %1222 : f32 to vector<16x16xf32>
    %1224 = arith.mulf %1223, %124 : vector<16x16xf32>
    %1225 = arith.addf %1209, %1224 : vector<16x16xf32>
    %c207 = arith.constant 207 : index
    %1226 = memref.load %arg2[%c207] : memref<288xf32, #tpu.memory_space<smem>>
    %1227 = vector.broadcast %1226 : f32 to vector<16x16xf32>
    %1228 = arith.mulf %1227, %124 : vector<16x16xf32>
    %1229 = arith.addf %1213, %1228 : vector<16x16xf32>
    %c243 = arith.constant 243 : index
    %1230 = memref.load %arg2[%c243] : memref<288xf32, #tpu.memory_space<smem>>
    %1231 = vector.broadcast %1230 : f32 to vector<16x16xf32>
    %1232 = arith.mulf %1231, %124 : vector<16x16xf32>
    %1233 = arith.addf %1217, %1232 : vector<16x16xf32>
    %c279 = arith.constant 279 : index
    %1234 = memref.load %arg2[%c279] : memref<288xf32, #tpu.memory_space<smem>>
    %1235 = vector.broadcast %1234 : f32 to vector<16x16xf32>
    %1236 = arith.mulf %1235, %124 : vector<16x16xf32>
    %1237 = arith.addf %1221, %1236 : vector<16x16xf32>
    %c172 = arith.constant 172 : index
    %1238 = memref.load %arg2[%c172] : memref<288xf32, #tpu.memory_space<smem>>
    %1239 = vector.broadcast %1238 : f32 to vector<16x16xf32>
    %1240 = arith.mulf %1239, %127 : vector<16x16xf32>
    %1241 = arith.addf %1225, %1240 : vector<16x16xf32>
    %c208 = arith.constant 208 : index
    %1242 = memref.load %arg2[%c208] : memref<288xf32, #tpu.memory_space<smem>>
    %1243 = vector.broadcast %1242 : f32 to vector<16x16xf32>
    %1244 = arith.mulf %1243, %127 : vector<16x16xf32>
    %1245 = arith.addf %1229, %1244 : vector<16x16xf32>
    %c244 = arith.constant 244 : index
    %1246 = memref.load %arg2[%c244] : memref<288xf32, #tpu.memory_space<smem>>
    %1247 = vector.broadcast %1246 : f32 to vector<16x16xf32>
    %1248 = arith.mulf %1247, %127 : vector<16x16xf32>
    %1249 = arith.addf %1233, %1248 : vector<16x16xf32>
    %c280 = arith.constant 280 : index
    %1250 = memref.load %arg2[%c280] : memref<288xf32, #tpu.memory_space<smem>>
    %1251 = vector.broadcast %1250 : f32 to vector<16x16xf32>
    %1252 = arith.mulf %1251, %127 : vector<16x16xf32>
    %1253 = arith.addf %1237, %1252 : vector<16x16xf32>
    %c173 = arith.constant 173 : index
    %1254 = memref.load %arg2[%c173] : memref<288xf32, #tpu.memory_space<smem>>
    %1255 = vector.broadcast %1254 : f32 to vector<16x16xf32>
    %1256 = arith.mulf %1255, %133 : vector<16x16xf32>
    %1257 = arith.addf %1241, %1256 : vector<16x16xf32>
    %c209 = arith.constant 209 : index
    %1258 = memref.load %arg2[%c209] : memref<288xf32, #tpu.memory_space<smem>>
    %1259 = vector.broadcast %1258 : f32 to vector<16x16xf32>
    %1260 = arith.mulf %1259, %133 : vector<16x16xf32>
    %1261 = arith.addf %1245, %1260 : vector<16x16xf32>
    %c245 = arith.constant 245 : index
    %1262 = memref.load %arg2[%c245] : memref<288xf32, #tpu.memory_space<smem>>
    %1263 = vector.broadcast %1262 : f32 to vector<16x16xf32>
    %1264 = arith.mulf %1263, %133 : vector<16x16xf32>
    %1265 = arith.addf %1249, %1264 : vector<16x16xf32>
    %c281 = arith.constant 281 : index
    %1266 = memref.load %arg2[%c281] : memref<288xf32, #tpu.memory_space<smem>>
    %1267 = vector.broadcast %1266 : f32 to vector<16x16xf32>
    %1268 = arith.mulf %1267, %133 : vector<16x16xf32>
    %1269 = arith.addf %1253, %1268 : vector<16x16xf32>
    %c174 = arith.constant 174 : index
    %1270 = memref.load %arg2[%c174] : memref<288xf32, #tpu.memory_space<smem>>
    %1271 = vector.broadcast %1270 : f32 to vector<16x16xf32>
    %1272 = arith.mulf %1271, %136 : vector<16x16xf32>
    %1273 = arith.addf %1257, %1272 : vector<16x16xf32>
    %c210 = arith.constant 210 : index
    %1274 = memref.load %arg2[%c210] : memref<288xf32, #tpu.memory_space<smem>>
    %1275 = vector.broadcast %1274 : f32 to vector<16x16xf32>
    %1276 = arith.mulf %1275, %136 : vector<16x16xf32>
    %1277 = arith.addf %1261, %1276 : vector<16x16xf32>
    %c246 = arith.constant 246 : index
    %1278 = memref.load %arg2[%c246] : memref<288xf32, #tpu.memory_space<smem>>
    %1279 = vector.broadcast %1278 : f32 to vector<16x16xf32>
    %1280 = arith.mulf %1279, %136 : vector<16x16xf32>
    %1281 = arith.addf %1265, %1280 : vector<16x16xf32>
    %c282 = arith.constant 282 : index
    %1282 = memref.load %arg2[%c282] : memref<288xf32, #tpu.memory_space<smem>>
    %1283 = vector.broadcast %1282 : f32 to vector<16x16xf32>
    %1284 = arith.mulf %1283, %136 : vector<16x16xf32>
    %1285 = arith.addf %1269, %1284 : vector<16x16xf32>
    %c175 = arith.constant 175 : index
    %1286 = memref.load %arg2[%c175] : memref<288xf32, #tpu.memory_space<smem>>
    %1287 = vector.broadcast %1286 : f32 to vector<16x16xf32>
    %1288 = arith.mulf %1287, %118 : vector<16x16xf32>
    %1289 = arith.addf %1273, %1288 : vector<16x16xf32>
    %c211 = arith.constant 211 : index
    %1290 = memref.load %arg2[%c211] : memref<288xf32, #tpu.memory_space<smem>>
    %1291 = vector.broadcast %1290 : f32 to vector<16x16xf32>
    %1292 = arith.mulf %1291, %118 : vector<16x16xf32>
    %1293 = arith.addf %1277, %1292 : vector<16x16xf32>
    %c247 = arith.constant 247 : index
    %1294 = memref.load %arg2[%c247] : memref<288xf32, #tpu.memory_space<smem>>
    %1295 = vector.broadcast %1294 : f32 to vector<16x16xf32>
    %1296 = arith.mulf %1295, %118 : vector<16x16xf32>
    %1297 = arith.addf %1281, %1296 : vector<16x16xf32>
    %c283 = arith.constant 283 : index
    %1298 = memref.load %arg2[%c283] : memref<288xf32, #tpu.memory_space<smem>>
    %1299 = vector.broadcast %1298 : f32 to vector<16x16xf32>
    %1300 = arith.mulf %1299, %118 : vector<16x16xf32>
    %1301 = arith.addf %1285, %1300 : vector<16x16xf32>
    %c176 = arith.constant 176 : index
    %1302 = memref.load %arg2[%c176] : memref<288xf32, #tpu.memory_space<smem>>
    %1303 = vector.broadcast %1302 : f32 to vector<16x16xf32>
    %1304 = arith.mulf %1303, %139 : vector<16x16xf32>
    %1305 = arith.addf %1289, %1304 : vector<16x16xf32>
    %c212 = arith.constant 212 : index
    %1306 = memref.load %arg2[%c212] : memref<288xf32, #tpu.memory_space<smem>>
    %1307 = vector.broadcast %1306 : f32 to vector<16x16xf32>
    %1308 = arith.mulf %1307, %139 : vector<16x16xf32>
    %1309 = arith.addf %1293, %1308 : vector<16x16xf32>
    %c248 = arith.constant 248 : index
    %1310 = memref.load %arg2[%c248] : memref<288xf32, #tpu.memory_space<smem>>
    %1311 = vector.broadcast %1310 : f32 to vector<16x16xf32>
    %1312 = arith.mulf %1311, %139 : vector<16x16xf32>
    %1313 = arith.addf %1297, %1312 : vector<16x16xf32>
    %c284 = arith.constant 284 : index
    %1314 = memref.load %arg2[%c284] : memref<288xf32, #tpu.memory_space<smem>>
    %1315 = vector.broadcast %1314 : f32 to vector<16x16xf32>
    %1316 = arith.mulf %1315, %139 : vector<16x16xf32>
    %1317 = arith.addf %1301, %1316 : vector<16x16xf32>
    %c177 = arith.constant 177 : index
    %1318 = memref.load %arg2[%c177] : memref<288xf32, #tpu.memory_space<smem>>
    %1319 = vector.broadcast %1318 : f32 to vector<16x16xf32>
    %1320 = arith.mulf %1319, %145 : vector<16x16xf32>
    %1321 = arith.addf %1305, %1320 : vector<16x16xf32>
    %c213 = arith.constant 213 : index
    %1322 = memref.load %arg2[%c213] : memref<288xf32, #tpu.memory_space<smem>>
    %1323 = vector.broadcast %1322 : f32 to vector<16x16xf32>
    %1324 = arith.mulf %1323, %145 : vector<16x16xf32>
    %1325 = arith.addf %1309, %1324 : vector<16x16xf32>
    %c249 = arith.constant 249 : index
    %1326 = memref.load %arg2[%c249] : memref<288xf32, #tpu.memory_space<smem>>
    %1327 = vector.broadcast %1326 : f32 to vector<16x16xf32>
    %1328 = arith.mulf %1327, %145 : vector<16x16xf32>
    %1329 = arith.addf %1313, %1328 : vector<16x16xf32>
    %c285 = arith.constant 285 : index
    %1330 = memref.load %arg2[%c285] : memref<288xf32, #tpu.memory_space<smem>>
    %1331 = vector.broadcast %1330 : f32 to vector<16x16xf32>
    %1332 = arith.mulf %1331, %145 : vector<16x16xf32>
    %1333 = arith.addf %1317, %1332 : vector<16x16xf32>
    %c178 = arith.constant 178 : index
    %1334 = memref.load %arg2[%c178] : memref<288xf32, #tpu.memory_space<smem>>
    %1335 = vector.broadcast %1334 : f32 to vector<16x16xf32>
    %1336 = arith.mulf %1335, %148 : vector<16x16xf32>
    %1337 = arith.addf %1321, %1336 : vector<16x16xf32>
    %c214 = arith.constant 214 : index
    %1338 = memref.load %arg2[%c214] : memref<288xf32, #tpu.memory_space<smem>>
    %1339 = vector.broadcast %1338 : f32 to vector<16x16xf32>
    %1340 = arith.mulf %1339, %148 : vector<16x16xf32>
    %1341 = arith.addf %1325, %1340 : vector<16x16xf32>
    %c250 = arith.constant 250 : index
    %1342 = memref.load %arg2[%c250] : memref<288xf32, #tpu.memory_space<smem>>
    %1343 = vector.broadcast %1342 : f32 to vector<16x16xf32>
    %1344 = arith.mulf %1343, %148 : vector<16x16xf32>
    %1345 = arith.addf %1329, %1344 : vector<16x16xf32>
    %c286 = arith.constant 286 : index
    %1346 = memref.load %arg2[%c286] : memref<288xf32, #tpu.memory_space<smem>>
    %1347 = vector.broadcast %1346 : f32 to vector<16x16xf32>
    %1348 = arith.mulf %1347, %148 : vector<16x16xf32>
    %1349 = arith.addf %1333, %1348 : vector<16x16xf32>
    %c179 = arith.constant 179 : index
    %1350 = memref.load %arg2[%c179] : memref<288xf32, #tpu.memory_space<smem>>
    %1351 = vector.broadcast %1350 : f32 to vector<16x16xf32>
    %1352 = arith.mulf %1351, %154 : vector<16x16xf32>
    %1353 = arith.addf %1337, %1352 : vector<16x16xf32>
    %c215 = arith.constant 215 : index
    %1354 = memref.load %arg2[%c215] : memref<288xf32, #tpu.memory_space<smem>>
    %1355 = vector.broadcast %1354 : f32 to vector<16x16xf32>
    %1356 = arith.mulf %1355, %154 : vector<16x16xf32>
    %1357 = arith.addf %1341, %1356 : vector<16x16xf32>
    %c251 = arith.constant 251 : index
    %1358 = memref.load %arg2[%c251] : memref<288xf32, #tpu.memory_space<smem>>
    %1359 = vector.broadcast %1358 : f32 to vector<16x16xf32>
    %1360 = arith.mulf %1359, %154 : vector<16x16xf32>
    %1361 = arith.addf %1345, %1360 : vector<16x16xf32>
    %c287 = arith.constant 287 : index
    %1362 = memref.load %arg2[%c287] : memref<288xf32, #tpu.memory_space<smem>>
    %1363 = vector.broadcast %1362 : f32 to vector<16x16xf32>
    %1364 = arith.mulf %1363, %154 : vector<16x16xf32>
    %1365 = arith.addf %1349, %1364 : vector<16x16xf32>
    %1366 = arith.truncf %1353 : vector<16x16xf32> to vector<16x16xbf16>
    %1367 = arith.truncf %1357 : vector<16x16xf32> to vector<16x16xbf16>
    %1368 = arith.truncf %1361 : vector<16x16xf32> to vector<16x16xbf16>
    %1369 = arith.truncf %1365 : vector<16x16xf32> to vector<16x16xbf16>
    %cst_73 = arith.constant dense<0.000000e+00> : vector<16x32xf32>
    %1370 = tpu.matmul %1366, %162, %cst_73 {dimension_numbers = #tpu.dot_dimension_numbers<[1], [0], [0], [1], [0, 0, 1, 1], [], []>} : vector<16x16xbf16>, vector<16x32xbf16>, vector<16x32xf32> -> vector<16x32xf32>
    %cst_74 = arith.constant dense<0.000000e+00> : vector<16x32xf32>
    %1371 = tpu.matmul %1367, %170, %cst_74 {dimension_numbers = #tpu.dot_dimension_numbers<[1], [0], [0], [1], [0, 0, 1, 1], [], []>} : vector<16x16xbf16>, vector<16x32xbf16>, vector<16x32xf32> -> vector<16x32xf32>
    %1372 = arith.addf %1370, %1371 : vector<16x32xf32>
    %cst_75 = arith.constant dense<0.000000e+00> : vector<16x32xf32>
    %1373 = tpu.matmul %1368, %162, %cst_75 {dimension_numbers = #tpu.dot_dimension_numbers<[1], [0], [0], [1], [0, 0, 1, 1], [], []>} : vector<16x16xbf16>, vector<16x32xbf16>, vector<16x32xf32> -> vector<16x32xf32>
    %cst_76 = arith.constant dense<0.000000e+00> : vector<16x32xf32>
    %1374 = tpu.matmul %1369, %170, %cst_76 {dimension_numbers = #tpu.dot_dimension_numbers<[1], [0], [0], [1], [0, 0, 1, 1], [], []>} : vector<16x16xbf16>, vector<16x32xbf16>, vector<16x32xf32> -> vector<16x32xf32>
    %1375 = arith.addf %1373, %1374 : vector<16x32xf32>
    %1376 = arith.truncf %1372 : vector<16x32xf32> to vector<16x32xbf16>
    %cst_77 = arith.constant dense<0.000000e+00> : vector<32x32xf32>
    %1377 = tpu.matmul %178, %1376, %cst_77 {dimension_numbers = #tpu.dot_dimension_numbers<[1], [0], [0], [1], [0, 0, 1, 1], [], []>} : vector<32x16xbf16>, vector<16x32xbf16>, vector<32x32xf32> -> vector<32x32xf32>
    %1378 = arith.truncf %1375 : vector<16x32xf32> to vector<16x32xbf16>
    %cst_78 = arith.constant dense<0.000000e+00> : vector<32x32xf32>
    %1379 = tpu.matmul %186, %1378, %cst_78 {dimension_numbers = #tpu.dot_dimension_numbers<[1], [0], [0], [1], [0, 0, 1, 1], [], []>} : vector<32x16xbf16>, vector<16x32xbf16>, vector<32x32xf32> -> vector<32x32xf32>
    %1380 = arith.addf %1377, %1379 : vector<32x32xf32>
    %1381 = arith.truncf %1380 : vector<32x32xf32> to vector<32x32xbf16>
    %c0_79 = arith.constant 0 : index
    %c1_80 = arith.constant 1 : index
    %c0_81 = arith.constant 0 : index
    %c0_82 = arith.constant 0 : index
    %1382 = vector.load %arg3[%c0_79, %c1_80, %c0_81, %c0_82] : memref<1x2x32x32xbf16, #tpu.memory_space<vmem>>, vector<1x1x32x32xbf16>
    %1383 = vector.shape_cast %1382 : vector<1x1x32x32xbf16> to vector<32x32xbf16>
    %1384 = vector.shape_cast %1381 : vector<32x32xbf16> to vector<1x1x32x32xbf16>
    tpu.vector_store %arg3[%c0_79, %c1_80, %c0_81, %c0_82], %1384 {strides = array<i32>} : memref<1x2x32x32xbf16, #tpu.memory_space<vmem>>, vector<1x1x32x32xbf16>,
    return
  }
  func.func @transform_0(%arg0: i32) -> (i32, i32, i32, i32) {
    %c0_i32 = arith.constant 0 : i32
    %c0_i32_0 = arith.constant 0 : i32
    %c0_i32_1 = arith.constant 0 : i32
    %c0_i32_2 = arith.constant 0 : i32
    return %arg0, %c0_i32, %c0_i32_0, %c0_i32_1 : i32, i32, i32, i32
  }
  func.func @transform_1(%arg0: i32) -> i32 {
    %c0_i32 = arith.constant 0 : i32
    %c0_i32_0 = arith.constant 0 : i32
    return %c0_i32 : i32
  }
  func.func @transform_2(%arg0: i32) -> (i32, i32, i32, i32) {
    %c0_i32 = arith.constant 0 : i32
    %c0_i32_0 = arith.constant 0 : i32
    %c0_i32_1 = arith.constant 0 : i32
    %c0_i32_2 = arith.constant 0 : i32
    return %arg0, %c0_i32, %c0_i32_0, %c0_i32_1 : i32, i32, i32, i32
  }
}

</mosaic_0001>

<bundles_post_ra>
// kernel: upsample_pallas.1
= control target key start
LH: loop header
LB: loop body
LE: loop exit
PB: predicated region body
PF: predicated region fallthrough
CT: control target
= control target key end

     0   :  { %s6442_s0 = inlined_call_operand.vmem [shape: bf16[2,4,16,16], index: 0, kind: input, shape index: {}]   ;;  %s6443_s1 = inlined_call_operand.vmem [shape: f32[288], index: 1, kind: input, shape index: {}]   ;;  %s6444_s2 = inlined_call_operand.hbm [shape: bf16[2,2,32,32], index: 2, kind: output, shape index: {}]  }
   0x1   :  { %6634 = sst [smem:[#allocation191_spill]] %s6442_s0 }
   0x2   :  { %6635 = sst [smem:[#allocation192_spill]] %s6443_s1 }
   0x3   :  { %6636 = sst [smem:[#allocation193_spill]] %s6444_s2 }
   0x4   :  { %7 = vsyncpa [#allocation4], 0 }
   0x5   :  { %8 = vsyncpa [#allocation3], 0 }
   0x6   :  { %10 = vsyncpa [#allocation3 + $0x1], 0  ;;  %s3713_s9 = smov 0   ;;  %s3715_s10 = smov 0  }
   0x7   :  { %s3717_s11 = smov 0   ;;  %s3719_s12 = smov 0  }
   0x8 LB: > { %6637 = sst [smem:[#allocation8_spill]] %s3675_s9  ;;  %s3734_s13 = sadd.s32 4294967295, %s3687_s12   ;;  %s3687_s12 = sphi %s3719_s12, %s7295_s12   ;;  %s3683_s11 = sphi %s3717_s11, %s7298_s11   ;;  %s3679_s10 = sphi %s3715_s10, %s7297_s10   ;;  %s3675_s9 = sphi %s3713_s9, %s7296_s9  }
   0x9   : > { %6638 = sst [smem:[#allocation9_spill]] %s3679_s10  ;;  %s2919_s14 = sadd.s32 4294967294, %s3687_s12  }
   0xa   : > { %6639 = sst [smem:[#allocation10_spill]] %s3683_s11  ;;  %s3738_s15 = sadd.s32 1, %s3687_s12  }
   0xb   : > { %6640 = sst [smem:[#allocation11_spill]] %s3687_s12  ;;  %s70_s16 = sadd.s32 1, %s3683_s11 }
   0xc   : > { %6641 = sst [smem:[#allocation12_spill]] %s3734_s13  ;;  %s67_s17 = ssub.s32 %s3687_s12, %s3738_s15 }
   0xd   : > { %6642 = sst [smem:[#allocation13_spill]] %s3738_s15  ;;  %p80_p0 = scmp.ne.s32.totalorder %s3683_s11, %s3679_s10 }
   0xe   : > { %p68_p1 = scmp.eq.s32.totalorder %s67_s17, 0  ;;  %p81_p2 = scmp.eq.s32.totalorder %s3734_s13, 1 }
   0xf   : > { %p86_p3 = scmp.ne.s32.totalorder %s3679_s10, %s3675_s9  ;;  %p87_p4 = scmp.eq.s32.totalorder %s2919_s14, 1 }
  0x10   : > { %s3749_s18 = scalar_select %p68_p1, %s3683_s11, %s70_s16  }
  0x11   : > { %p3751_p5 = por %p81_p2, %p80_p0  ;;  %p3755_p6 = por %p87_p4, %p86_p3 }
  0x12   : > { %6643 = sst [smem:[#allocation14_spill]] %s3749_s18  ;;  %p2920_p7 = scmp.ge.s32.totalorder %s3687_s12, 1 }
  0x13   : > { %s6644_s19 = scalar_select %p3751_p5, 1, 0 }
  0x14   : > { %s6646_s20 = scalar_select %p3755_p6, 1, 0 }
  0x15   : > { %6645 = sst [smem:[#allocation15_spill]] %s6644_s19  ;;  %p94_p8 = scmp.lt.s32.totalorder %s3687_s12, 3 }
  0x16   : > { %6647 = sst [smem:[#allocation16_spill]] %s6646_s20  ;;  %p3443_p9 = scmp.eq.s32.totalorder %s3734_s13, 0 }
  0x17   : > { %p3762_p10 = pnand %p2920_p7, %p94_p8  ;;  %s6649_s1 = sld [smem:[#allocation192_spill]] }
  0x19   : > { %p3435_p11 = pneg %p3762_p10 }
  0x1b   : > { %p3436_p12 = pnand %p3443_p9, %p3435_p11 }
  0x1d   : > { %s107_s24 = sshll.u32 %s6649_s1, 4  ;;  %p3608_p0 = pneg %p3436_p12  ;;  %s108_s24 = int_to_ptr.vmem [resolvable:$true] %s107_s24 }
  0x1e   : > { %s3606_s25 = scalar_lea.vmem %s108_s24, 48  ;;  %s3613_s26 = scalar_lea.vmem %s108_s24, 64 }
  0x1f   : > { %p3607_p13 = scmp.ne.s32.totalorder %s108_s24, %s3606_s25  ;;  %p3614_p3 = scmp.lt.s32.totalorder %s108_s24, %s108_s24 }
  0x20   : > { %p3615_p4 = scmp.lt.s32.totalorder %s3613_s26, %s3606_s25 }
  0x21   : > { %p3609_p1 = pnand %p3608_p0, %p3607_p13 }
  0x22   : > { %p3616_p7 = por %p3615_p4, %p3614_p3 }
  0x23   : > { %p3610_p2 = pneg %p3609_p1 }
  0x25   : > { %p3617_p8 = pnand %p3616_p7, %p3610_p2 }
  0x27   : > { %3620 = shalt.err (!%p3617_p8)
}
  0x28   : > { %s3689_s27 = smov [#allocation2]   ;;  %128 = sbr.rel (%p3762_p10) target bundleno = 1265 (0x4f1), region = 28 }
  0x29   : > { %3438 = dma.vmem_to_smem (!%p3436_p12), %s108_s24, 48, %s3689_s27, [#allocation4]  }
  0x2f   : > { %3666 = dma.done.wait (%p3443_p9), [#allocation4], 48  }
  0x30   : > { %3668 = vsyncadd (%p3443_p9), [#allocation4], 4294967248 }
  0x31   : > { %134 = sfence }
  0x32   : > { %p151_p11 = scmp.lt.s32.totalorder %s3734_s13, 1  ;;  %s6650_s0 = sld [smem:[#allocation191_spill]]  ;;  %vm175_vm0 = vcmask 1040384   ;;  %vm217_vm1 = vcmask 1046528   ;;  %vm189_vm2 = vcmask 7168   ;;  %vm198_vm3 = vcmask 121856  }
  0x33   : > { %s3690_s5 = smov 1   ;;  %s3691_s6 = smov 127   ;;  %vm3693_vm4 = vmmov 0   ;;  %vm1356_vm8 = vcmask 130048  }
  0x34   : > { %s152_s28 = scalar_select %p151_p11, %s3734_s13, 1 }
  0x35   : > { %s3905_s7 = sld [smem:[#allocation2]]  ;;  %s3907_s8 = sld [smem:[#allocation2 + $0x24]] }
  0x36   : > { %s3276_s29 = sshll.u32 %s152_s28, 5  ;;  %s3909_s14 = sld [smem:[#allocation2 + $0x48]] }
  0x37   : > { %s3911_s16 = sld [smem:[#allocation2 + $0x6c]]  ;;  %s3913_s17 = sld [smem:[#allocation2 + $0x1]] }
  0x38   : > { %s3784_s4 = scalar_lea.vmem %s6650_s0, %s3276_s29  ;;  %s3915_s21 = sld [smem:[#allocation2 + $0x25]] }
  0x39   : > { %v3287_v0 = vld [vmem:[%s3784_s4] sm:$0xff]   ;;  %v3302_v1 = vld [vmem:[%s3784_s4 + $0x8] sm:$0xff]   ;;  %v3303_v21 = vld [vmem:[%s3784_s4 + $0x10] sm:$0xff]   ;;  %s3924_s22 = sld [smem:[#allocation2 + $0x49]]  ;;  %s3926_s23 = sld [smem:[#allocation2 + $0x6d]] }
  0x3a   : > { %v3788_v2 = vunpack.c.l.bf16 %v3287_v0  ;;  %v3790_v3 = vunpack.c.h.bf16 %v3287_v0  ;;  %v3796_v7 = vunpack.c.l.bf16 %v3302_v1  ;;  %v3800_v10 = vunpack.c.h.bf16 %v3302_v1  ;;  %v3304_v35 = vld [vmem:[%s3784_s4 + $0x18] sm:$0xff]   ;;  %s3931_s24 = sld [smem:[#allocation2 + $0x90]]  ;;  %s3933_s25 = sld [smem:[#allocation2 + $0xb4]] }
  0x3b   : > { %v3834_v23 = vunpack.c.l.bf16 %v3303_v21  ;;  %v3839_v26 = vunpack.c.h.bf16 %v3303_v21  ;;  %v3867_v37 = vunpack.c.l.bf16 %v3304_v35  ;;  %v3872_v40 = vunpack.c.h.bf16 %v3304_v35  ;;  %6661 = sst [smem:[#allocation27_spill]] %s3905_s7  ;;  %s3935_s26 = sld [smem:[#allocation2 + $0xd8]] }
  0x3c   : > { %v176_v4 = vrot.slane %v3788_v2, 7  ;;  %v177_v5 = vrot.slane %v3790_v3, 7  ;;  %v3496_v6 = vpack.i.bf16 %v3790_v3, %v3788_v2  ;;  %v218_v8 = vrot.slane %v3788_v2, 1  ;;  %6662 = sst [smem:[#allocation28_spill]] %s3907_s8  ;;  %s3937_s27 = sld [smem:[#allocation2 + $0xfc]] }
  0x3d   : > { %v219_v9 = vrot.slane %v3790_v3, 1  ;;  %v243_v14 = vrot.slane %v3796_v7, 7  ;;  %v244_v17 = vrot.slane %v3800_v10, 7  ;;  %6651 = vst [vmem:[#allocation17_spill] sm:$0xff] %v3834_v23  ;;  %v282_v24 = vrot.slane %v3796_v7, 1  ;;  %6652 = vst [vmem:[#allocation18_spill] sm:$0xff] %v3839_v26 }
  0x3e   : > { %v3803_v11 = vsel %vm175_vm0, %v176_v4, %v177_v5  ;;  %v3806_v12 = vsel %vm175_vm0, 0.0, %v176_v4  ;;  %3497 = vrot.lane.b32.xlu1 %v3496_v6, %s3690_s5  ;;  %v283_v25 = vrot.slane %v3800_v10, 1  ;;  %v3531_v27 = vpack.i.bf16 %v3800_v10, %v3796_v7  ;;  %6655 = vst [vmem:[#allocation21_spill] sm:$0xff] %v3867_v37  ;;  %6656 = vst [vmem:[#allocation22_spill] sm:$0xff] %v3872_v40  ;;  %6663 = sst [smem:[#allocation29_spill]] %s3909_s14  ;;  %s3939_s28 = sld [smem:[#allocation2 + $0x91]] }
  0x3f   : > { %v3486_v13 = vpack.i.bf16 %v3803_v11, %v3806_v12  ;;  %v3814_v15 = vsel %vm217_vm1, %v218_v8, %v219_v9  ;;  %v3817_v16 = vsel %vm217_vm1, %v219_v9, 0.0  ;;  %v3825_v19 = vsel %vm175_vm0, %v243_v14, %v244_v17  ;;  %6664 = sst [smem:[#allocation30_spill]] %s3911_s16  ;;  %s3941_s29 = sld [smem:[#allocation2 + $0xb5]] }
  0x40   : > { %v3511_v18 = vpack.i.bf16 %v3817_v16, %v3814_v15  ;;  %v3828_v20 = vsel %vm175_vm0, 0.0, %v243_v14  ;;  %v3846_v28 = vsel %vm217_vm1, %v282_v24, %v283_v25  ;;  %v3849_v29 = vsel %vm217_vm1, %v283_v25, 0.0  ;;  %6667 = sst [smem:[#allocation33_spill]] %s3931_s24  ;;  %s3944_s30 = sld [smem:[#allocation2 + $0xd9]] }
  0x41   : > { %3487 = vrot.lane.b32.xlu0 %v3486_v13, %s3690_s5  ;;  %v3521_v22 = vpack.i.bf16 %v3825_v19, %v3828_v20  ;;  %v307_v30 = vrot.slane %v3834_v23, 7  ;;  %v308_v31 = vrot.slane %v3839_v26, 7  ;;  %v3541_v32 = vpack.i.bf16 %v3849_v29, %v3846_v28  ;;  %6668 = sst [smem:[#allocation34_spill]] %s3933_s25  ;;  %s3946_s3 = sld [smem:[#allocation2 + $0xfd]] }
  0x42   : > { %3502 = vrot.lane.b32.xlu1 %v3496_v6, %s3691_s6  ;;  %v346_v38 = vrot.slane %v3834_v23, 1  ;;  %v347_v39 = vrot.slane %v3839_v26, 1  ;;  %v3561_v41 = vpack.i.bf16 %v3839_v26, %v3834_v23  ;;  %v371_v44 = vrot.slane %v3867_v37, 7  ;;  %6669 = sst [smem:[#allocation35_spill]] %s3935_s26  ;;  %s3949_s4 = sld [smem:[#allocation2 + $0x2]] }
  0x43   : > { %v3858_v33 = vsel %vm175_vm0, %v307_v30, %v308_v31  ;;  %v3861_v34 = vsel %vm175_vm0, 0.0, %v307_v30  ;;  %v372_v45 = vrot.slane %v3872_v40, 7  ;;  %v410_v50 = vrot.slane %v3867_v37, 1  ;;  %6670 = sst [smem:[#allocation36_spill]] %s3937_s27  ;;  %s3951_s0 = sld [smem:[#allocation2 + $0x26]] }
  0x44   : > { %6653 = vst [vmem:[#allocation19_spill] sm:$0xff] %v3858_v33  ;;  %6654 = vst [vmem:[#allocation20_spill] sm:$0xff] %v3861_v34  ;;  %v3551_v36 = vpack.i.bf16 %v3858_v33, %v3861_v34  ;;  %v3879_v42 = vsel %vm217_vm1, %v346_v38, %v347_v39  ;;  %v3882_v43 = vsel %vm217_vm1, %v347_v39, 0.0  ;;  %v3894_v48 = vsel %vm175_vm0, 0.0, %v371_v44  ;;  %s3953_s1 = sld [smem:[#allocation2 + $0x4a]]  ;;  %s3955_s18 = sld [smem:[#allocation2 + $0x6e]] }
  0x45   : > { %3492 = vrot.lane.b32.xlu0 %v3486_v13, %s3691_s6  ;;  %6657 = vst [vmem:[#allocation23_spill] sm:$0xff] %v3879_v42  ;;  %6658 = vst [vmem:[#allocation24_spill] sm:$0xff] %v3882_v43  ;;  %v3571_v46 = vpack.i.bf16 %v3882_v43, %v3879_v42  ;;  %v3891_v47 = vsel %vm175_vm0, %v371_v44, %v372_v45  ;;  %v411_v51 = vrot.slane %v3872_v40, 1  ;;  %s3957_s11 = sld [smem:[#allocation2 + $0x92]]  ;;  %s3959_s15 = sld [smem:[#allocation2 + $0xb6]]  ;;  %v513_v56 = vstv %s3913_s17 }
  0x46   : > { %3512 = vrot.lane.b32.xlu1 %v3511_v18, %s3691_s6  ;;  %6659 = vst [vmem:[#allocation25_spill] sm:$0xff] %v3891_v47  ;;  %6660 = vst [vmem:[#allocation26_spill] sm:$0xff] %v3894_v48  ;;  %v3581_v49 = vpack.i.bf16 %v3891_v47, %v3894_v48  ;;  %v3591_v52 = vpack.i.bf16 %v3872_v40, %v3867_v37  ;;  %s3962_s20 = sld [smem:[#allocation2 + $0xda]]  ;;  %s3964_s9 = sld [smem:[#allocation2 + $0xfe]]  ;;  %v519_v57 = vstv %s3915_s21  ;;  %v525_v58 = vstv %s3924_s22 }
  0x47   : > { %v3919_v53 = vsel %vm217_vm1, %v410_v50, %v411_v51  ;;  %v3922_v54 = vsel %vm217_vm1, %v411_v51, 0.0  ;;  %s3966_s12 = sld [smem:[#allocation2 + $0x3]]  ;;  %s3972_s19 = sld [smem:[#allocation2 + $0x6f]]  ;;  %v531_v59 = vstv %s3926_s23  ;;  %v4019_v0 = vmul.f32 %v513_v56, %v3806_v12 }
  0x48   : > { %6665 = vst [vmem:[#allocation31_spill] sm:$0xff] %v3919_v53  ;;  %6666 = vst [vmem:[#allocation32_spill] sm:$0xff] %v3922_v54  ;;  %v3601_v55 = vpack.i.bf16 %v3922_v54, %v3919_v53  ;;  %6671 = sst [smem:[#allocation37_spill]] %s3949_s4  ;;  %s3970_s2 = sld [smem:[#allocation2 + $0x4b]]  ;;  %v4022_v1 = vmul.f32 %v519_v57, %v3806_v12  ;;  %v1691_v4 = vstv %s3939_s28  ;;  %v1697_v5 = vstv %s3941_s29 }
  0x49   : > { %3507 = vrot.lane.b32.xlu0 %v3511_v18, %s3690_s5  ;;  %6672 = sst [smem:[#allocation38_spill]] %s3951_s0  ;;  %s3974_s13 = sld [smem:[#allocation2 + $0x93]]  ;;  %v4031_v6 = vmul.f32 %v525_v58, %v3806_v12  ;;  %v4034_v8 = vmul.f32 %v531_v59, %v3806_v12  ;;  %v1703_v9 = vstv %s3944_s30  ;;  %v1709_v13 = vstv %s3946_s3 }
  0x4a   : > { %3522 = vrot.lane.b32.xlu1 %v3521_v22, %s3691_s6  ;;  %6673 = sst [smem:[#allocation39_spill]] %s3953_s1  ;;  %s3976_s10 = sld [smem:[#allocation2 + $0xb7]]  ;;  %v4046_v21 = vmul.f32 %v513_v56, %v3803_v11  ;;  %v4054_v24 = vmul.f32 %v1691_v4, %v3806_v12  ;;  %v4057_v25 = vmul.f32 %v1697_v5, %v3806_v12  ;;  %v4067_v30 = vmul.f32 %v1703_v9, %v3806_v12 }
  0x4b   : > { %6674 = sst [smem:[#allocation40_spill]] %s3955_s18  ;;  %s4014_s17 = sld [smem:[#allocation2 + $0x95]]  ;;  %v4070_v31 = vmul.f32 %v1709_v13, %v3806_v12  ;;  %v4076_v35 = vmul.f32 %v531_v59, %v3803_v11  ;;  %v4086_v12 = vmul.f32 %v1697_v5, %v3803_v11  ;;  %v4089_v38 = vmul.f32 %v1703_v9, %v3803_v11 }
  0x4c   : > { %6675 = sst [smem:[#allocation41_spill]] %s3957_s11  ;;  %s4016_s21 = sld [smem:[#allocation2 + $0xb9]]  ;;  %v4092_v39 = vmul.f32 %v1709_v13, %v3803_v11 }
  0x4d   : > { %3517 = vrot.lane.b32.xlu0 %v3521_v22, %s3690_s5  ;;  %6676 = sst [smem:[#allocation42_spill]] %s3959_s15  ;;  %s4026_s22 = sld [smem:[#allocation2 + $0xdd]] }
  0x4e   : > { %3532 = vrot.lane.b32.xlu1 %v3531_v27, %s3691_s6  ;;  %6677 = sst [smem:[#allocation43_spill]] %s3962_s20  ;;  %s4028_s23 = sld [smem:[#allocation2 + $0x101]] }
  0x4f   : > { %6678 = sst [smem:[#allocation44_spill]] %s3964_s9  ;;  %s3980_s20 = sld [smem:[#allocation2 + $0xff]] }
  0x50   : > { %6679 = sst [smem:[#allocation45_spill]] %s3966_s12  ;;  %s3982_s9 = sld [smem:[#allocation2 + $0x4]] }
  0x51   : > { %3527 = vrot.lane.b32.xlu0 %v3531_v27, %s3690_s5  ;;  %6681 = sst [smem:[#allocation47_spill]] %s3970_s2  ;;  %s3984_s12 = sld [smem:[#allocation2 + $0x28]]  ;;  %v4060_v27 = vmul.f32 %v519_v57, %v3803_v11 }
  0x52   : > { %3542 = vrot.lane.b32.xlu1 %v3541_v32, %s3691_s6  ;;  %6682 = sst [smem:[#allocation48_spill]] %s3972_s19  ;;  %s3988_s19 = sld [smem:[#allocation2 + $0x70]] }
  0x53   : > { %6683 = sst [smem:[#allocation49_spill]] %s3974_s13  ;;  %s4038_s16 = sld [smem:[#allocation2 + $0x6]] }
  0x54   : > { %6684 = sst [smem:[#allocation50_spill]] %s3976_s10  ;;  %s3990_s13 = sld [smem:[#allocation2 + $0x5]] }
  0x55   : > { %3537 = vrot.lane.b32.xlu0 %v3541_v32, %s3690_s5  ;;  %6686 = sst [smem:[#allocation52_spill]] %s3980_s20  ;;  %s3992_s10 = sld [smem:[#allocation2 + $0x29]]  ;;  %v4073_v32 = vmul.f32 %v525_v58, %v3803_v11 }
  0x56   : > { %3552 = vrot.lane.b32.xlu1 %v3551_v36, %s3691_s6  ;;  %s3994_s2 = sld [smem:[#allocation2 + $0x4d]]  ;;  %s4000_s20 = sld [smem:[#allocation2 + $0x94]]  ;;  %v585_v56 = vstv %s3982_s9 }
  0x57   : > { %6687 = sst [smem:[#allocation53_spill]] %s3984_s12  ;;  %s4002_s12 = sld [smem:[#allocation2 + $0xb8]]  ;;  %v4177_v62 = vmul.f32 %v3788_v2, %v585_v56 }
  0x58   : > { %6688 = sst [smem:[#allocation54_spill]] %s3988_s19  ;;  %s4006_s19 = sld [smem:[#allocation2 + $0xdc]] }
  0x59   : > { %3547 = vrot.lane.b32.xlu0 %v3551_v36, %s3690_s5  ;;  %6693 = sst [smem:[#allocation59_spill]] %s4014_s17  ;;  %s4040_s14 = sld [smem:[#allocation2 + $0x2a]]  ;;  %v4083_v36 = vmul.f32 %v1691_v4, %v3803_v11 }
  0x5a   : > { %3562 = vrot.lane.b32.xlu1 %v3561_v41, %s3691_s6  ;;  %6689 = sst [smem:[#allocation55_spill]] %s3990_s13  ;;  %s4008_s13 = sld [smem:[#allocation2 + $0x100]] }
  0x5b   : > { %6690 = sst [smem:[#allocation56_spill]] %s3992_s10  ;;  %s4048_s28 = sld [smem:[#allocation2 + $0x4e]] }
  0x5c   : > { %6691 = sst [smem:[#allocation57_spill]] %s3994_s2  ;;  %s4050_s29 = sld [smem:[#allocation2 + $0x72]] }
  0x5d   : > { %3557 = vrot.lane.b32.xlu0 %v3561_v41, %s3690_s5  ;;  %6694 = sst [smem:[#allocation60_spill]] %s4016_s21  ;;  %s4062_s30 = sld [smem:[#allocation2 + $0x96]]  ;;  %v1769_v45 = vstv %s4002_s12 }
  0x5e   : > { %3572 = vrot.lane.b32.xlu1 %v3571_v46, %s3691_s6  ;;  %6695 = sst [smem:[#allocation61_spill]] %s4026_s22  ;;  %s4064_s3 = sld [smem:[#allocation2 + $0xba]]  ;;  %v1775_v17 = vstv %s4006_s19  ;;  %v4174_v63 = vmul.f32 %v3790_v3, %v1769_v45 }
  0x5f   : > { %6696 = sst [smem:[#allocation62_spill]] %s4028_s23  ;;  %s4078_s25 = sld [smem:[#allocation2 + $0xde]]  ;;  %v4187_v13 = vmul.f32 %v3790_v3, %v1775_v17 }
  0x60   : > { %6697 = sst [smem:[#allocation63_spill]] %s4038_s16  ;;  %s4080_s27 = sld [smem:[#allocation2 + $0x102]]  ;;  %v1781_v14 = vstv %s4008_s13  ;;  %6734 = vst [vmem:[#allocation84_spill] sm:$0xff] %v4174_v63 }
  0x61   : > { %3567 = vrot.lane.b32.xlu0 %v3571_v46, %s3690_s5  ;;  %6698 = sst [smem:[#allocation64_spill]] %s4040_s14  ;;  %s4104_s14 = sld [smem:[#allocation2 + $0x73]]  ;;  %v1763_v46 = vstv %s4000_s20  ;;  %6737 = vst [vmem:[#allocation87_spill] sm:$0xff] %v4187_v13  ;;  %v4190_v51 = vmul.f32 %v3790_v3, %v1781_v14 }
  0x62   : > { %3582 = vrot.lane.b32.xlu1 %v3581_v49, %s3691_s6  ;;  %6699 = sst [smem:[#allocation65_spill]] %s4048_s28  ;;  %s4102_s28 = sld [smem:[#allocation2 + $0x4f]]  ;;  %v4171_v18 = vmul.f32 %v3790_v3, %v1763_v46 }
  0x63   : > { %6700 = sst [smem:[#allocation66_spill]] %s4050_s29  ;;  %s6715_s16 = sld [smem:[#allocation54_spill]]  ;;  %6738 = vst [vmem:[#allocation88_spill] sm:$0xff] %v4190_v51 }
  0x64   : > { %6701 = sst [smem:[#allocation67_spill]] %s4062_s30  ;;  %s4112_s0 = sld [smem:[#allocation2 + $0x2c]]  ;;  %6733 = vst [vmem:[#allocation83_spill] sm:$0xff] %v4171_v18 }
  0x65   : > { %3577 = vrot.lane.b32.xlu0 %v3581_v49, %s3690_s5  ;;  %6702 = sst [smem:[#allocation68_spill]] %s4064_s3  ;;  %s4094_s3 = sld [smem:[#allocation2 + $0x7]]  ;;  %v4139_v49 = vmul.f32 %v3790_v3, %v585_v56  ;;  %v4214_v56 = vmul.f32 %v3788_v2, %v1769_v45 }
  0x66   : > { %3592 = vrot.lane.b32.xlu1 %v3591_v52, %s3691_s6  ;;  %6703 = sst [smem:[#allocation69_spill]] %s4078_s25  ;;  %s4096_s25 = sld [smem:[#allocation2 + $0x2b]] }
  0x67   : > { %6705 = sst [smem:[#allocation70_spill]] %s4080_s27  ;;  %s6711_s27 = sld [smem:[#allocation53_spill]]  ;;  %6753 = vst [vmem:[#allocation93_spill] sm:$0xff] %v4214_v56 }
  0x68   : > { %6714 = sst [smem:[#allocation53_spill]] %s4104_s14  ;;  %s4118_s18 = sld [smem:[#allocation2 + $0x50]]  ;;  %v669_v61 = vstv %s4102_s28 }
  0x69   : > { %3587 = vrot.lane.b32.xlu0 %v3591_v52, %s3690_s5  ;;  %s4120_s14 = sld [smem:[#allocation2 + $0x74]]  ;;  %v603_v5 = vstv %s6715_s16  ;;  %s4126_s26 = sld [smem:[#allocation2 + $0x97]]  ;;  %v4257_v45 = vmul.f32 %v669_v61, %v3817_v16  ;;  %v4289_v43 = vmul.f32 %v669_v61, %v3814_v15 }
  0x6a   : > { %3602 = vrot.lane.b32.xlu1 %v3601_v55, %s3691_s6  ;;  %s3968_s6 = sld [smem:[#allocation2 + $0x27]]  ;;  %6720 = sst [smem:[#allocation73_spill]] %s4112_s0  ;;  %v4154_v41 = vmul.f32 %v3790_v3, %v603_v5  ;;  %v4204_v9 = vmul.f32 %v3788_v2, %v603_v5  ;;  %v4220_v5 = vmul.f32 %v3788_v2, %v1781_v14 }
  0x6b   : > { %6709 = sst [smem:[#allocation71_spill]] %s4094_s3  ;;  %s4146_s16 = sld [smem:[#allocation2 + $0x98]]  ;;  %6767 = vst [vmem:[#allocation103_spill] sm:$0xff] %v4257_v45  ;;  %6773 = vst [vmem:[#allocation109_spill] sm:$0xff] %v4289_v43 }
  0x6c   : > { %6710 = sst [smem:[#allocation72_spill]] %s4096_s25  ;;  %s4110_s25 = sld [smem:[#allocation2 + $0x8]]  ;;  %6728 = vst [vmem:[#allocation79_spill] sm:$0xff] %v4154_v41  ;;  %6746 = vst [vmem:[#allocation90_spill] sm:$0xff] %v4204_v9 }
  0x6d   : > { %3597 = vrot.lane.b32.xlu0 %v3601_v55, %s3690_s5  ;;  %s3978_s5 = sld [smem:[#allocation2 + $0xdb]]  ;;  %v591_v57 = vstv %s6711_s27  ;;  %s4134_s27 = sld [smem:[#allocation2 + $0xdf]]  ;;  %6756 = vst [vmem:[#allocation95_spill] sm:$0xff] %v4220_v5 }
  0x6e   : > { %6722 = sst [smem:[#allocation74_spill]] %s4118_s18  ;;  %s4128_s24 = sld [smem:[#allocation2 + $0xbb]]  ;;  %v4142_v11 = vmul.f32 %v3790_v3, %v591_v57  ;;  %v4180_v22 = vmul.f32 %v3788_v2, %v591_v57 }
  0x6f   : > { %6723 = sst [smem:[#allocation75_spill]] %s4120_s14  ;;  %s4136_s15 = sld [smem:[#allocation2 + $0x103]]  ;;  %v1835_v52 = vstv %s4126_s26 }
  0x70   : > { %6680 = sst [smem:[#allocation46_spill]] %s3968_s6  ;;  %s3986_s6 = sld [smem:[#allocation2 + $0x4c]]  ;;  %v4299_v37 = vmul.f32 %v1835_v52, %v3817_v16 }
  0x71   : > { %6725 = sst [smem:[#allocation76_spill]] %s4146_s16  ;;  %s4160_s1 = sld [smem:[#allocation2 + $0x104]] }
  0x72   : > { %6718 = sst [smem:[#allocation54_spill]] %s4110_s25  ;;  %s4158_s11 = sld [smem:[#allocation2 + $0xe0]]  ;;  %6777 = vst [vmem:[#allocation113_spill] sm:$0xff] %v4299_v37 }
  0x73   : > { %6685 = sst [smem:[#allocation51_spill]] %s3978_s5  ;;  %s3996_s5 = sld [smem:[#allocation2 + $0x71]]  ;;  %v1847_v14 = vstv %s4134_s27 }
  0x74   : > { %s4166_s20 = sld [smem:[#allocation2 + $0x9]]  ;;  %s4168_s4 = sld [smem:[#allocation2 + $0x2d]]  ;;  %v1841_v55 = vstv %s4128_s24  ;;  %v4329_v23 = vmul.f32 %v1847_v14, %v3814_v15 }
  0x75   : > { %s4182_s13 = sld [smem:[#allocation2 + $0x51]]  ;;  %s4184_s19 = sld [smem:[#allocation2 + $0x75]]  ;;  %v4302_v53 = vmul.f32 %v1841_v55, %v3817_v16  ;;  %v4326_v26 = vmul.f32 %v1841_v55, %v3814_v15 }
  0x76   : > { %v597_v4 = vstv %s3986_s6  ;;  %s4148_s6 = sld [smem:[#allocation2 + $0xbc]]  ;;  %s4194_s10 = sld [smem:[#allocation2 + $0x99]]  ;;  %6790 = vst [vmem:[#allocation120_spill] sm:$0xff] %v4329_v23 }
  0x77   : > { %v4151_v44 = vmul.f32 %v3790_v3, %v597_v4  ;;  %6730 = sst [smem:[#allocation81_spill]] %s4160_s1  ;;  %s6740_s2 = sld [smem:[#allocation72_spill]]  ;;  %v4201_v60 = vmul.f32 %v3788_v2, %v597_v4  ;;  %v4211_v3 = vmul.f32 %v3788_v2, %v1763_v46  ;;  %v4217_v4 = vmul.f32 %v3788_v2, %v1775_v17  ;;  %6778 = vst [vmem:[#allocation114_spill] sm:$0xff] %v4302_v53 }
  0x78   : > { %6729 = sst [smem:[#allocation80_spill]] %s4158_s11  ;;  %s4196_s9 = sld [smem:[#allocation2 + $0xbd]]  ;;  %v1853_v17 = vstv %s4136_s15  ;;  %6789 = vst [vmem:[#allocation119_spill] sm:$0xff] %v4326_v26 }
  0x79   : > { %6692 = sst [smem:[#allocation58_spill]] %s3996_s5  ;;  %6727 = vst [vmem:[#allocation78_spill] sm:$0xff] %v4151_v44  ;;  %s6739_s5 = sld [smem:[#allocation71_spill]]  ;;  %6744 = vst [vmem:[#allocation89_spill] sm:$0xff] %v4201_v60  ;;  %v4308_v61 = vmul.f32 %v1853_v17, %v3817_v16  ;;  %v4332_v54 = vmul.f32 %v1853_v17, %v3814_v15 }
  0x7a   : > { %6732 = sst [smem:[#allocation82_spill]] %s4168_s4  ;;  %s6743_s23 = sld [smem:[#allocation53_spill]]  ;;  %6752 = vst [vmem:[#allocation92_spill] sm:$0xff] %v4211_v3  ;;  %6754 = vst [vmem:[#allocation94_spill] sm:$0xff] %v4217_v4 }
  0x7b   : > { %6735 = sst [smem:[#allocation85_spill]] %s4182_s13  ;;  %s4206_s17 = sld [smem:[#allocation2 + $0xe1]]  ;;  %6780 = vst [vmem:[#allocation116_spill] sm:$0xff] %v4308_v61  ;;  %6792 = vst [vmem:[#allocation121_spill] sm:$0xff] %v4332_v54 }
  0x7c   : > { %6726 = sst [smem:[#allocation77_spill]] %s4148_s6  ;;  %s4208_s30 = sld [smem:[#allocation2 + $0x105]] }
  0x7d   : > { %6736 = sst [smem:[#allocation86_spill]] %s4184_s19  ;;  %s4222_s8 = sld [smem:[#allocation2 + $0xa]]  ;;  %v663_v46 = vstv %s6740_s2 }
  0x7e   : > { %6741 = sst [smem:[#allocation71_spill]] %s4194_s10  ;;  %s4230_s10 = sld [smem:[#allocation2 + $0x52]]  ;;  %v4254_v59 = vmul.f32 %v663_v46, %v3817_v16  ;;  %v4286_v48 = vmul.f32 %v663_v46, %v3814_v15 }
  0x7f   : > { %6742 = sst [smem:[#allocation72_spill]] %s4196_s9  ;;  %s4224_s9 = sld [smem:[#allocation2 + $0x2e]]  ;;  %v657_v57 = vstv %s6739_s5 }
  0x80   : > { %v675_v50 = vstv %s6743_s23  ;;  %s4232_s19 = sld [smem:[#allocation2 + $0x76]]  ;;  %s4238_s13 = sld [smem:[#allocation2 + $0xb]]  ;;  %v4251_v2 = vmul.f32 %v657_v57, %v3817_v16  ;;  %6766 = vst [vmem:[#allocation102_spill] sm:$0xff] %v4254_v59  ;;  %v4283_v47 = vmul.f32 %v657_v57, %v3814_v15  ;;  %6772 = vst [vmem:[#allocation108_spill] sm:$0xff] %v4286_v48  ;;  %v4305_v57 = vmul.f32 %v1847_v14, %v3817_v16 }
  0x81   : > { %6748 = sst [smem:[#allocation53_spill]] %s4206_s17  ;;  %s4246_s2 = sld [smem:[#allocation2 + $0x53]]  ;;  %v4260_v58 = vmul.f32 %v675_v50, %v3817_v16  ;;  %v4292_v40 = vmul.f32 %v675_v50, %v3814_v15  ;;  %v4323_v16 = vmul.f32 %v1835_v52, %v3814_v15 }
  0x82   : > { %6750 = sst [smem:[#allocation91_spill]] %s4208_s30  ;;  %6765 = vst [vmem:[#allocation101_spill] sm:$0xff] %v4251_v2  ;;  %s4262_s23 = sld [smem:[#allocation2 + $0x9a]]  ;;  %6771 = vst [vmem:[#allocation107_spill] sm:$0xff] %v4283_v47 }
  0x83   : > { %6758 = sst [smem:[#allocation96_spill]] %s4222_s8  ;;  %s4240_s8 = sld [smem:[#allocation2 + $0x2f]]  ;;  %6768 = vst [vmem:[#allocation104_spill] sm:$0xff] %v4260_v58  ;;  %6774 = vst [vmem:[#allocation110_spill] sm:$0xff] %v4292_v40 }
  0x84   : > { %s4248_s5 = sld [smem:[#allocation2 + $0x77]]  ;;  %s4264_s28 = sld [smem:[#allocation2 + $0xbe]]  ;;  %6779 = vst [vmem:[#allocation115_spill] sm:$0xff] %v4305_v57  ;;  %6788 = vst [vmem:[#allocation118_spill] sm:$0xff] %v4323_v16  ;;  %v741_v42 = vstv %s4230_s10 }
  0x85   : > { %s4270_s30 = sld [smem:[#allocation2 + $0xe2]]  ;;  %s4272_s22 = sld [smem:[#allocation2 + $0x106]]  ;;  %v735_v50 = vstv %s4224_s9 }
  0x86   : > { %6761 = sst [smem:[#allocation97_spill]] %s4238_s13  ;;  %s4278_s17 = sld [smem:[#allocation2 + $0x9b]]  ;;  %v747_v34 = vstv %s4232_s19  ;;  %v4369_v14 = vmul.f32 %v735_v50, %v3828_v20  ;;  %v4372_v55 = vmul.f32 %v735_v50, %v3825_v19  ;;  %v4390_v50 = vmul.f32 %v741_v42, %v3825_v19 }
  0x87   : > { %6763 = sst [smem:[#allocation99_spill]] %s4246_s2  ;;  %s4280_s12 = sld [smem:[#allocation2 + $0xbf]]  ;;  %v4401_v17 = vmul.f32 %v747_v34, %v3825_v19 }
  0x88   : > { %s4294_s15 = sld [smem:[#allocation2 + $0xe3]]  ;;  %s4296_s24 = sld [smem:[#allocation2 + $0x107]]  ;;  %6800 = vst [vmem:[#allocation128_spill] sm:$0xff] %v4369_v14  ;;  %6801 = vst [vmem:[#allocation129_spill] sm:$0xff] %v4372_v55  ;;  %v1907_v61 = vstv %s4262_s23  ;;  %v4393_v55 = vmul.f32 %v747_v34, %v3828_v20 }
  0x89   : > { %6762 = sst [smem:[#allocation98_spill]] %s4240_s8  ;;  %s4310_s26 = sld [smem:[#allocation2 + $0xc]]  ;;  %6806 = vst [vmem:[#allocation134_spill] sm:$0xff] %v4390_v50  ;;  %6808 = vst [vmem:[#allocation136_spill] sm:$0xff] %v4401_v17 }
  0x8a   : > { %6764 = sst [smem:[#allocation100_spill]] %s4248_s5  ;;  %s6781_s27 = sld [smem:[#allocation96_spill]]  ;;  %6807 = vst [vmem:[#allocation135_spill] sm:$0xff] %v4393_v55  ;;  %v4414_v55 = vmul.f32 %v1907_v61, %v3825_v19 }
  0x8b   : > { %s4312_s14 = sld [smem:[#allocation2 + $0x30]]  ;;  %s4318_s25 = sld [smem:[#allocation2 + $0x54]]  ;;  %v1919_v14 = vstv %s4270_s30  ;;  %v1925_v54 = vstv %s4272_s22 }
  0x8c   : > { %6769 = sst [smem:[#allocation105_spill]] %s4278_s17  ;;  %s4320_s21 = sld [smem:[#allocation2 + $0x78]]  ;;  %6810 = vst [vmem:[#allocation138_spill] sm:$0xff] %v4414_v55 }
  0x8d   : > { %6770 = sst [smem:[#allocation106_spill]] %s4280_s12  ;;  %s4334_s6 = sld [smem:[#allocation2 + $0x9c]] }
  0x8e   : > { %6775 = sst [smem:[#allocation111_spill]] %s4294_s15  ;;  %s4336_s16 = sld [smem:[#allocation2 + $0xc0]] }
  0x8f   : > { %6776 = sst [smem:[#allocation112_spill]] %s4296_s24  ;;  %s4342_s3 = sld [smem:[#allocation2 + $0xe4]] }
  0x90   : > { %v729_v46 = vstv %s6781_s27  ;;  %s4358_s9 = sld [smem:[#allocation2 + $0x55]]  ;;  %s4360_s27 = sld [smem:[#allocation2 + $0x79]] }
  0x91   : > { %6784 = sst [smem:[#allocation96_spill]] %s4318_s25  ;;  %s4350_s25 = sld [smem:[#allocation2 + $0xd]]  ;;  %v4363_v33 = vmul.f32 %v729_v46, %v3828_v20  ;;  %v4366_v15 = vmul.f32 %v729_v46, %v3825_v19  ;;  %v4387_v46 = vmul.f32 %v741_v42, %v3828_v20  ;;  %v4411_v42 = vmul.f32 %v1907_v61, %v3828_v20 }
  0x92   : > { %6786 = sst [smem:[#allocation117_spill]] %s4320_s21  ;;  %s4344_s21 = sld [smem:[#allocation2 + $0x108]]  ;;  %v4430_v61 = vmul.f32 %v1919_v14, %v3825_v19 }
  0x93   : > { %6794 = sst [smem:[#allocation122_spill]] %s4334_s6  ;;  %s4352_s6 = sld [smem:[#allocation2 + $0x31]]  ;;  %6798 = vst [vmem:[#allocation126_spill] sm:$0xff] %v4363_v33  ;;  %6799 = vst [vmem:[#allocation127_spill] sm:$0xff] %v4366_v15  ;;  %v1913_v33 = vstv %s4264_s28  ;;  %v4427_v15 = vmul.f32 %v1919_v14, %v3828_v20 }
  0x94   : > { %6795 = sst [smem:[#allocation123_spill]] %s4336_s16  ;;  %s4374_s10 = sld [smem:[#allocation2 + $0xe]]  ;;  %6805 = vst [vmem:[#allocation133_spill] sm:$0xff] %v4387_v46  ;;  %6809 = vst [vmem:[#allocation137_spill] sm:$0xff] %v4411_v42  ;;  %v4417_v50 = vmul.f32 %v1913_v33, %v3828_v20  ;;  %v4420_v34 = vmul.f32 %v1913_v33, %v3825_v19  ;;  %v4439_v33 = vmul.f32 %v1925_v54, %v3828_v20 }
  0x95   : > { %6796 = sst [smem:[#allocation124_spill]] %s4342_s3  ;;  %s4376_s19 = sld [smem:[#allocation2 + $0x32]]  ;;  %6815 = vst [vmem:[#allocation143_spill] sm:$0xff] %v4427_v15  ;;  %6816 = vst [vmem:[#allocation144_spill] sm:$0xff] %v4430_v61 }
  0x96   : > { %s4382_s1 = sld [smem:[#allocation2 + $0x56]]  ;;  %s4384_s29 = sld [smem:[#allocation2 + $0x7a]]  ;;  %6811 = vst [vmem:[#allocation139_spill] sm:$0xff] %v4417_v50  ;;  %6812 = vst [vmem:[#allocation140_spill] sm:$0xff] %v4420_v34  ;;  %v4442_v34 = vmul.f32 %v1925_v54, %v3825_v19  ;;  %v813_v15 = vstv %s4358_s9 }
  0x97   : > { %s4396_s11 = sld [smem:[#allocation2 + $0x9d]]  ;;  %s4398_s8 = sld [smem:[#allocation2 + $0xc1]]  ;;  %6820 = vst [vmem:[#allocation145_spill] sm:$0xff] %v4439_v33  ;;  %v801_v61 = vstv %s4350_s25 }
  0x98   : > { %6797 = sst [smem:[#allocation125_spill]] %s4344_s21  ;;  %s4408_s28 = sld [smem:[#allocation2 + $0x109]]  ;;  %6821 = vst [vmem:[#allocation146_spill] sm:$0xff] %v4442_v34  ;;  %v819_v34 = vstv %s4360_s27  ;;  %v4475_v54 = vmul.f32 %v3796_v7, %v801_v61  ;;  %v4478_v14 = vmul.f32 %v3800_v10, %v801_v61  ;;  %v4499_v61 = vmul.f32 %v3796_v7, %v813_v15 }
  0x99   : > { %s4406_s23 = sld [smem:[#allocation2 + $0xe5]]  ;;  %s4422_s22 = sld [smem:[#allocation2 + $0x9e]]  ;;  %v807_v55 = vstv %s4352_s6  ;;  %v4513_v50 = vmul.f32 %v3800_v10, %v819_v34 }
  0x9a   : > { %s4424_s30 = sld [smem:[#allocation2 + $0xc2]]  ;;  %s6817_s5 = sld [smem:[#allocation96_spill]]  ;;  %6824 = vst [vmem:[#allocation147_spill] sm:$0xff] %v4475_v54  ;;  %6825 = vst [vmem:[#allocation148_spill] sm:$0xff] %v4478_v14  ;;  %v4481_v20 = vmul.f32 %v3796_v7, %v807_v55  ;;  %v4484_v19 = vmul.f32 %v3800_v10, %v807_v55  ;;  %v4502_v55 = vmul.f32 %v3800_v10, %v813_v15 }
  0x9b   : > { %6802 = sst [smem:[#allocation130_spill]] %s4376_s19  ;;  %s6818_s2 = sld [smem:[#allocation117_spill]]  ;;  %6829 = vst [vmem:[#allocation151_spill] sm:$0xff] %v4499_v61  ;;  %6834 = vst [vmem:[#allocation156_spill] sm:$0xff] %v4513_v50 }
  0x9c   : > { %6803 = sst [smem:[#allocation131_spill]] %s4382_s1  ;;  %s4434_s13 = sld [smem:[#allocation2 + $0xe6]]  ;;  %6826 = vst [vmem:[#allocation149_spill] sm:$0xff] %v4481_v20  ;;  %6827 = vst [vmem:[#allocation150_spill] sm:$0xff] %v4484_v19  ;;  %v4505_v20 = vmul.f32 %v3796_v7, %v819_v34 }
  0x9d   : > { %6804 = sst [smem:[#allocation132_spill]] %s4384_s29  ;;  %s6819_s7 = sld [smem:[#allocation122_spill]]  ;;  %v1979_v33 = vstv %s4396_s11  ;;  %v1985_v54 = vstv %s4398_s8  ;;  %6830 = vst [vmem:[#allocation152_spill] sm:$0xff] %v4502_v55 }
  0x9e   : > { %s4436_s0 = sld [smem:[#allocation2 + $0x10a]]  ;;  %s4446_s17 = sld [smem:[#allocation2 + $0xf]]  ;;  %6831 = vst [vmem:[#allocation153_spill] sm:$0xff] %v4505_v20  ;;  %v1997_v42 = vstv %s4408_s28  ;;  %v4523_v15 = vmul.f32 %v3796_v7, %v1979_v33  ;;  %v4526_v20 = vmul.f32 %v3800_v10, %v1979_v33  ;;  %v4529_v34 = vmul.f32 %v3796_v7, %v1985_v54 }
  0x9f   : > { %6813 = sst [smem:[#allocation141_spill]] %s4422_s22  ;;  %s4448_s12 = sld [smem:[#allocation2 + $0x33]]  ;;  %v1991_v19 = vstv %s4406_s23  ;;  %v4532_v14 = vmul.f32 %v3800_v10, %v1985_v54  ;;  %v4551_v54 = vmul.f32 %v3796_v7, %v1997_v42 }
  0xa0   : > { %6814 = sst [smem:[#allocation142_spill]] %s4424_s30  ;;  %s4454_s18 = sld [smem:[#allocation2 + $0x57]]  ;;  %6835 = vst [vmem:[#allocation157_spill] sm:$0xff] %v4523_v15  ;;  %6836 = vst [vmem:[#allocation158_spill] sm:$0xff] %v4526_v20  ;;  %v4539_v52 = vmul.f32 %v3796_v7, %v1991_v19  ;;  %v4542_v15 = vmul.f32 %v3800_v10, %v1991_v19 }
  0xa1   : > { %s4456_s4 = sld [smem:[#allocation2 + $0x7b]]  ;;  %s4462_s24 = sld [smem:[#allocation2 + $0x9f]]  ;;  %6837 = vst [vmem:[#allocation159_spill] sm:$0xff] %v4529_v34  ;;  %6838 = vst [vmem:[#allocation160_spill] sm:$0xff] %v4532_v14  ;;  %v4554_v14 = vmul.f32 %v3800_v10, %v1997_v42 }
  0xa2   : > { %s4464_s15 = sld [smem:[#allocation2 + $0xc3]]  ;;  %s4470_s25 = sld [smem:[#allocation2 + $0x10]]  ;;  %6841 = vst [vmem:[#allocation163_spill] sm:$0xff] %v4539_v52  ;;  %6842 = vst [vmem:[#allocation164_spill] sm:$0xff] %v4542_v15 }
  0xa3   : > { %s4472_s6 = sld [smem:[#allocation2 + $0x34]]  ;;  %s4486_s9 = sld [smem:[#allocation2 + $0xe7]]  ;;  %6843 = vst [vmem:[#allocation165_spill] sm:$0xff] %v4551_v54  ;;  %6844 = vst [vmem:[#allocation166_spill] sm:$0xff] %v4554_v14 }
  0xa4   : > { %s4488_s27 = sld [smem:[#allocation2 + $0x10b]]  ;;  %s4494_s21 = sld [smem:[#allocation2 + $0x58]] }
  0xa5   : > { %6822 = sst [smem:[#allocation96_spill]] %s4448_s12  ;;  %s4496_s16 = sld [smem:[#allocation2 + $0x7c]] }
  0xa6   : > { %s4508_s3 = sld [smem:[#allocation2 + $0x11]]  ;;  %s4510_s19 = sld [smem:[#allocation2 + $0x35]] }
  0xa7   : > { %s4518_s11 = sld [smem:[#allocation2 + $0xa0]]  ;;  %s4520_s8 = sld [smem:[#allocation2 + $0xc4]] }
  0xa8   : > { %6823 = sst [smem:[#allocation117_spill]] %s4464_s15  ;;  %s4536_s28 = sld [smem:[#allocation2 + $0x7d]]  ;;  %v873_v15 = vstv %s4470_s25 }
  0xa9   : > { %s4534_s23 = sld [smem:[#allocation2 + $0x59]]  ;;  %s4546_s29 = sld [smem:[#allocation2 + $0xe8]]  ;;  %v879_v52 = vstv %s4472_s6  ;;  %v4579_v20 = vmul.f32 %v873_v15, %v3846_v28  ;;  %v4582_v7 = vmul.f32 %v873_v15, %v3849_v29 }
  0xaa   : > { %6828 = sst [smem:[#allocation122_spill]] %s4488_s27  ;;  %s4548_s1 = sld [smem:[#allocation2 + $0x10c]]  ;;  %v885_v33 = vstv %s4494_s21  ;;  %v4585_v10 = vmul.f32 %v879_v52, %v3846_v28  ;;  %v4588_v19 = vmul.f32 %v879_v52, %v3849_v29 }
  0xab   : > { %s4562_s30 = sld [smem:[#allocation2 + $0xa1]]  ;;  %s4564_s22 = sld [smem:[#allocation2 + $0xc5]]  ;;  %v891_v34 = vstv %s4496_s16  ;;  %6849 = vst [vmem:[#allocation171_spill] sm:$0xff] %v4579_v20  ;;  %6850 = vst [vmem:[#allocation172_spill] sm:$0xff] %v4582_v7  ;;  %v4601_v15 = vmul.f32 %v885_v33, %v3846_v28 }
  0xac   : > { %6832 = sst [smem:[#allocation154_spill]] %s4508_s3  ;;  %s4574_s12 = sld [smem:[#allocation2 + $0xe9]]  ;;  %6851 = vst [vmem:[#allocation173_spill] sm:$0xff] %v4585_v10  ;;  %6852 = vst [vmem:[#allocation174_spill] sm:$0xff] %v4588_v19  ;;  %v4604_v10 = vmul.f32 %v885_v33, %v3849_v29  ;;  %v4607_v52 = vmul.f32 %v891_v34, %v3846_v28  ;;  %v4610_v19 = vmul.f32 %v891_v34, %v3849_v29 }
  0xad   : > { %6833 = sst [smem:[#allocation155_spill]] %s4510_s19  ;;  %s4576_s25 = sld [smem:[#allocation2 + $0x10d]]  ;;  %v2051_v61 = vstv %s4518_s11  ;;  %v2057_v20 = vstv %s4520_s8  ;;  %6855 = vst [vmem:[#allocation177_spill] sm:$0xff] %v4601_v15 }
  0xae   : > { %6840 = sst [smem:[#allocation162_spill]] %s4536_s28  ;;  %s4590_s21 = sld [smem:[#allocation2 + $0x12]]  ;;  %6856 = vst [vmem:[#allocation178_spill] sm:$0xff] %v4604_v10  ;;  %6857 = vst [vmem:[#allocation179_spill] sm:$0xff] %v4607_v52  ;;  %v4617_v55 = vmul.f32 %v2051_v61, %v3846_v28  ;;  %v4620_v33 = vmul.f32 %v2051_v61, %v3849_v29  ;;  %v4623_v15 = vmul.f32 %v2057_v20, %v3846_v28 }
  0xaf   : > { %6839 = sst [smem:[#allocation161_spill]] %s4534_s23  ;;  %s4592_s16 = sld [smem:[#allocation2 + $0x36]]  ;;  %6858 = vst [vmem:[#allocation180_spill] sm:$0xff] %v4610_v19  ;;  %v2063_v7 = vstv %s4546_s29  ;;  %v4626_v34 = vmul.f32 %v2057_v20, %v3849_v29 }
  0xb0   : > { %s4598_s6 = sld [smem:[#allocation2 + $0x5a]]  ;;  %v2069_v14 = vstv %s4548_s1  ;;  %v3498_v50 = vpop.permute.xlu1 %3497  ;;  %6859 = vst [vmem:[#allocation181_spill] sm:$0xff] %v4617_v55  ;;  %6860 = vst [vmem:[#allocation182_spill] sm:$0xff] %v4620_v33  ;;  %s6863_s1 = sld [smem:[#allocation45_spill]]  ;;  %v4631_v55 = vmul.f32 %v2063_v7, %v3846_v28  ;;  %v4634_v61 = vmul.f32 %v2063_v7, %v3849_v29 }
  0xb1   : > { %6845 = sst [smem:[#allocation167_spill]] %s4562_s30  ;;  %6861 = vst [vmem:[#allocation183_spill] sm:$0xff] %v4623_v15  ;;  %6862 = vst [vmem:[#allocation184_spill] sm:$0xff] %v4626_v34  ;;  %v3500_v42 = vunpack.i.h.bf16 %v3498_v50  ;;  %v3499_v54 = vunpack.i.l.bf16 %v3498_v50  ;;  %s6864_s29 = sld [smem:[#allocation46_spill]]  ;;  %v4637_v15 = vmul.f32 %v2069_v14, %v3846_v28  ;;  %v4640_v20 = vmul.f32 %v2069_v14, %v3849_v29 }
  0xb2   : > { %6846 = sst [smem:[#allocation168_spill]] %s4564_s22  ;;  %s6865_s11 = sld [smem:[#allocation47_spill]]  ;;  %6866 = vst [vmem:[#allocation185_spill] sm:$0xff] %v4631_v55  ;;  %6867 = vst [vmem:[#allocation186_spill] sm:$0xff] %v4634_v61 }
  0xb3   : > { %6847 = sst [smem:[#allocation169_spill]] %s4574_s12  ;;  %6868 = vst [vmem:[#allocation187_spill] sm:$0xff] %v4637_v15  ;;  %6869 = vst [vmem:[#allocation188_spill] sm:$0xff] %v4640_v20  ;;  %v3488_v34 = vpop.permute.xlu0 %3487  ;;  %s6870_s8 = sld [smem:[#allocation48_spill]]  ;;  %v208_v50 = vsel %vm189_vm2, 0.0, %v3500_v42  ;;  %v4647_v28 = vsel %vm189_vm2, 0.0, %v3499_v54 }
  0xb4   : > { %6848 = sst [smem:[#allocation170_spill]] %s4576_s25  ;;  %s6871_s30 = sld [smem:[#allocation49_spill]]  ;;  %v3490_v33 = vunpack.i.h.bf16 %v3488_v34  ;;  %v3489_v7 = vunpack.i.l.bf16 %v3488_v34 }
  0xb5   : > { %6853 = sst [smem:[#allocation175_spill]] %s4590_s21  ;;  %s6872_s22 = sld [smem:[#allocation27_spill]] }
  0xb6   : > { %6854 = sst [smem:[#allocation176_spill]] %s4592_s16  ;;  %s6873_s28 = sld [smem:[#allocation28_spill]]  ;;  %v6878_v14 = vstv %s6863_s1  ;;  %v191_v54 = vsel %vm189_vm2, 0.0, %v3490_v33  ;;  %v190_v29 = vsel %vm189_vm2, 0.0, %v3489_v7 }
  0xb7   : > { %s6874_s23 = sld [smem:[#allocation29_spill]]  ;;  %s6875_s19 = sld [smem:[#allocation30_spill]]  ;;  %v4652_v20 = vmul.f32 %v6878_v14, %v208_v50  ;;  %v6880_v42 = vstv %s6864_s29 }
  0xb8   : > { %s6876_s3 = sld [smem:[#allocation35_spill]]  ;;  %s6877_s27 = sld [smem:[#allocation50_spill]]  ;;  %v4656_v19 = vmul.f32 %v6880_v42, %v208_v50  ;;  %v6882_v52 = vstv %s6865_s11 }
  0xb9   : > { %s6879_s15 = sld [smem:[#allocation51_spill]]  ;;  %s6881_s12 = sld [smem:[#allocation52_spill]]  ;;  %v4660_v55 = vmul.f32 %v6882_v52, %v208_v50  ;;  %v6885_v14 = vstv %s6870_s8 }
  0xba   : > { %s6883_s21 = sld [smem:[#allocation36_spill]]  ;;  %s6884_s16 = sld [smem:[#allocation33_spill]]  ;;  %v4667_v15 = vmul.f32 %v6885_v14, %v208_v50  ;;  %v6887_v42 = vstv %s6871_s30 }
  0xbb   : > { %s6886_s25 = sld [smem:[#allocation34_spill]]  ;;  %v4671_v61 = vmul.f32 %v6887_v42, %v208_v50  ;;  %v6889_v52 = vstv %s6872_s22 }
  0xbc   : > { %v491_v10 = vmul.f32 %v6889_v52, %v191_v54  ;;  %v6890_v17 = vstv %s6873_s28 }
  0xbd   : > { %6888 = vst [vmem:[#allocation189_spill] sm:$0xff] %v4671_v61  ;;  %v497_v34 = vmul.f32 %v6890_v17, %v191_v54  ;;  %v6891_v46 = vstv %s6874_s23  ;;  %v6892_v33 = vstv %s6875_s19  ;;  %v6904_v47 = vstv %s6875_s19  ;;  %s6910_s19 = sld [smem:[#allocation38_spill]] }
  0xbe   : > { %v503_v57 = vmul.f32 %v6891_v46, %v191_v54  ;;  %v509_v23 = vmul.f32 %v6892_v33, %v191_v54  ;;  %v6893_v53 = vstv %s6876_s3  ;;  %v6894_v26 = vstv %s6877_s27 }
  0xbf   : > { %v1681_v7 = vmul.f32 %v6893_v53, %v191_v54  ;;  %v4685_v37 = vmul.f32 %v6894_v26, %v208_v50  ;;  %v6896_v14 = vstv %s6879_s15  ;;  %v6897_v42 = vstv %s6881_s12 }
  0xc0   : > { %v4689_v16 = vmul.f32 %v6896_v14, %v208_v50  ;;  %v4693_v58 = vmul.f32 %v6897_v42, %v208_v50  ;;  %v6898_v52 = vstv %s6883_s21  ;;  %v6899_v46 = vstv %s6872_s22  ;;  %s6911_s22 = sld [smem:[#allocation39_spill]] }
  0xc1   : > { %6895 = vst [vmem:[#allocation190_spill] sm:$0xff] %v4685_v37  ;;  %v1687_v17 = vmul.f32 %v6898_v52, %v191_v54  ;;  %v490_v40 = vmul.f32 %v6899_v46, %v190_v29  ;;  %v6900_v33 = vstv %s6873_s28  ;;  %v6901_v53 = vstv %s6874_s23  ;;  %s6912_s23 = sld [smem:[#allocation40_spill]]  ;;  %s6913_s28 = sld [smem:[#allocation41_spill]] }
  0xc2   : > { %v496_v45 = vmul.f32 %v6900_v33, %v190_v29  ;;  %v502_v43 = vmul.f32 %v6901_v53, %v190_v29  ;;  %v6902_v59 = vstv %s6884_s16  ;;  %v6903_v48 = vstv %s6886_s25  ;;  %s6914_s25 = sld [smem:[#allocation42_spill]]  ;;  %s6918_s16 = sld [smem:[#allocation44_spill]] }
  0xc3   : > { %v1669_v26 = vmul.f32 %v6902_v59, %v191_v54  ;;  %v1675_v2 = vmul.f32 %v6903_v48, %v191_v54  ;;  %v508_v14 = vmul.f32 %v6904_v47, %v190_v29  ;;  %v517_v51 = vadd.f32 %v4046_v21, %v491_v10  ;;  %v3493_v47 = vpop.permute.xlu0 %3492 }
  0xc4   : > { %v516_v50 = vadd.f32 %v4019_v0, %v490_v40  ;;  %v523_v42 = vadd.f32 %v4060_v27, %v497_v34  ;;  %v529_v52 = vadd.f32 %v4073_v32, %v503_v57  ;;  %v535_v46 = vadd.f32 %v4076_v35, %v509_v23 }
  0xc5   : > { %v6905_v5 = vmov %v6902_v59  ;;  %v6906_v13 = vmov %v6903_v48  ;;  %v6907_v4 = vstv %s6876_s3  ;;  %v6908_v63 = vstv %s6883_s21  ;;  %s6909_s3 = sld [smem:[#allocation37_spill]]  ;;  %s6916_s21 = sld [smem:[#allocation43_spill]] }
  0xc6   : > { %v1668_v33 = vmul.f32 %v6905_v5, %v190_v29  ;;  %v1674_v53 = vmul.f32 %v6906_v13, %v190_v29  ;;  %v1680_v59 = vmul.f32 %v6907_v4, %v190_v29  ;;  %v1686_v48 = vmul.f32 %v6908_v63, %v190_v29 }
  0xc7   : > { %v522_v40 = vadd.f32 %v4022_v1, %v496_v45  ;;  %v528_v0 = vadd.f32 %v4031_v6, %v502_v43  ;;  %v1707_v21 = vadd.f32 %v4089_v38, %v1681_v7  ;;  %v1713_v23 = vadd.f32 %v4092_v39, %v1687_v17 }
  0xc8   : > { %v534_v27 = vadd.f32 %v4034_v8, %v508_v14  ;;  %v1695_v32 = vadd.f32 %v4083_v36, %v1669_v26  ;;  %v1706_v63 = vadd.f32 %v4067_v30, %v1680_v59  ;;  %v1712_v35 = vadd.f32 %v4070_v31, %v1686_v48 }
  0xc9   : > { %v1694_v43 = vadd.f32 %v4054_v24, %v1668_v33  ;;  %v1701_v1 = vadd.f32 %v4086_v12, %v1675_v2  ;;  %v3495_v6 = vunpack.i.h.bf16 %v3493_v47  ;;  %v3494_v38 = vunpack.i.l.bf16 %v3493_v47 }
  0xca   : > { %v1700_v8 = vadd.f32 %v4057_v25, %v1674_v53  ;;  %v6915_v36 = vstv %s6863_s1  ;;  %v6917_v39 = vstv %s6864_s29  ;;  %v6919_v24 = vstv %s6865_s11  ;;  %s6943_s1 = sld [smem:[#allocation58_spill]]  ;;  %s6944_s29 = sld [smem:[#allocation59_spill]] }
  0xcb   : > { %v562_v30 = vmul.f32 %v6915_v36, %v4647_v28  ;;  %v568_v31 = vmul.f32 %v6917_v39, %v4647_v28  ;;  %v574_v13 = vmul.f32 %v6919_v24, %v4647_v28  ;;  %v200_v12 = vsel %vm198_vm3, %v3495_v6, 0.0  ;;  %s6946_s11 = sld [smem:[#allocation60_spill]] }
  0xcc   : > { %v199_v4 = vsel %vm198_vm3, %v3494_v38, 0.0  ;;  %v6920_v5 = vstv %s6870_s8  ;;  %v6921_v45 = vstv %s6871_s30  ;;  %v6922_v57 = vstv %s6909_s3  ;;  %s6941_s30 = sld [smem:[#allocation56_spill]]  ;;  %s6948_s8 = sld [smem:[#allocation61_spill]] }
  0xcd   : > { %v580_v25 = vmul.f32 %v6920_v5, %v4647_v28  ;;  %v1740_v2 = vmul.f32 %v6921_v45, %v4647_v28  ;;  %v539_v10 = vmul.f32 %v6922_v57, %v200_v12  ;;  %v6923_v29 = vstv %s6910_s19  ;;  %s6950_s3 = sld [smem:[#allocation62_spill]]  ;;  %s6978_s19 = sld [smem:[#allocation63_spill]] }
  0xce   : > { %v545_v34 = vmul.f32 %v6923_v29, %v200_v12  ;;  %v6924_v54 = vstv %s6911_s22  ;;  %v6925_v17 = vstv %s6912_s23  ;;  %v6926_v14 = vstv %s6913_s28 }
  0xcf   : > { %v551_v7 = vmul.f32 %v6924_v54, %v200_v12  ;;  %v557_v26 = vmul.f32 %v6925_v17, %v200_v12  ;;  %v1717_v33 = vmul.f32 %v6926_v14, %v200_v12  ;;  %v6927_v53 = vstv %s6914_s25 }
  0xd0   : > { %v1723_v59 = vmul.f32 %v6927_v53, %v200_v12  ;;  %v6928_v48 = vstv %s6877_s27  ;;  %v6929_v6 = vstv %s6879_s15  ;;  %v6930_v36 = vstv %s6916_s21  ;;  %s4792_s15 = sld [smem:[#allocation2 + $0x7e]]  ;;  %s6942_s27 = sld [smem:[#allocation57_spill]] }
  0xd1   : > { %v1746_v47 = vmul.f32 %v6928_v48, %v4647_v28  ;;  %v1752_v38 = vmul.f32 %v6929_v6, %v4647_v28  ;;  %v1729_v39 = vmul.f32 %v6930_v36, %v200_v12  ;;  %v6931_v24 = vstv %s6918_s16 }
  0xd2   : > { %v1735_v5 = vmul.f32 %v6931_v24, %v200_v12  ;;  %v6932_v45 = vmov %v6922_v57  ;;  %v544_v54 = vmul.f32 %v6923_v29, %v199_v4  ;;  %v541_v17 = vadd.f32 %v539_v10, %v517_v51 }
  0xd3   : > { %v538_v57 = vmul.f32 %v6932_v45, %v199_v4  ;;  %v547_v14 = vadd.f32 %v545_v34, %v523_v42  ;;  %v6933_v53 = vstv %s6911_s22  ;;  %v6934_v18 = vstv %s6912_s23  ;;  %s6979_s22 = sld [smem:[#allocation64_spill]]  ;;  %s6980_s23 = sld [smem:[#allocation65_spill]] }
  0xd4   : > { %v550_v56 = vmul.f32 %v6933_v53, %v199_v4  ;;  %v556_v48 = vmul.f32 %v6934_v18, %v199_v4  ;;  %v553_v6 = vadd.f32 %v551_v7, %v529_v52  ;;  %v559_v37 = vadd.f32 %v557_v26, %v535_v46 }
  0xd5   : > { %v540_v3 = vadd.f32 %v538_v57, %v516_v50  ;;  %v6935_v41 = vstv %s6913_s28  ;;  %v546_v9 = vadd.f32 %v544_v54, %v522_v40  ;;  %v6936_v61 = vstv %s6914_s25  ;;  %s6981_s28 = sld [smem:[#allocation66_spill]]  ;;  %s6982_s25 = sld [smem:[#allocation67_spill]] }
  0xd6   : > { %v1716_v36 = vmul.f32 %v6935_v41, %v199_v4  ;;  %v552_v12 = vadd.f32 %v550_v56, %v528_v0  ;;  %v558_v24 = vadd.f32 %v556_v48, %v534_v27  ;;  %v1722_v45 = vmul.f32 %v6936_v61, %v199_v4  ;;  %v3503_v27 = vpop.permute.xlu1 %3502 }
  0xd7   : > { %v6937_v29 = vstv %s6916_s21  ;;  %v1731_v51 = vadd.f32 %v1729_v39, %v1707_v21  ;;  %v6938_v42 = vstv %s6918_s16  ;;  %v1719_v34 = vadd.f32 %v1717_v33, %v1695_v32  ;;  %v6956_v39 = vld [vmem:[#allocation190_spill] sm:$0xff]  ;;  %s6983_s21 = sld [smem:[#allocation69_spill]]  ;;  %s6984_s16 = sld [smem:[#allocation68_spill]] }
  0xd8   : > { %v1718_v44 = vadd.f32 %v1716_v36, %v1694_v43  ;;  %v1728_v60 = vmul.f32 %v6937_v29, %v199_v4  ;;  %v1734_v10 = vmul.f32 %v6938_v42, %v199_v4  ;;  %v1725_v53 = vadd.f32 %v1723_v59, %v1701_v1 }
  0xd9   : > { %v1737_v18 = vadd.f32 %v1735_v5, %v1713_v23  ;;  %v6939_v50 = vstv %s6881_s12  ;;  %v564_v41 = vadd.f32 %v562_v30, %v540_v3  ;;  %v565_v56 = vadd.f32 %v4652_v20, %v541_v17  ;;  %s6940_s12 = sld [smem:[#allocation55_spill]] }
  0xda   : > { %v1758_v52 = vmul.f32 %v6939_v50, %v4647_v28  ;;  %v1730_v46 = vadd.f32 %v1728_v60, %v1706_v63  ;;  %v1736_v7 = vadd.f32 %v1734_v10, %v1712_v35  ;;  %v570_v61 = vadd.f32 %v568_v31, %v546_v9  ;;  %v6947_v35 = vld [vmem:[#allocation78_spill] sm:$0xff]  ;;  %v6951_v31 = vld [vmem:[#allocation90_spill] sm:$0xff] }
  0xdb   : > { %v571_v40 = vadd.f32 %v4656_v19, %v547_v14  ;;  %v576_v0 = vadd.f32 %v574_v13, %v552_v12  ;;  %v577_v21 = vadd.f32 %v4660_v55, %v553_v6  ;;  %v1724_v32 = vadd.f32 %v1722_v45, %v1700_v8  ;;  %v6952_v13 = vld [vmem:[#allocation79_spill] sm:$0xff] }
  0xdc   : > { %v582_v43 = vadd.f32 %v580_v25, %v558_v24  ;;  %v583_v23 = vadd.f32 %v4667_v15, %v559_v37  ;;  %v1742_v1 = vadd.f32 %v1740_v2, %v1718_v44  ;;  %v1754_v28 = vadd.f32 %v1752_v38, %v1730_v46  ;;  %v6945_v15 = vld [vmem:[#allocation89_spill] sm:$0xff]  ;;  %v6965_v46 = vld [vmem:[#allocation92_spill] sm:$0xff] }
  0xdd   : > { %v1755_v60 = vadd.f32 %v4689_v16, %v1731_v51  ;;  %v1760_v3 = vadd.f32 %v1758_v52, %v1736_v7  ;;  %v1761_v9 = vadd.f32 %v4693_v58, %v1737_v18  ;;  %v3505_v20 = vunpack.i.h.bf16 %v3503_v27  ;;  %v6949_v58 = vld [vmem:[#allocation189_spill] sm:$0xff] }
  0xde   : > { %v3504_v19 = vunpack.i.l.bf16 %v3503_v27  ;;  %v588_v63 = vadd.f32 %v4177_v62, %v564_v41  ;;  %v589_v55 = vadd.f32 %v4139_v49, %v565_v56  ;;  %v594_v37 = vadd.f32 %v4180_v22, %v570_v61  ;;  %v6966_v41 = vld [vmem:[#allocation83_spill] sm:$0xff] }
  0xdf   : > { %v595_v44 = vadd.f32 %v4142_v11, %v571_v40  ;;  %v600_v16 = vadd.f32 %v6945_v15, %v576_v0  ;;  %v601_v8 = vadd.f32 %v6947_v35, %v577_v21  ;;  %v1743_v30 = vadd.f32 %v6949_v58, %v1719_v34  ;;  %v6968_v21 = vld [vmem:[#allocation93_spill] sm:$0xff]  ;;  %v3508_v58 = vpop.permute.xlu0 %3507 }
  0xe0   : > { %v216_v62 = vsel %vm198_vm3, %v3505_v20, 0.0  ;;  %v606_v49 = vadd.f32 %v6951_v31, %v582_v43  ;;  %v607_v22 = vadd.f32 %v6952_v13, %v583_v23  ;;  %v6953_v4 = vstv %s6940_s12  ;;  %v6970_v23 = vld [vmem:[#allocation94_spill] sm:$0xff]  ;;  %v6973_v35 = vld [vmem:[#allocation88_spill] sm:$0xff]  ;;  %s6985_s12 = sld [smem:[#allocation70_spill]] }
  0xe1   : > { %v611_v25 = vmul.f32 %v6953_v4, %v216_v62  ;;  %v6954_v11 = vstv %s6941_s30  ;;  %v6955_v26 = vstv %s6942_s27  ;;  %v215_v59 = vsel %vm198_vm3, %v3504_v19, 0.0  ;;  %v6971_v19 = vld [vmem:[#allocation87_spill] sm:$0xff]  ;;  %s6999_s30 = sld [smem:[#allocation54_spill]]  ;;  %s7001_s27 = sld [smem:[#allocation73_spill]] }
  0xe2   : > { %v617_v2 = vmul.f32 %v6954_v11, %v216_v62  ;;  %v623_v33 = vmul.f32 %v6955_v26, %v216_v62  ;;  %v1748_v38 = vadd.f32 %v1746_v47, %v1724_v32  ;;  %v1749_v5 = vadd.f32 %v6956_v39, %v1725_v53  ;;  %v6969_v32 = vld [vmem:[#allocation84_spill] sm:$0xff] }
  0xe3   : > { %v6957_v57 = vstv %s6943_s1  ;;  %v939_v17 = vstv %s4792_s15  ;;  %v6958_v14 = vstv %s6944_s29  ;;  %v6959_v6 = vstv %s6946_s11  ;;  %s7003_s1 = sld [smem:[#allocation74_spill]]  ;;  %s7004_s29 = sld [smem:[#allocation75_spill]] }
  0xe4   : > { %v629_v54 = vmul.f32 %v6957_v57, %v216_v62  ;;  %v1789_v48 = vmul.f32 %v6958_v14, %v216_v62  ;;  %v1795_v36 = vmul.f32 %v6959_v6, %v216_v62  ;;  %v6960_v12 = vstv %s6948_s8  ;;  %s7006_s11 = sld [smem:[#allocation76_spill]]  ;;  %s7008_s8 = sld [smem:[#allocation77_spill]] }
  0xe5   : > { %v1801_v24 = vmul.f32 %v6960_v12, %v216_v62  ;;  %v6961_v45 = vstv %s6950_s3  ;;  %v6962_v51 = vmov %v6953_v4  ;;  %v613_v10 = vadd.f32 %v611_v25, %v589_v55  ;;  %s7010_s3 = sld [smem:[#allocation80_spill]]  ;;  %s5294_s15 = sld [smem:[#allocation2 + $0xc8]] }
  0xe6   : > { %v1807_v29 = vmul.f32 %v6961_v45, %v216_v62  ;;  %v610_v42 = vmul.f32 %v6962_v51, %v215_v59  ;;  %v6963_v34 = vmov %v6954_v11  ;;  %v619_v47 = vadd.f32 %v617_v2, %v595_v44  ;;  %v6972_v44 = vld [vmem:[#allocation95_spill] sm:$0xff] }
  0xe7   : > { %v616_v18 = vmul.f32 %v6963_v34, %v215_v59  ;;  %v6964_v50 = vmov %v6955_v26  ;;  %v625_v52 = vadd.f32 %v623_v33, %v601_v8  ;;  %v1766_v7 = vadd.f32 %v6965_v46, %v1742_v1 }
  0xe8   : > { %v622_v53 = vmul.f32 %v6964_v50, %v215_v59  ;;  %v1767_v56 = vadd.f32 %v6966_v41, %v1743_v30  ;;  %v6967_v61 = vmov %v6957_v57  ;;  %v631_v0 = vadd.f32 %v629_v54, %v607_v22  ;;  %v4852_v57 = vpop.permute.xlu0 %3517 }
  0xe9   : > { %v628_v40 = vmul.f32 %v6967_v61, %v215_v59  ;;  %v1772_v27 = vadd.f32 %v6968_v21, %v1748_v38  ;;  %v1773_v43 = vadd.f32 %v6969_v32, %v1749_v5  ;;  %v1778_v20 = vadd.f32 %v6970_v23, %v1754_v28 }
  0xea   : > { %v1779_v55 = vadd.f32 %v6971_v19, %v1755_v60  ;;  %v1784_v15 = vadd.f32 %v6972_v44, %v1760_v3  ;;  %v1785_v8 = vadd.f32 %v6973_v35, %v1761_v9  ;;  %v612_v1 = vadd.f32 %v610_v42, %v588_v63  ;;  %v3513_v63 = vpop.permute.xlu1 %3512 }
  0xeb   : > { %v618_v62 = vadd.f32 %v616_v18, %v594_v37  ;;  %v6974_v30 = vmov %v6958_v14  ;;  %v6975_v13 = vmov %v6959_v6  ;;  %v6976_v22 = vmov %v6960_v12 }
  0xec   : > { %v1788_v31 = vmul.f32 %v6974_v30, %v215_v59  ;;  %v1794_v4 = vmul.f32 %v6975_v13, %v215_v59  ;;  %v1800_v25 = vmul.f32 %v6976_v22, %v215_v59  ;;  %v1803_v11 = vadd.f32 %v1801_v24, %v1779_v55 }
  0xed   : > { %v6977_v2 = vmov %v6961_v45  ;;  %v1809_v28 = vadd.f32 %v1807_v29, %v1785_v8  ;;  %v624_v60 = vadd.f32 %v622_v53, %v600_v16  ;;  %v630_v3 = vadd.f32 %v628_v40, %v606_v49 }
  0xee   : > { %v1806_v26 = vmul.f32 %v6977_v2, %v215_v59  ;;  %v3510_v33 = vunpack.i.h.bf16 %v3508_v58  ;;  %v3509_v9 = vunpack.i.l.bf16 %v3508_v58  ;;  %v1791_v37 = vadd.f32 %v1789_v48, %v1767_v56 }
  0xef   : > { %v1797_v38 = vadd.f32 %v1795_v36, %v1773_v43  ;;  %v1802_v39 = vadd.f32 %v1800_v25, %v1778_v20  ;;  %v1790_v59 = vadd.f32 %v1788_v31, %v1766_v7  ;;  %v1796_v54 = vadd.f32 %v1794_v4, %v1772_v27 }
  0xf0   : > { %v1808_v5 = vadd.f32 %v1806_v26, %v1784_v15  ;;  %v232_v16 = vsel %vm189_vm2, 0.0, %v3510_v33  ;;  %v231_v49 = vsel %vm189_vm2, 0.0, %v3509_v9  ;;  %v6986_v14 = vstv %s6978_s19  ;;  %s7011_s19 = sld [smem:[#allocation81_spill]] }
  0xf1   : > { %v635_v48 = vmul.f32 %v6986_v14, %v232_v16  ;;  %v6987_v6 = vstv %s6979_s22  ;;  %v6988_v12 = vstv %s6980_s23  ;;  %v3515_v45 = vunpack.i.h.bf16 %v3513_v63  ;;  %s7038_s22 = sld [smem:[#allocation82_spill]]  ;;  %s7040_s23 = sld [smem:[#allocation85_spill]] }
  0xf2   : > { %v641_v36 = vmul.f32 %v6987_v6, %v232_v16  ;;  %v647_v24 = vmul.f32 %v6988_v12, %v232_v16  ;;  %v6989_v29 = vstv %s6981_s28  ;;  %v3514_v42 = vunpack.i.l.bf16 %v3513_v63  ;;  %s7043_s28 = sld [smem:[#allocation86_spill]] }
  0xf3   : > { %v653_v51 = vmul.f32 %v6989_v29, %v232_v16  ;;  %v3520_v34 = vunpack.i.h.bf16 %v4852_v57  ;;  %v3519_v18 = vunpack.i.l.bf16 %v4852_v57  ;;  %v6990_v50 = vstv %s6982_s25  ;;  %s7045_s25 = sld [smem:[#allocation71_spill]] }
  0xf4   : > { %v1813_v53 = vmul.f32 %v6990_v50, %v232_v16  ;;  %v6991_v46 = vstv %s6983_s21  ;;  %v6992_v41 = vmov %v6986_v14  ;;  %v6993_v61 = vmov %v6987_v6  ;;  %s7046_s21 = sld [smem:[#allocation53_spill]] }
  0xf5   : > { %v1825_v7 = vmul.f32 %v6991_v46, %v232_v16  ;;  %v634_v56 = vmul.f32 %v6992_v41, %v231_v49  ;;  %v640_v40 = vmul.f32 %v6993_v61, %v231_v49  ;;  %v6994_v21 = vstv %s6984_s16  ;;  %v7021_v41 = vld [vmem:[#allocation110_spill] sm:$0xff]  ;;  %s7047_s16 = sld [smem:[#allocation72_spill]] }
  0xf6   : > { %v1819_v27 = vmul.f32 %v6994_v21, %v232_v16  ;;  %v6995_v32 = vstv %s6985_s12  ;;  %v6996_v23 = vmov %v6988_v12  ;;  %v6997_v19 = vmov %v6989_v29  ;;  %v7014_v12 = vld [vmem:[#allocation107_spill] sm:$0xff]  ;;  %v7022_v61 = vld [vmem:[#allocation104_spill] sm:$0xff]  ;;  %s7048_s12 = sld [smem:[#allocation91_spill]] }
  0xf7   : > { %v1831_v43 = vmul.f32 %v6995_v32, %v232_v16  ;;  %v646_v20 = vmul.f32 %v6996_v23, %v231_v49  ;;  %v652_v55 = vmul.f32 %v6997_v19, %v231_v49  ;;  %v637_v44 = vadd.f32 %v635_v48, %v613_v10 }
  0xf8   : > { %v643_v15 = vadd.f32 %v641_v36, %v619_v47  ;;  %v649_v35 = vadd.f32 %v647_v24, %v625_v52  ;;  %v6998_v8 = vmov %v6990_v50  ;;  %v636_v30 = vadd.f32 %v634_v56, %v612_v1 }
  0xf9   : > { %v1812_v58 = vmul.f32 %v6998_v8, %v231_v49  ;;  %v642_v31 = vadd.f32 %v640_v40, %v618_v62  ;;  %v655_v13 = vadd.f32 %v653_v51, %v631_v0  ;;  %v7000_v4 = vmov %v6994_v21  ;;  %v7018_v51 = vld [vmem:[#allocation109_spill] sm:$0xff] }
  0xfa   : > { %v1818_v22 = vmul.f32 %v7000_v4, %v231_v49  ;;  %v1815_v25 = vadd.f32 %v1813_v53, %v1791_v37  ;;  %v7002_v2 = vmov %v6991_v46  ;;  %v1827_v33 = vadd.f32 %v1825_v7, %v1803_v11  ;;  %v7019_v53 = vld [vmem:[#allocation103_spill] sm:$0xff] }
  0xfb   : > { %v1824_v26 = vmul.f32 %v7002_v2, %v231_v49  ;;  %v7005_v9 = vmov %v6995_v32  ;;  %v648_v10 = vadd.f32 %v646_v20, %v624_v60  ;;  %v654_v47 = vadd.f32 %v652_v55, %v630_v3  ;;  %v7030_v2 = vld [vmem:[#allocation113_spill] sm:$0xff] }
  0xfc   : > { %v1830_v63 = vmul.f32 %v7005_v9, %v231_v49  ;;  %v1833_v52 = vadd.f32 %v1831_v43, %v1809_v28  ;;  %v240_v16 = vsel %vm198_vm3, %v3515_v45, 0.0  ;;  %v1814_v1 = vadd.f32 %v1812_v58, %v1790_v59  ;;  %v7017_v45 = vld [vmem:[#allocation102_spill] sm:$0xff] }
  0xfd   : > { %v1821_v62 = vadd.f32 %v1819_v27, %v1797_v38  ;;  %v1826_v0 = vadd.f32 %v1824_v26, %v1802_v39  ;;  %v1820_v48 = vadd.f32 %v1818_v22, %v1796_v54  ;;  %v7007_v37 = vstv %s6999_s30  ;;  %v7015_v39 = vld [vmem:[#allocation101_spill] sm:$0xff]  ;;  %v7016_v54 = vld [vmem:[#allocation108_spill] sm:$0xff]  ;;  %s7066_s30 = sld [smem:[#allocation98_spill]] }
  0xfe   : > { %v1832_v14 = vadd.f32 %v1830_v63, %v1808_v5  ;;  %v683_v6 = vmul.f32 %v7007_v37, %v240_v16  ;;  %v7009_v36 = vstv %s7001_s27  ;;  %v239_v60 = vsel %vm198_vm3, %v3514_v42, 0.0  ;;  %v7031_v9 = vld [vmem:[#allocation119_spill] sm:$0xff]  ;;  %s7067_s27 = sld [smem:[#allocation99_spill]] }
  0xff   : > { %v689_v11 = vmul.f32 %v7009_v36, %v240_v16  ;;  %v7012_v3 = vstv %s7003_s1  ;;  %v7013_v49 = vstv %s7004_s29  ;;  %v660_v38 = vadd.f32 %v7014_v12, %v636_v30  ;;  %s7068_s1 = sld [smem:[#allocation100_spill]]  ;;  %s7071_s29 = sld [smem:[#allocation105_spill]] }
 0x100   : > { %v695_v28 = vmul.f32 %v7012_v3, %v240_v16  ;;  %v701_v59 = vmul.f32 %v7013_v49, %v240_v16  ;;  %v661_v5 = vadd.f32 %v7015_v39, %v637_v44  ;;  %v666_v24 = vadd.f32 %v7016_v54, %v642_v31  ;;  %v7029_v31 = vld [vmem:[#allocation118_spill] sm:$0xff]  ;;  %v7036_v39 = vld [vmem:[#allocation121_spill] sm:$0xff] }
 0x101   : > { %v667_v29 = vadd.f32 %v7017_v45, %v643_v15  ;;  %v672_v50 = vadd.f32 %v7018_v51, %v648_v10  ;;  %v673_v46 = vadd.f32 %v7019_v53, %v649_v35  ;;  %v7020_v7 = vstv %s7006_s11  ;;  %s7073_s11 = sld [smem:[#allocation106_spill]] }
 0x102   : > { %v1861_v42 = vmul.f32 %v7020_v7, %v240_v16  ;;  %v678_v56 = vadd.f32 %v7021_v41, %v654_v47  ;;  %v679_v40 = vadd.f32 %v7022_v61, %v655_v13  ;;  %v7023_v21 = vmov %v7007_v37 }
 0x103   : > { %v682_v27 = vmul.f32 %v7023_v21, %v239_v60  ;;  %v7024_v32 = vstv %s7008_s8  ;;  %v7025_v23 = vstv %s7010_s3  ;;  %v7026_v19 = vstv %s7011_s19  ;;  %s7075_s8 = sld [smem:[#allocation111_spill]]  ;;  %s7076_s3 = sld [smem:[#allocation112_spill]] }
 0x104   : > { %v1867_v43 = vmul.f32 %v7024_v32, %v240_v16  ;;  %v1873_v20 = vmul.f32 %v7025_v23, %v240_v16  ;;  %v1879_v55 = vmul.f32 %v7026_v19, %v240_v16  ;;  %v7027_v44 = vmov %v7009_v36  ;;  %v7033_v16 = vld [vmem:[#allocation114_spill] sm:$0xff]  ;;  %s7105_s19 = sld [smem:[#allocation124_spill]] }
 0x105   : > { %v688_v15 = vmul.f32 %v7027_v44, %v239_v60  ;;  %v685_v8 = vadd.f32 %v683_v6, %v661_v5  ;;  %v691_v35 = vadd.f32 %v689_v11, %v667_v29  ;;  %v7028_v58 = vmov %v7012_v3  ;;  %v7034_v6 = vld [vmem:[#allocation120_spill] sm:$0xff] }
 0x106   : > { %v694_v30 = vmul.f32 %v7028_v58, %v239_v60  ;;  %v1838_v4 = vadd.f32 %v7029_v31, %v1814_v1  ;;  %v684_v13 = vadd.f32 %v682_v27, %v660_v38  ;;  %v697_v22 = vadd.f32 %v695_v28, %v673_v46  ;;  %v7035_v11 = vld [vmem:[#allocation115_spill] sm:$0xff]  ;;  %v7037_v38 = vld [vmem:[#allocation116_spill] sm:$0xff] }
 0x107   : > { %v1839_v26 = vadd.f32 %v7030_v2, %v1815_v25  ;;  %v1844_v63 = vadd.f32 %v7031_v9, %v1820_v48  ;;  %v7032_v10 = vmov %v7013_v49  ;;  %v1845_v37 = vadd.f32 %v7033_v16, %v1821_v62 }
 0x108   : > { %v700_v47 = vmul.f32 %v7032_v10, %v239_v60  ;;  %v1850_v36 = vadd.f32 %v7034_v6, %v1826_v0  ;;  %v1851_v3 = vadd.f32 %v7035_v11, %v1827_v33  ;;  %v690_v49 = vadd.f32 %v688_v15, %v666_v24 }
 0x109   : > { %v703_v12 = vadd.f32 %v701_v59, %v679_v40  ;;  %v1856_v1 = vadd.f32 %v7036_v39, %v1832_v14  ;;  %v1857_v28 = vadd.f32 %v7037_v38, %v1833_v52  ;;  %v7039_v5 = vmov %v7020_v7 }
 0x10a   : > { %v1860_v25 = vmul.f32 %v7039_v5, %v239_v60  ;;  %v7041_v48 = vmov %v7024_v32  ;;  %v7042_v45 = vmov %v7025_v23  ;;  %v1875_v62 = vadd.f32 %v1873_v20, %v1851_v3 }
 0x10b   : > { %v1866_v54 = vmul.f32 %v7041_v48, %v239_v60  ;;  %v1872_v29 = vmul.f32 %v7042_v45, %v239_v60  ;;  %v696_v0 = vadd.f32 %v694_v30, %v672_v50  ;;  %v7044_v51 = vmov %v7026_v19 }
 0x10c   : > { %v1878_v33 = vmul.f32 %v7044_v51, %v239_v60  ;;  %v1881_v59 = vadd.f32 %v1879_v55, %v1857_v28  ;;  %v257_v52 = vsel %vm189_vm2, 0.0, %v3520_v34  ;;  %v702_v14 = vadd.f32 %v700_v47, %v678_v56 }
 0x10d   : > { %v1863_v24 = vadd.f32 %v1861_v42, %v1839_v26  ;;  %v1869_v53 = vadd.f32 %v1867_v43, %v1845_v37  ;;  %v1874_v46 = vadd.f32 %v1872_v29, %v1850_v36  ;;  %v7049_v7 = vstv %s4166_s20  ;;  %v3523_v37 = vpop.permute.xlu1 %3522  ;;  %s7064_s20 = sld [smem:[#allocation97_spill]] }
 0x10e   : > { %v1880_v50 = vadd.f32 %v1878_v33, %v1856_v1  ;;  %v707_v41 = vmul.f32 %v7049_v7, %v257_v52  ;;  %v7050_v60 = vstv %s7038_s22  ;;  %v7051_v40 = vstv %s7040_s23  ;;  %s7106_s22 = sld [smem:[#allocation123_spill]]  ;;  %s7107_s23 = sld [smem:[#allocation125_spill]] }
 0x10f   : > { %v713_v61 = vmul.f32 %v7050_v60, %v257_v52  ;;  %v719_v21 = vmul.f32 %v7051_v40, %v257_v52  ;;  %v1862_v27 = vadd.f32 %v1860_v25, %v1838_v4  ;;  %v1868_v32 = vadd.f32 %v1866_v54, %v1844_v63 }
 0x110   : > { %v7052_v23 = vstv %s7043_s28  ;;  %v256_v42 = vsel %vm189_vm2, 0.0, %v3519_v18  ;;  %v7053_v56 = vstv %s7045_s25  ;;  %v7054_v20 = vstv %s7046_s21  ;;  %s7128_s28 = sld [smem:[#allocation142_spill]] }
 0x111   : > { %v725_v34 = vmul.f32 %v7052_v23, %v257_v52  ;;  %v1885_v43 = vmul.f32 %v7053_v56, %v257_v52  ;;  %v1897_v19 = vmul.f32 %v7054_v20, %v257_v52  ;;  %v7055_v55 = vmov %v7049_v7  ;;  %v7074_v7 = vld [vmem:[#allocation129_spill] sm:$0xff]  ;;  %s7163_s25 = sld [smem:[#allocation122_spill]] }
 0x112   : > { %v706_v44 = vmul.f32 %v7055_v55, %v256_v42  ;;  %v7056_v15 = vmov %v7050_v60  ;;  %v7057_v30 = vstv %s7047_s16  ;;  %v7058_v4 = vstv %s7048_s12  ;;  %v7083_v55 = vld [vmem:[#allocation135_spill] sm:$0xff]  ;;  %s7187_s21 = sld [smem:[#allocation170_spill]]  ;;  %s5182_s12 = sld [smem:[#allocation2 + $0xc6]] }
 0x113   : > { %v712_v58 = vmul.f32 %v7056_v15, %v256_v42  ;;  %v1891_v31 = vmul.f32 %v7057_v30, %v257_v52  ;;  %v1903_v2 = vmul.f32 %v7058_v4, %v257_v52  ;;  %v7059_v26 = vmov %v7051_v40  ;;  %v7072_v52 = vld [vmem:[#allocation128_spill] sm:$0xff]  ;;  %s5180_s16 = sld [smem:[#allocation2 + $0xa2]] }
 0x114   : > { %v718_v57 = vmul.f32 %v7059_v26, %v256_v42  ;;  %v7060_v9 = vmov %v7052_v23  ;;  %v708_v63 = vadd.f32 %v706_v44, %v684_v13  ;;  %v709_v10 = vadd.f32 %v707_v41, %v685_v8  ;;  %v7084_v44 = vld [vmem:[#allocation136_spill] sm:$0xff] }
 0x115   : > { %v724_v18 = vmul.f32 %v7060_v9, %v256_v42  ;;  %v715_v47 = vadd.f32 %v713_v61, %v691_v35  ;;  %v721_v16 = vadd.f32 %v719_v21, %v697_v22  ;;  %v714_v6 = vadd.f32 %v712_v58, %v690_v49 }
 0x116   : > { %v720_v36 = vadd.f32 %v718_v57, %v696_v0  ;;  %v727_v11 = vadd.f32 %v725_v34, %v703_v12  ;;  %v7061_v3 = vmov %v7053_v56  ;;  %v7062_v38 = vmov %v7054_v20  ;;  %v7069_v12 = vld [vmem:[#allocation126_spill] sm:$0xff]  ;;  %v7070_v0 = vld [vmem:[#allocation127_spill] sm:$0xff] }
 0x117   : > { %v1884_v39 = vmul.f32 %v7061_v3, %v256_v42  ;;  %v726_v1 = vadd.f32 %v724_v18, %v702_v14  ;;  %v1896_v28 = vmul.f32 %v7062_v38, %v256_v42  ;;  %v1899_v5 = vadd.f32 %v1897_v19, %v1875_v62  ;;  %v7082_v19 = vld [vmem:[#allocation134_spill] sm:$0xff] }
 0x118   : > { %v7063_v25 = vmov %v7058_v4  ;;  %v7065_v54 = vmov %v7057_v30  ;;  %v1905_v13 = vadd.f32 %v1903_v2, %v1881_v59  ;;  %v3525_v8 = vunpack.i.h.bf16 %v3523_v37 }
 0x119   : > { %v1902_v48 = vmul.f32 %v7063_v25, %v256_v42  ;;  %v1890_v45 = vmul.f32 %v7065_v54, %v256_v42  ;;  %v3524_v35 = vunpack.i.l.bf16 %v3523_v37  ;;  %v1898_v22 = vadd.f32 %v1896_v28, %v1874_v46 }
 0x11a   : > { %v732_v29 = vadd.f32 %v7069_v12, %v708_v63  ;;  %v733_v51 = vadd.f32 %v7070_v0, %v709_v10  ;;  %v1887_v33 = vadd.f32 %v1885_v43, %v1863_v24  ;;  %v265_v62 = vsel %vm198_vm3, %v3525_v8, 0.0  ;;  %v7081_v43 = vld [vmem:[#allocation133_spill] sm:$0xff]  ;;  %v7098_v0 = vld [vmem:[#allocation144_spill] sm:$0xff] }
 0x11b   : > { %v1904_v49 = vadd.f32 %v1902_v48, %v1880_v50  ;;  %v738_v14 = vadd.f32 %v7072_v52, %v714_v6  ;;  %v739_v59 = vadd.f32 %v7074_v7, %v715_v47  ;;  %v1886_v41 = vadd.f32 %v1884_v39, %v1862_v27  ;;  %v7093_v39 = vld [vmem:[#allocation138_spill] sm:$0xff]  ;;  %v7095_v48 = vld [vmem:[#allocation139_spill] sm:$0xff]  ;;  %v7100_v7 = vld [vmem:[#allocation146_spill] sm:$0xff] }
 0x11c   : > { %v1893_v60 = vadd.f32 %v1891_v31, %v1869_v53  ;;  %v7077_v46 = vstv %s7064_s20  ;;  %v7078_v61 = vstv %s7066_s30  ;;  %v1892_v21 = vadd.f32 %v1890_v45, %v1868_v32  ;;  %v7096_v45 = vld [vmem:[#allocation140_spill] sm:$0xff]  ;;  %s5192_s20 = sld [smem:[#allocation2 + $0x13]]  ;;  %s5194_s30 = sld [smem:[#allocation2 + $0x37]] }
 0x11d   : > { %v755_v50 = vmul.f32 %v7077_v46, %v265_v62  ;;  %v761_v40 = vmul.f32 %v7078_v61, %v265_v62  ;;  %v7079_v24 = vstv %s7067_s27  ;;  %v7080_v34 = vstv %s7068_s1  ;;  %s5204_s27 = sld [smem:[#allocation2 + $0xea]]  ;;  %s5206_s1 = sld [smem:[#allocation2 + $0x10e]] }
 0x11e   : > { %v767_v23 = vmul.f32 %v7079_v24, %v265_v62  ;;  %v773_v42 = vmul.f32 %v7080_v34, %v265_v62  ;;  %v264_v56 = vsel %vm198_vm3, %v3524_v35, 0.0  ;;  %v744_v20 = vadd.f32 %v7081_v43, %v720_v36  ;;  %v7097_v35 = vld [vmem:[#allocation143_spill] sm:$0xff] }
 0x11f   : > { %v745_v27 = vadd.f32 %v7082_v19, %v721_v16  ;;  %v750_v53 = vadd.f32 %v7083_v55, %v726_v1  ;;  %v751_v15 = vadd.f32 %v7084_v44, %v727_v11  ;;  %v7085_v58 = vstv %s7071_s29  ;;  %v7092_v11 = vld [vmem:[#allocation137_spill] sm:$0xff]  ;;  %s5220_s29 = sld [smem:[#allocation2 + $0x5b]] }
 0x120   : > { %v1933_v30 = vmul.f32 %v7085_v58, %v265_v62  ;;  %v7086_v31 = vstv %s7073_s11  ;;  %v7087_v4 = vstv %s7075_s8  ;;  %v7088_v26 = vstv %s7076_s3  ;;  %s5222_s11 = sld [smem:[#allocation2 + $0x7f]]  ;;  %s7220_s8 = sld [smem:[#allocation175_spill]] }
 0x121   : > { %v1939_v32 = vmul.f32 %v7086_v31, %v265_v62  ;;  %v1945_v2 = vmul.f32 %v7087_v4, %v265_v62  ;;  %v1951_v57 = vmul.f32 %v7088_v26, %v265_v62  ;;  %v7089_v9 = vmov %v7077_v46  ;;  %v7099_v62 = vld [vmem:[#allocation145_spill] sm:$0xff]  ;;  %v3528_v46 = vpop.permute.xlu0 %3527  ;;  %s7221_s3 = sld [smem:[#allocation176_spill]] }
 0x122   : > { %v754_v18 = vmul.f32 %v7089_v9, %v264_v56  ;;  %v757_v63 = vadd.f32 %v755_v50, %v733_v51  ;;  %v7090_v10 = vmov %v7078_v61  ;;  %v763_v37 = vadd.f32 %v761_v40, %v739_v59 }
 0x123   : > { %v760_v47 = vmul.f32 %v7090_v10, %v264_v56  ;;  %v7091_v6 = vmov %v7079_v24  ;;  %v769_v36 = vadd.f32 %v767_v23, %v745_v27  ;;  %v1910_v3 = vadd.f32 %v7092_v11, %v1886_v41 }
 0x124   : > { %v766_v16 = vmul.f32 %v7091_v6, %v264_v56  ;;  %v1911_v1 = vadd.f32 %v7093_v39, %v1887_v33  ;;  %v7094_v38 = vmov %v7080_v34  ;;  %v775_v25 = vadd.f32 %v773_v42, %v751_v15 }
 0x125   : > { %v772_v28 = vmul.f32 %v7094_v38, %v264_v56  ;;  %v1916_v54 = vadd.f32 %v7095_v48, %v1892_v21  ;;  %v1917_v8 = vadd.f32 %v7096_v45, %v1893_v60  ;;  %v1922_v12 = vadd.f32 %v7097_v35, %v1898_v22  ;;  %v5028_v44 = vpop.permute.xlu0 %3537 }
 0x126   : > { %v1923_v51 = vadd.f32 %v7098_v0, %v1899_v5  ;;  %v1928_v52 = vadd.f32 %v7099_v62, %v1904_v49  ;;  %v1929_v59 = vadd.f32 %v7100_v7, %v1905_v13  ;;  %v756_v41 = vadd.f32 %v754_v18, %v732_v29  ;;  %v3533_v29 = vpop.permute.xlu1 %3532 }
 0x127   : > { %v762_v50 = vadd.f32 %v760_v47, %v738_v14  ;;  %v7101_v33 = vmov %v7085_v58  ;;  %v7102_v40 = vmov %v7086_v31  ;;  %v7103_v23 = vmov %v7087_v4 }
 0x128   : > { %v1932_v61 = vmul.f32 %v7101_v33, %v264_v56  ;;  %v1938_v24 = vmul.f32 %v7102_v40, %v264_v56  ;;  %v1944_v34 = vmul.f32 %v7103_v23, %v264_v56  ;;  %v1947_v21 = vadd.f32 %v1945_v2, %v1923_v51 }
 0x129   : > { %v7104_v42 = vmov %v7088_v26  ;;  %v1953_v22 = vadd.f32 %v1951_v57, %v1929_v59  ;;  %v768_v5 = vadd.f32 %v766_v16, %v744_v20  ;;  %v774_v49 = vadd.f32 %v772_v28, %v750_v53 }
 0x12a   : > { %v1950_v60 = vmul.f32 %v7104_v42, %v264_v56  ;;  %v3530_v43 = vunpack.i.h.bf16 %v3528_v46  ;;  %v3529_v13 = vunpack.i.l.bf16 %v3528_v46  ;;  %v1935_v14 = vadd.f32 %v1933_v30, %v1911_v1 }
 0x12b   : > { %v1941_v19 = vadd.f32 %v1939_v32, %v1917_v8  ;;  %v1946_v27 = vadd.f32 %v1944_v34, %v1922_v12  ;;  %v1934_v56 = vadd.f32 %v1932_v61, %v1910_v3  ;;  %v1940_v15 = vadd.f32 %v1938_v24, %v1916_v54 }
 0x12c   : > { %v1952_v55 = vadd.f32 %v1950_v60, %v1928_v52  ;;  %v273_v20 = vsel %vm189_vm2, 0.0, %v3530_v43  ;;  %v272_v53 = vsel %vm189_vm2, 0.0, %v3529_v13  ;;  %v7108_v58 = vstv %s4310_s26  ;;  %s7124_s26 = sld [smem:[#allocation131_spill]] }
 0x12d   : > { %v779_v30 = vmul.f32 %v7108_v58, %v273_v20  ;;  %v7109_v31 = vstv %s4312_s14  ;;  %v7110_v4 = vstv %s6817_s5  ;;  %v3535_v26 = vunpack.i.h.bf16 %v3533_v29  ;;  %s7122_s14 = sld [smem:[#allocation130_spill]]  ;;  %s7125_s5 = sld [smem:[#allocation132_spill]] }
 0x12e   : > { %v785_v32 = vmul.f32 %v7109_v31, %v273_v20  ;;  %v791_v2 = vmul.f32 %v7110_v4, %v273_v20  ;;  %v7111_v57 = vstv %s6818_s2  ;;  %v3534_v18 = vunpack.i.l.bf16 %v3533_v29  ;;  %s7127_s2 = sld [smem:[#allocation141_spill]] }
 0x12f   : > { %v797_v9 = vmul.f32 %v7111_v57, %v273_v20  ;;  %v3540_v10 = vunpack.i.h.bf16 %v5028_v44  ;;  %v3539_v47 = vunpack.i.l.bf16 %v5028_v44  ;;  %v7112_v6 = vstv %s6819_s7  ;;  %s7156_s7 = sld [smem:[#allocation96_spill]] }
 0x130   : > { %v1957_v16 = vmul.f32 %v7112_v6, %v273_v20  ;;  %v7113_v11 = vstv %s7105_s19  ;;  %v7114_v39 = vmov %v7108_v58  ;;  %v7115_v38 = vmov %v7109_v31  ;;  %s5253_s19 = sld [smem:[#allocation2 + $0x14]] }
 0x131   : > { %v1969_v3 = vmul.f32 %v7113_v11, %v273_v20  ;;  %v778_v1 = vmul.f32 %v7114_v39, %v272_v53  ;;  %v784_v28 = vmul.f32 %v7115_v38, %v272_v53  ;;  %v7116_v48 = vstv %s7106_s22  ;;  %v7140_v39 = vld [vmem:[#allocation149_spill] sm:$0xff]  ;;  %v7141_v38 = vld [vmem:[#allocation156_spill] sm:$0xff]  ;;  %s5255_s22 = sld [smem:[#allocation2 + $0x38]] }
 0x132   : > { %v1963_v54 = vmul.f32 %v7116_v48, %v273_v20  ;;  %v7117_v45 = vstv %s7107_s23  ;;  %v7118_v35 = vmov %v7110_v4  ;;  %v7119_v0 = vmov %v7111_v57  ;;  %s5264_s23 = sld [smem:[#allocation2 + $0xa3]] }
 0x133   : > { %v1975_v8 = vmul.f32 %v7117_v45, %v273_v20  ;;  %v790_v12 = vmul.f32 %v7118_v35, %v272_v53  ;;  %v796_v51 = vmul.f32 %v7119_v0, %v272_v53  ;;  %v781_v62 = vadd.f32 %v779_v30, %v757_v63  ;;  %v7144_v35 = vld [vmem:[#allocation151_spill] sm:$0xff]  ;;  %v7145_v0 = vld [vmem:[#allocation153_spill] sm:$0xff] }
 0x134   : > { %v787_v52 = vadd.f32 %v785_v32, %v763_v37  ;;  %v793_v7 = vadd.f32 %v791_v2, %v769_v36  ;;  %v7120_v59 = vmov %v7112_v6  ;;  %v780_v33 = vadd.f32 %v778_v1, %v756_v41 }
 0x135   : > { %v1956_v46 = vmul.f32 %v7120_v59, %v272_v53  ;;  %v786_v61 = vadd.f32 %v784_v28, %v762_v50  ;;  %v799_v40 = vadd.f32 %v797_v9, %v775_v25  ;;  %v7121_v24 = vmov %v7116_v48  ;;  %v7137_v9 = vld [vmem:[#allocation150_spill] sm:$0xff] }
 0x136   : > { %v1962_v23 = vmul.f32 %v7121_v24, %v272_v53  ;;  %v1959_v34 = vadd.f32 %v1957_v16, %v1935_v14  ;;  %v7123_v42 = vmov %v7113_v11  ;;  %v1971_v43 = vadd.f32 %v1969_v3, %v1947_v21  ;;  %v7138_v16 = vld [vmem:[#allocation152_spill] sm:$0xff] }
 0x137   : > { %v1968_v60 = vmul.f32 %v7123_v42, %v272_v53  ;;  %v7126_v13 = vmov %v7117_v45  ;;  %v792_v37 = vadd.f32 %v790_v12, %v768_v5  ;;  %v798_v36 = vadd.f32 %v796_v51, %v774_v49 }
 0x138   : > { %v1974_v63 = vmul.f32 %v7126_v13, %v272_v53  ;;  %v1977_v29 = vadd.f32 %v1975_v8, %v1953_v22  ;;  %v281_v41 = vsel %vm198_vm3, %v3535_v26, 0.0  ;;  %v1958_v50 = vadd.f32 %v1956_v46, %v1934_v56  ;;  %v7134_v26 = vld [vmem:[#allocation148_spill] sm:$0xff] }
 0x139   : > { %v1965_v25 = vadd.f32 %v1963_v54, %v1941_v19  ;;  %v1970_v20 = vadd.f32 %v1968_v60, %v1946_v27  ;;  %v1964_v14 = vadd.f32 %v1962_v23, %v1940_v15  ;;  %v7129_v30 = vstv %s4374_s10  ;;  %v7136_v15 = vld [vmem:[#allocation147_spill] sm:$0xff]  ;;  %s7162_s10 = sld [smem:[#allocation117_spill]] }
 0x13a   : > { %v1976_v58 = vadd.f32 %v1974_v63, %v1952_v55  ;;  %v827_v31 = vmul.f32 %v7129_v30, %v281_v41  ;;  %v7130_v21 = vstv %s7122_s14  ;;  %v280_v53 = vsel %vm198_vm3, %v3534_v18, 0.0  ;;  %v7149_v60 = vld [vmem:[#allocation157_spill] sm:$0xff]  ;;  %s5266_s14 = sld [smem:[#allocation2 + $0xc7]] }
 0x13b   : > { %v833_v32 = vmul.f32 %v7130_v21, %v281_v41  ;;  %v7131_v5 = vstv %s7124_s26  ;;  %v7132_v22 = vstv %s7125_s5  ;;  %v7133_v2 = vstv %s7127_s2  ;;  %s5272_s26 = sld [smem:[#allocation2 + $0xeb]]  ;;  %s5274_s5 = sld [smem:[#allocation2 + $0x10f]] }
 0x13c   : > { %v839_v49 = vmul.f32 %v7131_v5, %v281_v41  ;;  %v845_v4 = vmul.f32 %v7132_v22, %v281_v41  ;;  %v2005_v56 = vmul.f32 %v7133_v2, %v281_v41  ;;  %v805_v19 = vadd.f32 %v7134_v26, %v781_v62 }
 0x13d   : > { %v7135_v27 = vstv %s7128_s28  ;;  %v804_v57 = vadd.f32 %v7136_v15, %v780_v33  ;;  %v811_v6 = vadd.f32 %v7137_v9, %v787_v52  ;;  %v817_v11 = vadd.f32 %v7138_v16, %v793_v7 }
 0x13e   : > { %v2011_v55 = vmul.f32 %v7135_v27, %v281_v41  ;;  %v7139_v18 = vstv %s4434_s13  ;;  %v810_v1 = vadd.f32 %v7140_v39, %v786_v61  ;;  %v823_v28 = vadd.f32 %v7141_v38, %v799_v40  ;;  %s7184_s13 = sld [smem:[#allocation167_spill]] }
 0x13f   : > { %v2017_v3 = vmul.f32 %v7139_v18, %v281_v41  ;;  %v7142_v48 = vmov %v7129_v30  ;;  %v7143_v45 = vstv %s4436_s0  ;;  %v816_v12 = vadd.f32 %v7144_v35, %v792_v37  ;;  %v7150_v37 = vld [vmem:[#allocation158_spill] sm:$0xff]  ;;  %s7179_s0 = sld [smem:[#allocation154_spill]] }
 0x140   : > { %v826_v54 = vmul.f32 %v7142_v48, %v280_v53  ;;  %v2023_v8 = vmul.f32 %v7143_v45, %v281_v41  ;;  %v822_v51 = vadd.f32 %v7145_v0, %v798_v36  ;;  %v7146_v62 = vmov %v7130_v21  ;;  %v7151_v41 = vld [vmem:[#allocation163_spill] sm:$0xff] }
 0x141   : > { %v832_v59 = vmul.f32 %v7146_v62, %v280_v53  ;;  %v829_v46 = vadd.f32 %v827_v31, %v805_v19  ;;  %v835_v52 = vadd.f32 %v833_v32, %v811_v6  ;;  %v7147_v7 = vmov %v7131_v5  ;;  %v7152_v31 = vld [vmem:[#allocation164_spill] sm:$0xff]  ;;  %v7153_v32 = vld [vmem:[#allocation159_spill] sm:$0xff]  ;;  %v7157_v19 = vld [vmem:[#allocation166_spill] sm:$0xff] }
 0x142   : > { %v838_v33 = vmul.f32 %v7147_v7, %v280_v53  ;;  %v841_v61 = vadd.f32 %v839_v49, %v817_v11  ;;  %v828_v24 = vadd.f32 %v826_v54, %v804_v57  ;;  %v7148_v40 = vmov %v7132_v22  ;;  %v7154_v22 = vld [vmem:[#allocation160_spill] sm:$0xff]  ;;  %v7155_v49 = vld [vmem:[#allocation165_spill] sm:$0xff] }
 0x143   : > { %v844_v23 = vmul.f32 %v7148_v40, %v280_v53  ;;  %v847_v42 = vadd.f32 %v845_v4, %v823_v28  ;;  %v1982_v13 = vadd.f32 %v7149_v60, %v1958_v50  ;;  %v834_v63 = vadd.f32 %v832_v59, %v810_v1 }
 0x144   : > { %v1983_v36 = vadd.f32 %v7150_v37, %v1959_v34  ;;  %v1994_v30 = vadd.f32 %v7151_v41, %v1970_v20  ;;  %v1995_v21 = vadd.f32 %v7152_v31, %v1971_v43  ;;  %v1988_v5 = vadd.f32 %v7153_v32, %v1964_v14 }
 0x145   : > { %v1989_v2 = vadd.f32 %v7154_v22, %v1965_v25  ;;  %v2000_v26 = vadd.f32 %v7155_v49, %v1976_v58  ;;  %v2001_v4 = vadd.f32 %v7157_v19, %v1977_v29  ;;  %v7158_v27 = vstv %s7127_s2  ;;  %s5280_s2 = sld [smem:[#allocation2 + $0x5c]] }
 0x146   : > { %v2004_v50 = vmul.f32 %v7158_v27, %v280_v53  ;;  %v7159_v15 = vstv %s7128_s28  ;;  %v7160_v57 = vmov %v7139_v18  ;;  %v2019_v9 = vadd.f32 %v2017_v3, %v1995_v21  ;;  %v3543_v21 = vpop.permute.xlu1 %3542  ;;  %s5282_s28 = sld [smem:[#allocation2 + $0x80]] }
 0x147   : > { %v2010_v34 = vmul.f32 %v7159_v15, %v280_v53  ;;  %v2016_v20 = vmul.f32 %v7160_v57, %v280_v53  ;;  %v840_v43 = vadd.f32 %v838_v33, %v816_v12  ;;  %v7161_v6 = vmov %v7143_v45 }
 0x148   : > { %v2022_v14 = vmul.f32 %v7161_v6, %v280_v53  ;;  %v2025_v25 = vadd.f32 %v2023_v8, %v2001_v4  ;;  %v296_v58 = vsel %vm189_vm2, 0.0, %v3540_v10  ;;  %v846_v29 = vadd.f32 %v844_v23, %v822_v51 }
 0x149   : > { %v2007_v16 = vadd.f32 %v2005_v56, %v1983_v36  ;;  %v2018_v11 = vadd.f32 %v2016_v20, %v1994_v30  ;;  %v7164_v18 = vstv %s4446_s17  ;;  %v7165_v1 = vstv %s7156_s7  ;;  %s7180_s17 = sld [smem:[#allocation155_spill]] }
 0x14a   : > { %v851_v39 = vmul.f32 %v7164_v18, %v296_v58  ;;  %v2024_v3 = vadd.f32 %v2022_v14, %v2000_v26  ;;  %v857_v38 = vmul.f32 %v7165_v1, %v296_v58  ;;  %v7166_v53 = vstv %s4454_s18  ;;  %s7182_s18 = sld [smem:[#allocation161_spill]]  ;;  %s5301_s7 = sld [smem:[#allocation2 + $0xec]] }
 0x14b   : > { %v863_v28 = vmul.f32 %v7166_v53, %v296_v58  ;;  %v7167_v48 = vstv %s4456_s4  ;;  %v2006_v45 = vadd.f32 %v2004_v50, %v1982_v13  ;;  %v2012_v8 = vadd.f32 %v2010_v34, %v1988_v5  ;;  %s7183_s4 = sld [smem:[#allocation162_spill]] }
 0x14c   : > { %v869_v54 = vmul.f32 %v7167_v48, %v296_v58  ;;  %v2013_v10 = vadd.f32 %v2011_v55, %v1989_v2  ;;  %v295_v56 = vsel %vm189_vm2, 0.0, %v3539_v47  ;;  %v7168_v35 = vstv %s4462_s24  ;;  %s7185_s24 = sld [smem:[#allocation168_spill]] }
 0x14d   : > { %v2029_v12 = vmul.f32 %v7168_v35, %v296_v58  ;;  %v7169_v0 = vstv %s4486_s9  ;;  %v7170_v62 = vmov %v7164_v18  ;;  %v7171_v7 = vmov %v7165_v1  ;;  %s7186_s9 = sld [smem:[#allocation169_spill]]  ;;  %v7191_v1 = vld [vmem:[#allocation172_spill] sm:$0xff] }
 0x14e   : > { %v2041_v51 = vmul.f32 %v7169_v0, %v296_v58  ;;  %v850_v59 = vmul.f32 %v7170_v62, %v295_v56  ;;  %v856_v33 = vmul.f32 %v7171_v7, %v295_v56  ;;  %v7172_v40 = vstv %s7162_s10  ;;  %v7199_v62 = vld [vmem:[#allocation180_spill] sm:$0xff]  ;;  %s5303_s10 = sld [smem:[#allocation2 + $0x110]] }
 0x14f   : > { %v2035_v23 = vmul.f32 %v7172_v40, %v296_v58  ;;  %v7173_v60 = vstv %s7163_s25  ;;  %v853_v13 = vadd.f32 %v851_v39, %v829_v46  ;;  %v7174_v44 = vmov %v7166_v53  ;;  %s5343_s25 = sld [smem:[#allocation2 + $0x15]] }
 0x150   : > { %v2047_v55 = vmul.f32 %v7173_v60, %v296_v58  ;;  %v862_v37 = vmul.f32 %v7174_v44, %v295_v56  ;;  %v859_v47 = vadd.f32 %v857_v38, %v835_v52  ;;  %v865_v36 = vadd.f32 %v863_v28, %v841_v61  ;;  %v7188_v58 = vld [vmem:[#allocation171_spill] sm:$0xff] }
 0x151   : > { %v7175_v41 = vmov %v7167_v48  ;;  %v871_v31 = vadd.f32 %v869_v54, %v847_v42  ;;  %v852_v32 = vadd.f32 %v850_v59, %v828_v24  ;;  %v858_v5 = vadd.f32 %v856_v33, %v834_v63 }
 0x152   : > { %v868_v30 = vmul.f32 %v7175_v41, %v295_v56  ;;  %v7176_v22 = vmov %v7168_v35  ;;  %v7177_v49 = vmov %v7172_v40  ;;  %v2031_v19 = vadd.f32 %v2029_v12, %v2007_v16 }
 0x153   : > { %v2028_v2 = vmul.f32 %v7176_v22, %v295_v56  ;;  %v2034_v26 = vmul.f32 %v7177_v49, %v295_v56  ;;  %v7178_v4 = vmov %v7169_v0  ;;  %v2043_v46 = vadd.f32 %v2041_v51, %v2019_v9  ;;  %v7198_v0 = vld [vmem:[#allocation178_spill] sm:$0xff] }
 0x154   : > { %v2040_v27 = vmul.f32 %v7178_v4, %v295_v56  ;;  %v7181_v50 = vmov %v7173_v60  ;;  %v864_v52 = vadd.f32 %v862_v37, %v840_v43  ;;  %v2049_v61 = vadd.f32 %v2047_v55, %v2025_v25  ;;  %v7202_v60 = vld [vmem:[#allocation177_spill] sm:$0xff] }
 0x155   : > { %v2046_v15 = vmul.f32 %v7181_v50, %v295_v56  ;;  %v3545_v42 = vunpack.i.h.bf16 %v3543_v21  ;;  %v3544_v34 = vunpack.i.l.bf16 %v3543_v21  ;;  %v870_v24 = vadd.f32 %v868_v30, %v846_v29  ;;  %v7192_v29 = vld [vmem:[#allocation174_spill] sm:$0xff] }
 0x156   : > { %v2037_v63 = vadd.f32 %v2035_v23, %v2013_v10  ;;  %v2042_v57 = vadd.f32 %v2040_v27, %v2018_v11  ;;  %v2030_v6 = vadd.f32 %v2028_v2, %v2006_v45  ;;  %v2036_v14 = vadd.f32 %v2034_v26, %v2012_v8  ;;  %v7195_v45 = vld [vmem:[#allocation173_spill] sm:$0xff]  ;;  %v7208_v26 = vld [vmem:[#allocation181_spill] sm:$0xff]  ;;  %v7209_v27 = vld [vmem:[#allocation182_spill] sm:$0xff] }
 0x157   : > { %v2048_v20 = vadd.f32 %v2046_v15, %v2024_v3  ;;  %v304_v9 = vsel %vm198_vm3, %v3545_v42, 0.0  ;;  %v876_v16 = vadd.f32 %v7188_v58, %v852_v32  ;;  %v7189_v43 = vstv %s7179_s0  ;;  %v7210_v15 = vld [vmem:[#allocation183_spill] sm:$0xff]  ;;  %v7211_v42 = vld [vmem:[#allocation184_spill] sm:$0xff]  ;;  %v7213_v58 = vld [vmem:[#allocation186_spill] sm:$0xff]  ;;  %s5345_s0 = sld [smem:[#allocation2 + $0x39]] }
 0x158   : > { %v899_v18 = vmul.f32 %v7189_v43, %v304_v9  ;;  %v7190_v25 = vstv %s7180_s17  ;;  %v877_v38 = vadd.f32 %v7191_v1, %v853_v13  ;;  %v883_v53 = vadd.f32 %v7192_v29, %v859_v47  ;;  %v7203_v13 = vld [vmem:[#allocation179_spill] sm:$0xff]  ;;  %s5347_s17 = sld [smem:[#allocation2 + $0x5d]] }
 0x159   : > { %v905_v39 = vmul.f32 %v7190_v25, %v304_v9  ;;  %v7193_v28 = vstv %s7182_s18  ;;  %v7194_v3 = vstv %s7183_s4  ;;  %v303_v54 = vsel %vm198_vm3, %v3544_v34, 0.0  ;;  %s5349_s18 = sld [smem:[#allocation2 + $0x81]]  ;;  %s5355_s4 = sld [smem:[#allocation2 + $0xa5]] }
 0x15a   : > { %v911_v11 = vmul.f32 %v7193_v28, %v304_v9  ;;  %v917_v48 = vmul.f32 %v7194_v3, %v304_v9  ;;  %v882_v8 = vadd.f32 %v7195_v45, %v858_v5  ;;  %v7196_v10 = vstv %s7184_s13  ;;  %s5357_s13 = sld [smem:[#allocation2 + $0xc9]] }
 0x15b   : > { %v2077_v56 = vmul.f32 %v7196_v10, %v304_v9  ;;  %v7197_v35 = vstv %s7185_s24  ;;  %v889_v51 = vadd.f32 %v7198_v0, %v865_v36  ;;  %v895_v59 = vadd.f32 %v7199_v62, %v871_v31  ;;  %s5363_s24 = sld [smem:[#allocation2 + $0x16]] }
 0x15c   : > { %v2083_v12 = vmul.f32 %v7197_v35, %v304_v9  ;;  %v7200_v7 = vstv %s7186_s9  ;;  %v7201_v40 = vstv %s7187_s21  ;;  %v888_v55 = vadd.f32 %v7202_v60, %v864_v52  ;;  %v7222_v60 = vld [vmem:[#allocation20_spill] sm:$0xff]  ;;  %s5365_s9 = sld [smem:[#allocation2 + $0x3a]]  ;;  %s5371_s21 = sld [smem:[#allocation2 + $0xed]] }
 0x15d   : > { %v2089_v33 = vmul.f32 %v7200_v7, %v304_v9  ;;  %v2095_v23 = vmul.f32 %v7201_v40, %v304_v9  ;;  %v894_v44 = vadd.f32 %v7203_v13, %v870_v24  ;;  %v7204_v37 = vmov %v7189_v43  ;;  %v7212_v24 = vld [vmem:[#allocation185_spill] sm:$0xff]  ;;  %v7223_v13 = vld [vmem:[#allocation19_spill] sm:$0xff] }
 0x15e   : > { %v898_v47 = vmul.f32 %v7204_v37, %v303_v54  ;;  %v5186_v41 = vadd.f32 %v899_v18, %v877_v38  ;;  %v7205_v36 = vmov %v7190_v25  ;;  %v5190_v21 = vadd.f32 %v905_v39, %v883_v53  ;;  %v7214_v18 = vld [vmem:[#allocation187_spill] sm:$0xff]  ;;  %v7215_v39 = vld [vmem:[#allocation188_spill] sm:$0xff] }
 0x15f   : > { %v904_v30 = vmul.f32 %v7205_v36, %v303_v54  ;;  %v7206_v31 = vmov %v7193_v28  ;;  %v5198_v5 = vadd.f32 %v911_v11, %v889_v51  ;;  %v7207_v22 = vmov %v7194_v3 }
 0x160   : > { %v910_v32 = vmul.f32 %v7206_v31, %v303_v54  ;;  %v916_v2 = vmul.f32 %v7207_v22, %v303_v54  ;;  %v5202_v49 = vadd.f32 %v917_v48, %v895_v59  ;;  %v2054_v4 = vadd.f32 %v7208_v26, %v2030_v6 }
 0x161   : > { %v2055_v50 = vadd.f32 %v7209_v27, %v2031_v19  ;;  %v2060_v52 = vadd.f32 %v7210_v15, %v2036_v14  ;;  %v2061_v34 = vadd.f32 %v7211_v42, %v2037_v63  ;;  %v2066_v9 = vadd.f32 %v7212_v24, %v2042_v57  ;;  %v3548_v14 = vpop.permute.xlu0 %3547 }
 0x162   : > { %v2067_v43 = vadd.f32 %v7213_v58, %v2043_v46  ;;  %v2072_v25 = vadd.f32 %v7214_v18, %v2048_v20  ;;  %v2073_v1 = vadd.f32 %v7215_v39, %v2049_v61  ;;  %v900_v38 = vadd.f32 %v898_v47, %v876_v16 }
 0x163   : > { %v906_v29 = vadd.f32 %v904_v30, %v882_v8  ;;  %v7216_v53 = vmov %v7196_v10  ;;  %v7217_v6 = vmov %v7197_v35  ;;  %v7218_v19 = vmov %v7200_v7 }
 0x164   : > { %v2076_v28 = vmul.f32 %v7216_v53, %v303_v54  ;;  %v2082_v11 = vmul.f32 %v7217_v6, %v303_v54  ;;  %v2088_v63 = vmul.f32 %v7218_v19, %v303_v54  ;;  %v2091_v57 = vadd.f32 %v2089_v33, %v2067_v43 }
 0x165   : > { %v7219_v46 = vmov %v7201_v40  ;;  %v5228_v61 = vadd.f32 %v2095_v23, %v2073_v1  ;;  %v912_v16 = vadd.f32 %v910_v32, %v888_v55  ;;  %v918_v3 = vadd.f32 %v916_v2, %v894_v44 }
 0x166   : > { %v2094_v20 = vmul.f32 %v7219_v46, %v303_v54  ;;  %v2079_v48 = vadd.f32 %v2077_v56, %v2055_v50  ;;  %v2085_v45 = vadd.f32 %v2083_v12, %v2061_v34  ;;  %v2078_v8 = vadd.f32 %v2076_v28, %v2054_v4 }
 0x167   : > { %v2084_v10 = vadd.f32 %v2082_v11, %v2060_v52  ;;  %v2090_v35 = vadd.f32 %v2088_v63, %v2066_v9  ;;  %v3550_v51 = vunpack.i.h.bf16 %v3548_v14  ;;  %v3549_v62 = vunpack.i.l.bf16 %v3548_v14 }
 0x168   : > { %v2096_v0 = vadd.f32 %v2094_v20, %v2072_v25  ;;  %v945_v54 = vstv %s5192_s20  ;;  %v951_v59 = vstv %s5194_s30  ;;  %v2099_v7 = vstv %s5180_s16  ;;  %s5373_s16 = sld [smem:[#allocation2 + $0x111]]  ;;  %s5389_s20 = sld [smem:[#allocation2 + $0x82]] }
 0x169   : > { %v2105_v33 = vstv %s5182_s12  ;;  %v2111_v40 = vstv %s5204_s27  ;;  %v2117_v23 = vstv %s5206_s1  ;;  %v321_v56 = vsel %vm189_vm2, 0.0, %v3550_v51  ;;  %s5387_s12 = sld [smem:[#allocation2 + $0x5e]]  ;;  %s5424_s30 = sld [smem:[#allocation2 + $0x17]] }
 0x16a   : > { %v320_v12 = vsel %vm189_vm2, 0.0, %v3549_v62  ;;  %v5239_v55 = vmul.f32 %v945_v54, %v7222_v60  ;;  %v5242_v44 = vmul.f32 %v945_v54, %v7223_v13  ;;  %v7224_v37 = vstv %s7220_s8  ;;  %s5426_s27 = sld [smem:[#allocation2 + $0x3b]]  ;;  %s5433_s1 = sld [smem:[#allocation2 + $0xa6]] }
 0x16b   : > { %v923_v47 = vmul.f32 %v7224_v37, %v321_v56  ;;  %v7225_v36 = vstv %s7221_s3  ;;  %v7226_v31 = vstv %s4598_s6  ;;  %v5251_v22 = vmul.f32 %v951_v59, %v7222_v60  ;;  %s5292_s6 = sld [smem:[#allocation2 + $0xa4]]  ;;  %s5439_s8 = sld [smem:[#allocation2 + $0x112]] }
 0x16c   : > { %v929_v30 = vmul.f32 %v7225_v36, %v321_v56  ;;  %v935_v32 = vmul.f32 %v7226_v31, %v321_v56  ;;  %v941_v2 = vmul.f32 %v939_v17, %v321_v56  ;;  %v5260_v26 = vmul.f32 %v951_v59, %v7223_v13  ;;  %s5441_s3 = sld [smem:[#allocation2 + $0x5f]] }
 0x16d   : > { %v957_v4 = vstv %s5220_s29  ;;  %v963_v27 = vstv %s5222_s11  ;;  %v2101_v50 = vmul.f32 %v2099_v7, %v321_v56  ;;  %v2113_v15 = vmul.f32 %v2111_v40, %v321_v56  ;;  %s5435_s29 = sld [smem:[#allocation2 + $0xca]]  ;;  %s5437_s11 = sld [smem:[#allocation2 + $0xee]] }
 0x16e   : > { %v7227_v52 = vmov %v7224_v37  ;;  %v7228_v34 = vmov %v7225_v36  ;;  %v2107_v9 = vmul.f32 %v2105_v33, %v321_v56  ;;  %v2119_v58 = vmul.f32 %v2117_v23, %v321_v56 }
 0x16f   : > { %v922_v42 = vmul.f32 %v7227_v52, %v320_v12  ;;  %v928_v24 = vmul.f32 %v7228_v34, %v320_v12  ;;  %v7229_v43 = vmov %v7226_v31  ;;  %v940_v25 = vmul.f32 %v939_v17, %v320_v12 }
 0x170   : > { %v934_v18 = vmul.f32 %v7229_v43, %v320_v12  ;;  %v925_v39 = vadd.f32 %v923_v47, %v5186_v41  ;;  %v931_v1 = vadd.f32 %v929_v30, %v5190_v21  ;;  %v937_v53 = vadd.f32 %v935_v32, %v5198_v5 }
 0x171   : > { %v2100_v28 = vmul.f32 %v2099_v7, %v320_v12  ;;  %v924_v6 = vadd.f32 %v922_v42, %v900_v38  ;;  %v930_v11 = vadd.f32 %v928_v24, %v906_v29  ;;  %v943_v19 = vadd.f32 %v941_v2, %v5202_v49  ;;  %v3553_v7 = vpop.permute.xlu1 %3552 }
 0x172   : > { %v2106_v63 = vmul.f32 %v2105_v33, %v320_v12  ;;  %v5288_v46 = vadd.f32 %v2101_v50, %v2079_v48  ;;  %v2112_v20 = vmul.f32 %v2111_v40, %v320_v12  ;;  %v5290_v17 = vadd.f32 %v2113_v15, %v2091_v57 }
 0x173   : > { %v2118_v14 = vmul.f32 %v2117_v23, %v320_v12  ;;  %v936_v41 = vadd.f32 %v934_v18, %v912_v16  ;;  %v942_v21 = vadd.f32 %v940_v25, %v918_v3  ;;  %v5296_v5 = vadd.f32 %v2107_v9, %v2085_v45 }
 0x174   : > { %v5299_v49 = vadd.f32 %v2119_v58, %v5228_v61  ;;  %v5305_v38 = vadd.f32 %v2100_v28, %v2078_v8  ;;  %v5307_v29 = vadd.f32 %v2106_v63, %v2084_v10  ;;  %v5309_v57 = vadd.f32 %v2112_v20, %v2090_v35 }
 0x175   : > { %v5311_v16 = vadd.f32 %v2118_v14, %v2096_v0  ;;  %v958_v3 = vmul.f32 %v957_v4, %v7222_v60  ;;  %v959_v61 = vmul.f32 %v957_v4, %v7223_v13  ;;  %v964_v48 = vmul.f32 %v963_v27, %v7222_v60 }
 0x176   : > { %v965_v45 = vmul.f32 %v963_v27, %v7223_v13  ;;  %v2123_v51 = vstv %s5264_s23  ;;  %v2129_v62 = vstv %s5266_s14  ;;  %v2135_v54 = vstv %s5272_s26  ;;  %s5458_s23 = sld [smem:[#allocation2 + $0xcb]]  ;;  %s5467_s14 = sld [smem:[#allocation2 + $0xef]] }
 0x177   : > { %v2141_v8 = vstv %s5274_s5  ;;  %v969_v10 = vstv %s5253_s19  ;;  %v975_v59 = vstv %s5255_s22  ;;  %v981_v35 = vstv %s5280_s2  ;;  %s5443_s19 = sld [smem:[#allocation2 + $0x83]]  ;;  %s5456_s22 = sld [smem:[#allocation2 + $0xa7]] }
 0x178   : > { %v987_v0 = vstv %s5282_s28  ;;  %v2124_v33 = vmul.f32 %v2123_v51, %v7222_v60  ;;  %v2125_v40 = vmul.f32 %v2123_v51, %v7223_v13  ;;  %v2130_v23 = vmul.f32 %v2129_v62, %v7222_v60  ;;  %s5469_s26 = sld [smem:[#allocation2 + $0x113]]  ;;  %s5513_s5 = sld [smem:[#allocation2 + $0x18]] }
 0x179   : > { %v2131_v56 = vmul.f32 %v2129_v62, %v7223_v13  ;;  %v2136_v12 = vmul.f32 %v2135_v54, %v7222_v60  ;;  %v2137_v37 = vmul.f32 %v2135_v54, %v7223_v13  ;;  %v2142_v47 = vmul.f32 %v2141_v8, %v7222_v60  ;;  %s5515_s2 = sld [smem:[#allocation2 + $0x3c]]  ;;  %s5517_s28 = sld [smem:[#allocation2 + $0x60]] }
 0x17a   : > { %v2143_v36 = vmul.f32 %v2141_v8, %v7223_v13  ;;  %v2147_v30 = vstv %s5292_s6  ;;  %v2153_v31 = vstv %s5294_s15  ;;  %v3555_v32 = vunpack.i.h.bf16 %v3553_v7  ;;  %s5519_s6 = sld [smem:[#allocation2 + $0x84]]  ;;  %s5525_s15 = sld [smem:[#allocation2 + $0xa8]] }
 0x17b   : > { %v3554_v2 = vunpack.i.l.bf16 %v3553_v7  ;;  %v2159_v4 = vstv %s5301_s7  ;;  %v2165_v27 = vstv %s5303_s10  ;;  %v949_v50 = vadd.f32 %v5242_v44, %v925_v39  ;;  %s5527_s7 = sld [smem:[#allocation2 + $0xcc]]  ;;  %s5533_s10 = sld [smem:[#allocation2 + $0x19]] }
 0x17c   : > { %v955_v15 = vadd.f32 %v5260_v26, %v931_v1  ;;  %v329_v52 = vsel %vm198_vm3, %v3555_v32, 0.0  ;;  %v961_v34 = vadd.f32 %v959_v61, %v937_v53  ;;  %v967_v24 = vadd.f32 %v965_v45, %v943_v19 }
 0x17d   : > { %v328_v42 = vsel %vm198_vm3, %v3554_v2, 0.0  ;;  %v971_v9 = vmul.f32 %v969_v10, %v329_v52  ;;  %v977_v60 = vmul.f32 %v975_v59, %v329_v52  ;;  %v983_v58 = vmul.f32 %v981_v35, %v329_v52 }
 0x17e   : > { %v989_v13 = vmul.f32 %v987_v0, %v329_v52  ;;  %v948_v43 = vadd.f32 %v5239_v55, %v924_v6  ;;  %v954_v18 = vadd.f32 %v5251_v22, %v930_v11  ;;  %v960_v25 = vadd.f32 %v958_v3, %v936_v41 }
 0x17f   : > { %v966_v28 = vadd.f32 %v964_v48, %v942_v21  ;;  %v2149_v44 = vmul.f32 %v2147_v30, %v329_v52  ;;  %v2155_v26 = vmul.f32 %v2153_v31, %v329_v52  ;;  %v2161_v39 = vmul.f32 %v2159_v4, %v329_v52 }
 0x180   : > { %v2167_v1 = vmul.f32 %v2165_v27, %v329_v52  ;;  %v970_v53 = vmul.f32 %v969_v10, %v328_v42  ;;  %v5351_v19 = vadd.f32 %v971_v9, %v949_v50  ;;  %v976_v55 = vmul.f32 %v975_v59, %v328_v42  ;;  %v3558_v59 = vpop.permute.xlu0 %3557 }
 0x181   : > { %v5353_v6 = vadd.f32 %v977_v60, %v955_v15  ;;  %v982_v22 = vmul.f32 %v981_v35, %v328_v42  ;;  %v5359_v11 = vadd.f32 %v983_v58, %v961_v34  ;;  %v988_v63 = vmul.f32 %v987_v0, %v328_v42  ;;  %v7230_v15 = vld [vmem:[#allocation17_spill] sm:$0xff] }
 0x182   : > { %v5361_v20 = vadd.f32 %v989_v13, %v967_v24  ;;  %v2126_v14 = vadd.f32 %v2124_v33, %v5305_v38  ;;  %v2127_v41 = vadd.f32 %v2125_v40, %v5288_v46  ;;  %v2132_v21 = vadd.f32 %v2130_v23, %v5307_v29 }
 0x183   : > { %v2133_v3 = vadd.f32 %v2131_v56, %v5296_v5  ;;  %v2138_v61 = vadd.f32 %v2136_v12, %v5309_v57  ;;  %v2139_v48 = vadd.f32 %v2137_v37, %v5290_v17  ;;  %v2144_v45 = vadd.f32 %v2142_v47, %v5311_v16 }
 0x184   : > { %v2145_v51 = vadd.f32 %v2143_v36, %v5299_v49  ;;  %v5379_v62 = vadd.f32 %v970_v53, %v948_v43  ;;  %v5381_v38 = vadd.f32 %v976_v55, %v954_v18  ;;  %v2148_v46 = vmul.f32 %v2147_v30, %v328_v42 }
 0x185   : > { %v2154_v29 = vmul.f32 %v2153_v31, %v328_v42  ;;  %v2160_v5 = vmul.f32 %v2159_v4, %v328_v42  ;;  %v5383_v54 = vadd.f32 %v2161_v39, %v2139_v48  ;;  %v2166_v8 = vmul.f32 %v2165_v27, %v328_v42  ;;  %v7231_v42 = vld [vmem:[#allocation18_spill] sm:$0xff] }
 0x186   : > { %v5385_v57 = vadd.f32 %v2167_v1, %v2145_v51  ;;  %v5391_v17 = vadd.f32 %v982_v22, %v960_v25  ;;  %v5393_v49 = vadd.f32 %v988_v63, %v966_v28  ;;  %v2151_v16 = vadd.f32 %v2149_v44, %v2127_v41 }
 0x187   : > { %v2157_v10 = vadd.f32 %v2155_v26, %v2133_v3  ;;  %v5395_v35 = vadd.f32 %v2148_v46, %v2126_v14  ;;  %v5397_v0 = vadd.f32 %v2154_v29, %v2132_v21  ;;  %v5399_v7 = vadd.f32 %v2160_v5, %v2138_v61 }
 0x188   : > { %v5401_v33 = vadd.f32 %v2166_v8, %v2144_v45  ;;  %v993_v40 = vstv %s5343_s25  ;;  %v999_v23 = vstv %s5345_s0  ;;  %v1005_v56 = vstv %s5347_s17  ;;  %s5535_s25 = sld [smem:[#allocation2 + $0x3d]]  ;;  %s5541_s0 = sld [smem:[#allocation2 + $0xf0]] }
 0x189   : > { %v1011_v12 = vstv %s5349_s18  ;;  %v3560_v37 = vunpack.i.h.bf16 %v3558_v59  ;;  %v3559_v47 = vunpack.i.l.bf16 %v3558_v59  ;;  %v1017_v36 = vstv %s5363_s24  ;;  %s5543_s17 = sld [smem:[#allocation2 + $0x114]]  ;;  %s5557_s18 = sld [smem:[#allocation2 + $0x61]] }
 0x18a   : > { %v1023_v30 = vstv %s5365_s9  ;;  %v2171_v31 = vstv %s5355_s4  ;;  %v2177_v32 = vstv %s5357_s13  ;;  %v2183_v2 = vstv %s5371_s21  ;;  %s5559_s4 = sld [smem:[#allocation2 + $0x85]]  ;;  %s5594_s13 = sld [smem:[#allocation2 + $0x1a]] }
 0x18b   : > { %v2189_v4 = vstv %s5373_s16  ;;  %v337_v27 = vsel %vm189_vm2, 0.0, %v3560_v37  ;;  %v336_v50 = vsel %vm189_vm2, 0.0, %v3559_v47  ;;  %v5416_v52 = vmul.f32 %v7230_v15, %v1017_v36  ;;  %s5596_s24 = sld [smem:[#allocation2 + $0x3e]]  ;;  %s5603_s9 = sld [smem:[#allocation2 + $0xa9]] }
 0x18c   : > { %v5419_v34 = vmul.f32 %v7231_v42, %v1017_v36  ;;  %v995_v24 = vmul.f32 %v993_v40, %v337_v27  ;;  %v1001_v9 = vmul.f32 %v999_v23, %v337_v27  ;;  %v1007_v60 = vmul.f32 %v1005_v56, %v337_v27  ;;  %s5605_s21 = sld [smem:[#allocation2 + $0xcd]]  ;;  %s5607_s16 = sld [smem:[#allocation2 + $0xf1]] }
 0x18d   : > { %v5422_v58 = vmul.f32 %v7230_v15, %v1023_v30  ;;  %v1013_v13 = vmul.f32 %v1011_v12, %v337_v27  ;;  %v5429_v43 = vmul.f32 %v7231_v42, %v1023_v30  ;;  %v1029_v18 = vstv %s5387_s12  ;;  %s5609_s12 = sld [smem:[#allocation2 + $0x115]] }
 0x18e   : > { %v1035_v25 = vstv %s5389_s20  ;;  %v2173_v28 = vmul.f32 %v2171_v31, %v337_v27  ;;  %v2185_v44 = vmul.f32 %v2183_v2, %v337_v27  ;;  %v994_v26 = vmul.f32 %v993_v40, %v336_v50  ;;  %s5611_s20 = sld [smem:[#allocation2 + $0x62]] }
 0x18f   : > { %v1000_v39 = vmul.f32 %v999_v23, %v336_v50  ;;  %v2179_v1 = vmul.f32 %v2177_v32, %v337_v27  ;;  %v2191_v53 = vmul.f32 %v2189_v4, %v337_v27  ;;  %v1006_v55 = vmul.f32 %v1005_v56, %v336_v50  ;;  %v3563_v56 = vpop.permute.xlu1 %3562 }
 0x190   : > { %v1012_v22 = vmul.f32 %v1011_v12, %v336_v50  ;;  %v997_v63 = vadd.f32 %v995_v24, %v5351_v19  ;;  %v1003_v14 = vadd.f32 %v1001_v9, %v5353_v6  ;;  %v1009_v41 = vadd.f32 %v1007_v60, %v5359_v11 }
 0x191   : > { %v2172_v21 = vmul.f32 %v2171_v31, %v336_v50  ;;  %v996_v3 = vadd.f32 %v994_v26, %v5379_v62  ;;  %v1002_v61 = vadd.f32 %v1000_v39, %v5381_v38  ;;  %v1015_v48 = vadd.f32 %v1013_v13, %v5361_v20 }
 0x192   : > { %v2178_v45 = vmul.f32 %v2177_v32, %v336_v50  ;;  %v5451_v51 = vadd.f32 %v2173_v28, %v2151_v16  ;;  %v2184_v46 = vmul.f32 %v2183_v2, %v336_v50  ;;  %v5454_v29 = vadd.f32 %v2185_v44, %v5383_v54 }
 0x193   : > { %v2190_v5 = vmul.f32 %v2189_v4, %v336_v50  ;;  %v1008_v19 = vadd.f32 %v1006_v55, %v5391_v17  ;;  %v1014_v6 = vadd.f32 %v1012_v22, %v5393_v49  ;;  %v5462_v11 = vadd.f32 %v2179_v1, %v2157_v10 }
 0x194   : > { %v5465_v20 = vadd.f32 %v2191_v53, %v5385_v57  ;;  %v5472_v62 = vadd.f32 %v2172_v21, %v5395_v35  ;;  %v5475_v38 = vadd.f32 %v2178_v45, %v5397_v0  ;;  %v5478_v54 = vadd.f32 %v2184_v46, %v5399_v7 }
 0x195   : > { %v5481_v8 = vadd.f32 %v2190_v5, %v5401_v33  ;;  %v1030_v57 = vmul.f32 %v7230_v15, %v1029_v18  ;;  %v1031_v17 = vmul.f32 %v7231_v42, %v1029_v18  ;;  %v1036_v49 = vmul.f32 %v7230_v15, %v1035_v25 }
 0x196   : > { %v1037_v16 = vmul.f32 %v7231_v42, %v1035_v25  ;;  %v2195_v10 = vstv %s5433_s1  ;;  %v2201_v59 = vstv %s5435_s29  ;;  %v2207_v35 = vstv %s5437_s11  ;;  %s5628_s1 = sld [smem:[#allocation2 + $0xce]]  ;;  %s5637_s29 = sld [smem:[#allocation2 + $0xf2]] }
 0x197   : > { %v2213_v0 = vstv %s5439_s8  ;;  %v1041_v40 = vstv %s5424_s30  ;;  %v1047_v7 = vstv %s5426_s27  ;;  %v1053_v23 = vstv %s5441_s3  ;;  %s5613_s30 = sld [smem:[#allocation2 + $0x86]]  ;;  %s5626_s27 = sld [smem:[#allocation2 + $0xaa]] }
 0x198   : > { %v1059_v33 = vstv %s5443_s19  ;;  %v2196_v12 = vmul.f32 %v7230_v15, %v2195_v10  ;;  %v2197_v37 = vmul.f32 %v7231_v42, %v2195_v10  ;;  %v2202_v47 = vmul.f32 %v7230_v15, %v2201_v59  ;;  %s5639_s11 = sld [smem:[#allocation2 + $0x116]]  ;;  %s5683_s8 = sld [smem:[#allocation2 + $0x1b]] }
 0x199   : > { %v2203_v36 = vmul.f32 %v7231_v42, %v2201_v59  ;;  %v2208_v30 = vmul.f32 %v7230_v15, %v2207_v35  ;;  %v2209_v31 = vmul.f32 %v7231_v42, %v2207_v35  ;;  %v2214_v32 = vmul.f32 %v7230_v15, %v2213_v0  ;;  %s5685_s3 = sld [smem:[#allocation2 + $0x3f]]  ;;  %s5687_s19 = sld [smem:[#allocation2 + $0x63]] }
 0x19a   : > { %v2215_v2 = vmul.f32 %v7231_v42, %v2213_v0  ;;  %v2219_v4 = vstv %s5456_s22  ;;  %v2225_v27 = vstv %s5458_s23  ;;  %v3565_v50 = vunpack.i.h.bf16 %v3563_v56  ;;  %s5689_s22 = sld [smem:[#allocation2 + $0x87]]  ;;  %s5695_s23 = sld [smem:[#allocation2 + $0xab]] }
 0x19b   : > { %v3564_v24 = vunpack.i.l.bf16 %v3563_v56  ;;  %v2231_v9 = vstv %s5467_s14  ;;  %v2237_v60 = vstv %s5469_s26  ;;  %v1021_v13 = vadd.f32 %v5419_v34, %v997_v63  ;;  %s5697_s14 = sld [smem:[#allocation2 + $0xcf]]  ;;  %s5703_s26 = sld [smem:[#allocation2 + $0xf3]] }
 0x19c   : > { %v1027_v18 = vadd.f32 %v5429_v43, %v1003_v14  ;;  %v345_v25 = vsel %vm198_vm3, %v3565_v50, 0.0  ;;  %v1033_v44 = vadd.f32 %v1031_v17, %v1009_v41  ;;  %v1039_v26 = vadd.f32 %v1037_v16, %v1015_v48 }
 0x19d   : > { %v344_v28 = vsel %vm198_vm3, %v3564_v24, 0.0  ;;  %v1043_v39 = vmul.f32 %v1041_v40, %v345_v25  ;;  %v1049_v15 = vmul.f32 %v1047_v7, %v345_v25  ;;  %v1055_v1 = vmul.f32 %v1053_v23, %v345_v25 }
 0x19e   : > { %v1061_v42 = vmul.f32 %v1059_v33, %v345_v25  ;;  %v1020_v53 = vadd.f32 %v5416_v52, %v996_v3  ;;  %v1026_v55 = vadd.f32 %v5422_v58, %v1002_v61  ;;  %v1032_v22 = vadd.f32 %v1030_v57, %v1008_v19 }
 0x19f   : > { %v1038_v21 = vadd.f32 %v1036_v49, %v1014_v6  ;;  %v2221_v34 = vmul.f32 %v2219_v4, %v345_v25  ;;  %v2227_v43 = vmul.f32 %v2225_v27, %v345_v25  ;;  %v2233_v63 = vmul.f32 %v2231_v9, %v345_v25 }
 0x1a0   : > { %v2239_v14 = vmul.f32 %v2237_v60, %v345_v25  ;;  %v1042_v41 = vmul.f32 %v1041_v40, %v344_v28  ;;  %v5521_v48 = vadd.f32 %v1043_v39, %v1021_v13  ;;  %v1048_v52 = vmul.f32 %v1047_v7, %v344_v28  ;;  %v3568_v7 = vpop.permute.xlu0 %3567 }
 0x1a1   : > { %v5523_v3 = vadd.f32 %v1049_v15, %v1027_v18  ;;  %v1054_v58 = vmul.f32 %v1053_v23, %v344_v28  ;;  %v5529_v61 = vadd.f32 %v1055_v1, %v1033_v44  ;;  %v1060_v45 = vmul.f32 %v1059_v33, %v344_v28  ;;  %v7232_v18 = vld [vmem:[#allocation23_spill] sm:$0xff] }
 0x1a2   : > { %v5531_v46 = vadd.f32 %v1061_v42, %v1039_v26  ;;  %v2198_v5 = vadd.f32 %v2196_v12, %v5472_v62  ;;  %v2199_v19 = vadd.f32 %v2197_v37, %v5451_v51  ;;  %v2204_v6 = vadd.f32 %v2202_v47, %v5475_v38 }
 0x1a3   : > { %v2205_v57 = vadd.f32 %v2203_v36, %v5462_v11  ;;  %v2210_v17 = vadd.f32 %v2208_v30, %v5478_v54  ;;  %v2211_v49 = vadd.f32 %v2209_v31, %v5454_v29  ;;  %v2216_v16 = vadd.f32 %v2214_v32, %v5481_v8 }
 0x1a4   : > { %v2217_v10 = vadd.f32 %v2215_v2, %v5465_v20  ;;  %v5549_v59 = vadd.f32 %v1042_v41, %v1020_v53  ;;  %v5551_v62 = vadd.f32 %v1048_v52, %v1026_v55  ;;  %v2220_v51 = vmul.f32 %v2219_v4, %v344_v28 }
 0x1a5   : > { %v2226_v38 = vmul.f32 %v2225_v27, %v344_v28  ;;  %v2232_v11 = vmul.f32 %v2231_v9, %v344_v28  ;;  %v5553_v35 = vadd.f32 %v2233_v63, %v2211_v49  ;;  %v2238_v0 = vmul.f32 %v2237_v60, %v344_v28  ;;  %v7233_v28 = vld [vmem:[#allocation24_spill] sm:$0xff] }
 0x1a6   : > { %v5555_v54 = vadd.f32 %v2239_v14, %v2217_v10  ;;  %v5561_v29 = vadd.f32 %v1054_v58, %v1032_v22  ;;  %v5563_v20 = vadd.f32 %v1060_v45, %v1038_v21  ;;  %v2223_v8 = vadd.f32 %v2221_v34, %v2199_v19 }
 0x1a7   : > { %v2229_v40 = vadd.f32 %v2227_v43, %v2205_v57  ;;  %v5565_v23 = vadd.f32 %v2220_v51, %v2198_v5  ;;  %v5567_v33 = vadd.f32 %v2226_v38, %v2204_v6  ;;  %v5569_v56 = vadd.f32 %v2232_v11, %v2210_v17 }
 0x1a8   : > { %v5571_v12 = vadd.f32 %v2238_v0, %v2216_v16  ;;  %v1065_v37 = vstv %s5513_s5  ;;  %v1071_v47 = vstv %s5515_s2  ;;  %v1077_v36 = vstv %s5517_s28  ;;  %s5705_s5 = sld [smem:[#allocation2 + $0x1c]]  ;;  %s5711_s2 = sld [smem:[#allocation2 + $0x117]] }
 0x1a9   : > { %v1083_v30 = vstv %s5519_s6  ;;  %v3570_v31 = vunpack.i.h.bf16 %v3568_v7  ;;  %v3569_v32 = vunpack.i.l.bf16 %v3568_v7  ;;  %v1089_v2 = vstv %s5533_s10  ;;  %s5713_s28 = sld [smem:[#allocation2 + $0x64]]  ;;  %s5727_s6 = sld [smem:[#allocation2 + $0x1d]] }
 0x1aa   : > { %v1095_v4 = vstv %s5535_s25  ;;  %v2243_v27 = vstv %s5525_s15  ;;  %v2249_v50 = vstv %s5527_s7  ;;  %v2255_v24 = vstv %s5541_s0  ;;  %s5729_s15 = sld [smem:[#allocation2 + $0x41]]  ;;  %s5757_s7 = sld [smem:[#allocation2 + $0xac]] }
 0x1ab   : > { %v2261_v9 = vstv %s5543_s17  ;;  %v360_v60 = vsel %vm189_vm2, 0.0, %v3570_v31  ;;  %v359_v13 = vsel %vm189_vm2, 0.0, %v3569_v32  ;;  %v5586_v25 = vmul.f32 %v1089_v2, %v7232_v18  ;;  %s5759_s10 = sld [smem:[#allocation2 + $0xd0]]  ;;  %s5769_s25 = sld [smem:[#allocation2 + $0x65]] }
 0x1ac   : > { %v5589_v44 = vmul.f32 %v1089_v2, %v7233_v28  ;;  %v1067_v26 = vmul.f32 %v1065_v37, %v360_v60  ;;  %v1073_v39 = vmul.f32 %v1071_v47, %v360_v60  ;;  %v1079_v15 = vmul.f32 %v1077_v36, %v360_v60  ;;  %s5771_s0 = sld [smem:[#allocation2 + $0x89]]  ;;  %s5773_s17 = sld [smem:[#allocation2 + $0xf4]] }
 0x1ad   : > { %v5592_v1 = vmul.f32 %v1095_v4, %v7232_v18  ;;  %v1085_v42 = vmul.f32 %v1083_v30, %v360_v60  ;;  %v5599_v53 = vmul.f32 %v1095_v4, %v7233_v28  ;;  %v1101_v55 = vstv %s5557_s18  ;;  %s5775_s18 = sld [smem:[#allocation2 + $0x118]] }
 0x1ae   : > { %v1107_v22 = vstv %s5559_s4  ;;  %v2245_v21 = vmul.f32 %v2243_v27, %v360_v60  ;;  %v2257_v34 = vmul.f32 %v2255_v24, %v360_v60  ;;  %v1066_v43 = vmul.f32 %v1065_v37, %v359_v13  ;;  %s5777_s4 = sld [smem:[#allocation2 + $0xad]] }
 0x1af   : > { %v1072_v63 = vmul.f32 %v1071_v47, %v359_v13  ;;  %v2251_v14 = vmul.f32 %v2249_v50, %v360_v60  ;;  %v2263_v41 = vmul.f32 %v2261_v9, %v360_v60  ;;  %v1078_v52 = vmul.f32 %v1077_v36, %v359_v13  ;;  %v3573_v36 = vpop.permute.xlu1 %3572 }
 0x1b0   : > { %v1084_v58 = vmul.f32 %v1083_v30, %v359_v13  ;;  %v1069_v45 = vadd.f32 %v1067_v26, %v5521_v48  ;;  %v1075_v5 = vadd.f32 %v1073_v39, %v5523_v3  ;;  %v1081_v19 = vadd.f32 %v1079_v15, %v5529_v61 }
 0x1b1   : > { %v2244_v6 = vmul.f32 %v2243_v27, %v359_v13  ;;  %v1068_v57 = vadd.f32 %v1066_v43, %v5549_v59  ;;  %v1074_v17 = vadd.f32 %v1072_v63, %v5551_v62  ;;  %v1087_v49 = vadd.f32 %v1085_v42, %v5531_v46 }
 0x1b2   : > { %v2250_v16 = vmul.f32 %v2249_v50, %v359_v13  ;;  %v5621_v10 = vadd.f32 %v2245_v21, %v2223_v8  ;;  %v2256_v51 = vmul.f32 %v2255_v24, %v359_v13  ;;  %v5624_v38 = vadd.f32 %v2257_v34, %v5553_v35 }
 0x1b3   : > { %v2262_v11 = vmul.f32 %v2261_v9, %v359_v13  ;;  %v1080_v48 = vadd.f32 %v1078_v52, %v5561_v29  ;;  %v1086_v3 = vadd.f32 %v1084_v58, %v5563_v20  ;;  %v5632_v61 = vadd.f32 %v2251_v14, %v2229_v40 }
 0x1b4   : > { %v5635_v46 = vadd.f32 %v2263_v41, %v5555_v54  ;;  %v5642_v59 = vadd.f32 %v2244_v6, %v5565_v23  ;;  %v5645_v62 = vadd.f32 %v2250_v16, %v5567_v33  ;;  %v5648_v35 = vadd.f32 %v2256_v51, %v5569_v56 }
 0x1b5   : > { %v5651_v0 = vadd.f32 %v2262_v11, %v5571_v12  ;;  %v1102_v54 = vmul.f32 %v1101_v55, %v7232_v18  ;;  %v1103_v29 = vmul.f32 %v1101_v55, %v7233_v28  ;;  %v1108_v20 = vmul.f32 %v1107_v22, %v7232_v18 }
 0x1b6   : > { %v1109_v8 = vmul.f32 %v1107_v22, %v7233_v28  ;;  %v2267_v40 = vstv %s5603_s9  ;;  %v2273_v7 = vstv %s5605_s21  ;;  %v2279_v23 = vstv %s5607_s16  ;;  %s5795_s9 = sld [smem:[#allocation2 + $0x119]]  ;;  %s5831_s21 = sld [smem:[#allocation2 + $0x1e]] }
 0x1b7   : > { %v2285_v33 = vstv %s5609_s12  ;;  %v1113_v37 = vstv %s5594_s13  ;;  %v1119_v56 = vstv %s5596_s24  ;;  %v1125_v47 = vstv %s5611_s20  ;;  %s5779_s13 = sld [smem:[#allocation2 + $0xd1]]  ;;  %s5793_s24 = sld [smem:[#allocation2 + $0xf5]] }
 0x1b8   : > { %v1131_v12 = vstv %s5613_s30  ;;  %v2268_v30 = vmul.f32 %v2267_v40, %v7232_v18  ;;  %v2269_v31 = vmul.f32 %v2267_v40, %v7233_v28  ;;  %v2274_v32 = vmul.f32 %v2273_v7, %v7232_v18  ;;  %s5833_s16 = sld [smem:[#allocation2 + $0x42]]  ;;  %s5841_s12 = sld [smem:[#allocation2 + $0x66]] }
 0x1b9   : > { %v2275_v2 = vmul.f32 %v2273_v7, %v7233_v28  ;;  %v2280_v4 = vmul.f32 %v2279_v23, %v7232_v18  ;;  %v2281_v27 = vmul.f32 %v2279_v23, %v7233_v28  ;;  %v2286_v50 = vmul.f32 %v2285_v33, %v7232_v18  ;;  %s5843_s20 = sld [smem:[#allocation2 + $0x8a]]  ;;  %s5845_s30 = sld [smem:[#allocation2 + $0xae]] }
 0x1ba   : > { %v2287_v24 = vmul.f32 %v2285_v33, %v7233_v28  ;;  %v2291_v9 = vstv %s5626_s27  ;;  %v2297_v60 = vstv %s5628_s1  ;;  %v3575_v13 = vunpack.i.h.bf16 %v3573_v36  ;;  %s5847_s27 = sld [smem:[#allocation2 + $0xd2]]  ;;  %s5857_s1 = sld [smem:[#allocation2 + $0xf6]] }
 0x1bb   : > { %v3574_v26 = vunpack.i.l.bf16 %v3573_v36  ;;  %v2303_v39 = vstv %s5637_s29  ;;  %v2309_v15 = vstv %s5639_s11  ;;  %v1093_v42 = vadd.f32 %v5589_v44, %v1069_v45  ;;  %s5859_s29 = sld [smem:[#allocation2 + $0x11a]]  ;;  %s5863_s11 = sld [smem:[#allocation2 + $0x20]] }
 0x1bc   : > { %v1099_v55 = vadd.f32 %v5599_v53, %v1075_v5  ;;  %v368_v22 = vsel %vm198_vm3, %v3575_v13, 0.0  ;;  %v1105_v34 = vadd.f32 %v1103_v29, %v1081_v19  ;;  %v1111_v43 = vadd.f32 %v1109_v8, %v1087_v49 }
 0x1bd   : > { %v367_v21 = vsel %vm198_vm3, %v3574_v26, 0.0  ;;  %v1115_v63 = vmul.f32 %v1113_v37, %v368_v22  ;;  %v1121_v18 = vmul.f32 %v1119_v56, %v368_v22  ;;  %v1127_v14 = vmul.f32 %v1125_v47, %v368_v22 }
 0x1be   : > { %v1133_v28 = vmul.f32 %v1131_v12, %v368_v22  ;;  %v1092_v41 = vadd.f32 %v5586_v25, %v1068_v57  ;;  %v1098_v52 = vadd.f32 %v5592_v1, %v1074_v17  ;;  %v1104_v58 = vadd.f32 %v1102_v54, %v1080_v48 }
 0x1bf   : > { %v1110_v6 = vadd.f32 %v1108_v20, %v1086_v3  ;;  %v2293_v44 = vmul.f32 %v2291_v9, %v368_v22  ;;  %v2299_v53 = vmul.f32 %v2297_v60, %v368_v22  ;;  %v2305_v45 = vmul.f32 %v2303_v39, %v368_v22 }
 0x1c0   : > { %v2311_v5 = vmul.f32 %v2309_v15, %v368_v22  ;;  %v1114_v19 = vmul.f32 %v1113_v37, %v367_v21  ;;  %v5691_v49 = vadd.f32 %v1115_v63, %v1093_v42  ;;  %v1120_v25 = vmul.f32 %v1119_v56, %v367_v21  ;;  %v3578_v56 = vpop.permute.xlu0 %3577 }
 0x1c1   : > { %v5693_v57 = vadd.f32 %v1121_v18, %v1099_v55  ;;  %v1126_v1 = vmul.f32 %v1125_v47, %v367_v21  ;;  %v5699_v17 = vadd.f32 %v1127_v14, %v1105_v34  ;;  %v1132_v16 = vmul.f32 %v1131_v12, %v367_v21  ;;  %v7234_v55 = vld [vmem:[#allocation26_spill] sm:$0xff] }
 0x1c2   : > { %v5701_v51 = vadd.f32 %v1133_v28, %v1111_v43  ;;  %v2270_v11 = vadd.f32 %v2268_v30, %v5642_v59  ;;  %v2271_v48 = vadd.f32 %v2269_v31, %v5621_v10  ;;  %v2276_v3 = vadd.f32 %v2274_v32, %v5645_v62 }
 0x1c3   : > { %v2277_v54 = vadd.f32 %v2275_v2, %v5632_v61  ;;  %v2282_v29 = vadd.f32 %v2280_v4, %v5648_v35  ;;  %v2283_v20 = vadd.f32 %v2281_v27, %v5624_v38  ;;  %v2288_v8 = vadd.f32 %v2286_v50, %v5651_v0 }
 0x1c4   : > { %v2289_v40 = vadd.f32 %v2287_v24, %v5635_v46  ;;  %v5719_v7 = vadd.f32 %v1114_v19, %v1092_v41  ;;  %v5721_v59 = vadd.f32 %v1120_v25, %v1098_v52  ;;  %v2292_v10 = vmul.f32 %v2291_v9, %v367_v21 }
 0x1c5   : > { %v2298_v62 = vmul.f32 %v2297_v60, %v367_v21  ;;  %v2304_v61 = vmul.f32 %v2303_v39, %v367_v21  ;;  %v5723_v23 = vadd.f32 %v2305_v45, %v2283_v20  ;;  %v2310_v33 = vmul.f32 %v2309_v15, %v367_v21  ;;  %v7235_v21 = vld [vmem:[#allocation25_spill] sm:$0xff] }
 0x1c6   : > { %v5725_v35 = vadd.f32 %v2311_v5, %v2289_v40  ;;  %v5731_v38 = vadd.f32 %v1126_v1, %v1104_v58  ;;  %v5733_v46 = vadd.f32 %v1132_v16, %v1110_v6  ;;  %v2295_v0 = vadd.f32 %v2293_v44, %v2271_v48 }
 0x1c7   : > { %v2301_v37 = vadd.f32 %v2299_v53, %v2277_v54  ;;  %v5735_v47 = vadd.f32 %v2292_v10, %v2270_v11  ;;  %v5737_v12 = vadd.f32 %v2298_v62, %v2276_v3  ;;  %v2306_v36 = vadd.f32 %v2304_v61, %v2282_v29 }
 0x1c8   : > { %v2312_v30 = vadd.f32 %v2310_v33, %v2288_v8  ;;  %v1137_v31 = vstv %s5683_s8  ;;  %v1143_v32 = vstv %s5685_s3  ;;  %v1149_v2 = vstv %s5687_s19  ;;  %s5865_s8 = sld [smem:[#allocation2 + $0x68]]  ;;  %s5869_s19 = sld [smem:[#allocation2 + $0xd4]] }
 0x1c9   : > { %v1155_v4 = vstv %s5689_s22  ;;  %v2315_v27 = vstv %s5695_s23  ;;  %v3580_v50 = vunpack.i.h.bf16 %v3578_v56  ;;  %v3579_v24 = vunpack.i.l.bf16 %v3578_v56  ;;  %s5867_s3 = sld [smem:[#allocation2 + $0xb0]]  ;;  %s5875_s23 = sld [smem:[#allocation2 + $0x11c]] }
 0x1ca   : > { %v1161_v9 = vstv %s5705_s5  ;;  %v2321_v60 = vstv %s5697_s14  ;;  %v2327_v13 = vstv %s5703_s26  ;;  %v2333_v26 = vstv %s5711_s2  ;;  %s5873_s22 = sld [smem:[#allocation2 + $0xf8]]  ;;  %s5891_s14 = sld [smem:[#allocation2 + $0x21]] }
 0x1cb   : > { %v1173_v39 = vstv %s5713_s28  ;;  %v385_v15 = vsel %vm189_vm2, 0.0, %v3580_v50  ;;  %v384_v42 = vsel %vm189_vm2, 0.0, %v3579_v24  ;;  %v5752_v22 = vmul.f32 %v1161_v9, %v7234_v55  ;;  %s5893_s26 = sld [smem:[#allocation2 + $0x69]]  ;;  %s5899_s2 = sld [smem:[#allocation2 + $0xd5]] }
 0x1cc   : > { %v5755_v34 = vmul.f32 %v1161_v9, %v7235_v21  ;;  %v1139_v43 = vmul.f32 %v1137_v31, %v385_v15  ;;  %v1145_v63 = vmul.f32 %v1143_v32, %v385_v15  ;;  %v1151_v18 = vmul.f32 %v1149_v2, %v385_v15  ;;  %s5897_s5 = sld [smem:[#allocation2 + $0xb1]] }
 0x1cd   : > { %v1157_v14 = vmul.f32 %v1155_v4, %v385_v15  ;;  %v5762_v28 = vmul.f32 %v1173_v39, %v7234_v55  ;;  %v5765_v41 = vmul.f32 %v1173_v39, %v7235_v21  ;;  %v1185_v52 = vstv %s5727_s6  ;;  %s5919_s28 = sld [smem:[#allocation2 + $0xf9]]  ;;  %s5921_s6 = sld [smem:[#allocation2 + $0x11d]] }
 0x1ce   : > { %v1191_v58 = vstv %s5729_s15  ;;  %v2317_v6 = vmul.f32 %v2315_v27, %v385_v15  ;;  %v2329_v44 = vmul.f32 %v2327_v13, %v385_v15  ;;  %v1138_v53 = vmul.f32 %v1137_v31, %v384_v42  ;;  %s5961_s15 = sld [smem:[#allocation2 + $0x40]] }
 0x1cf   : > { %v1144_v45 = vmul.f32 %v1143_v32, %v384_v42  ;;  %v2323_v5 = vmul.f32 %v2321_v60, %v385_v15  ;;  %v2335_v19 = vmul.f32 %v2333_v26, %v385_v15  ;;  %v1150_v25 = vmul.f32 %v1149_v2, %v384_v42 }
 0x1d0   : > { %v1156_v1 = vmul.f32 %v1155_v4, %v384_v42  ;;  %v1141_v16 = vadd.f32 %v1139_v43, %v5691_v49  ;;  %v5783_v11 = vadd.f32 %v1145_v63, %v5693_v57  ;;  %v1153_v48 = vadd.f32 %v1151_v18, %v5699_v17 }
 0x1d1   : > { %v5787_v3 = vadd.f32 %v1157_v14, %v5701_v51  ;;  %v1140_v54 = vadd.f32 %v1138_v53, %v5719_v7  ;;  %v5791_v29 = vadd.f32 %v1144_v45, %v5721_v59  ;;  %v2316_v20 = vmul.f32 %v2315_v27, %v384_v42 }
 0x1d2   : > { %v2322_v8 = vmul.f32 %v2321_v60, %v384_v42  ;;  %v2319_v49 = vadd.f32 %v2317_v6, %v2295_v0  ;;  %v2328_v57 = vmul.f32 %v2327_v13, %v384_v42  ;;  %v2331_v17 = vadd.f32 %v2329_v44, %v5723_v23 }
 0x1d3   : > { %v2334_v51 = vmul.f32 %v2333_v26, %v384_v42  ;;  %v1152_v40 = vadd.f32 %v1150_v25, %v5731_v38  ;;  %v5800_v7 = vadd.f32 %v1156_v1, %v5733_v46  ;;  %v2325_v59 = vadd.f32 %v2323_v5, %v2301_v37  ;;  %v3583_v38 = vpop.permute.xlu1 %3582 }
 0x1d4   : > { %v2337_v10 = vadd.f32 %v2335_v19, %v5725_v35  ;;  %v2330_v62 = vadd.f32 %v2328_v57, %v2306_v36  ;;  %v2339_v33 = vstv %s5757_s7  ;;  %v2345_v0 = vstv %s5759_s10  ;;  %s5979_s7 = sld [smem:[#allocation2 + $0x43]]  ;;  %s5981_s10 = sld [smem:[#allocation2 + $0x44]] }
 0x1d5   : > { %v2336_v61 = vadd.f32 %v2334_v51, %v2312_v30  ;;  %v2318_v56 = vadd.f32 %v2316_v20, %v5735_v47  ;;  %v2324_v23 = vadd.f32 %v2322_v8, %v5737_v12  ;;  %v1197_v31 = vstv %s5769_s25  ;;  %s5989_s25 = sld [smem:[#allocation2 + $0x45]] }
 0x1d6   : > { %v1203_v32 = vstv %s5771_s0  ;;  %v2340_v46 = vmul.f32 %v2339_v33, %v7234_v55  ;;  %v2341_v37 = vmul.f32 %v2339_v33, %v7235_v21  ;;  %v2351_v35 = vstv %s5773_s17  ;;  %s6013_s0 = sld [smem:[#allocation2 + $0x46]]  ;;  %s6045_s17 = sld [smem:[#allocation2 + $0x47]] }
 0x1d7   : > { %v2357_v2 = vstv %s5775_s18  ;;  %v2346_v36 = vmul.f32 %v2345_v0, %v7234_v55  ;;  %v2347_v30 = vmul.f32 %v2345_v0, %v7235_v21  ;;  %v2363_v4 = vstv %s5777_s4  ;;  %v3588_v0 = vpop.permute.xlu0 %3587  ;;  %s6058_s18 = sld [smem:[#allocation2 + $0x88]]  ;;  %s6065_s4 = sld [smem:[#allocation2 + $0x8b]] }
 0x1d8   : > { %v2369_v47 = vstv %s5779_s13  ;;  %v2352_v12 = vmul.f32 %v2351_v35, %v7234_v55  ;;  %v2353_v27 = vmul.f32 %v2351_v35, %v7235_v21  ;;  %v3585_v50 = vunpack.i.h.bf16 %v3583_v38  ;;  %s6067_s13 = sld [smem:[#allocation2 + $0x8c]] }
 0x1d9   : > { %v3584_v24 = vunpack.i.l.bf16 %v3583_v38  ;;  %v2358_v9 = vmul.f32 %v2357_v2, %v7234_v55  ;;  %v2359_v60 = vmul.f32 %v2357_v2, %v7235_v21  ;;  %v2375_v13 = vstv %s5793_s24  ;;  %s6075_s24 = sld [smem:[#allocation2 + $0x8d]] }
 0x1da   : > { %v2381_v26 = vstv %s5795_s9  ;;  %v393_v39 = vsel %vm198_vm3, %v3585_v50, 0.0  ;;  %v1164_v15 = vadd.f32 %v5752_v22, %v1140_v54  ;;  %v1165_v42 = vadd.f32 %v5755_v34, %v1141_v16  ;;  %s6092_s9 = sld [smem:[#allocation2 + $0x8e]] }
 0x1db   : > { %v1176_v43 = vadd.f32 %v5762_v28, %v1152_v40  ;;  %v1187_v63 = vmul.f32 %v1185_v52, %v393_v39  ;;  %v1199_v18 = vmul.f32 %v1197_v31, %v393_v39  ;;  %v392_v14 = vsel %vm198_vm3, %v3584_v24, 0.0 }
 0x1dc   : > { %v1177_v6 = vadd.f32 %v5765_v41, %v1153_v48  ;;  %v5837_v44 = vmul.f32 %v1191_v58, %v393_v39  ;;  %v5839_v22 = vmul.f32 %v1203_v32, %v393_v39  ;;  %v2342_v34 = vadd.f32 %v2340_v46, %v2318_v56 }
 0x1dd   : > { %v2343_v28 = vadd.f32 %v2341_v37, %v2319_v49  ;;  %v2365_v53 = vmul.f32 %v2363_v4, %v393_v39  ;;  %v2371_v45 = vmul.f32 %v2369_v47, %v393_v39  ;;  %v2377_v5 = vmul.f32 %v2375_v13, %v393_v39 }
 0x1de   : > { %v2383_v41 = vmul.f32 %v2381_v26, %v393_v39  ;;  %v1186_v19 = vmul.f32 %v1185_v52, %v392_v14  ;;  %v5851_v25 = vadd.f32 %v1187_v63, %v1165_v42  ;;  %v5855_v1 = vmul.f32 %v1191_v58, %v392_v14 }
 0x1df   : > { %v1198_v16 = vmul.f32 %v1197_v31, %v392_v14  ;;  %v5861_v48 = vadd.f32 %v1199_v18, %v1177_v6  ;;  %v2349_v54 = vadd.f32 %v2347_v30, %v2325_v59  ;;  %v2354_v20 = vadd.f32 %v2352_v12, %v2330_v62 }
 0x1e0   : > { %v2355_v8 = vadd.f32 %v2353_v27, %v2331_v17  ;;  %v2348_v52 = vadd.f32 %v2346_v36, %v2324_v23  ;;  %v2360_v49 = vadd.f32 %v2358_v9, %v2336_v61  ;;  %v2361_v57 = vadd.f32 %v2359_v60, %v2337_v10 }
 0x1e1   : > { %v2364_v51 = vmul.f32 %v2363_v4, %v392_v14  ;;  %v5871_v58 = vmul.f32 %v1203_v32, %v392_v14  ;;  %v2370_v40 = vmul.f32 %v2369_v47, %v392_v14  ;;  %v2376_v33 = vmul.f32 %v2375_v13, %v392_v14 }
 0x1e2   : > { %v2379_v59 = vadd.f32 %v2377_v5, %v2355_v8  ;;  %v1188_v17 = vadd.f32 %v1186_v19, %v1164_v15  ;;  %v1200_v10 = vadd.f32 %v1198_v16, %v1176_v43  ;;  %v2382_v62 = vmul.f32 %v2381_v26, %v392_v14  ;;  %v3593_v16 = vpop.permute.xlu1 %3592 }
 0x1e3   : > { %v2385_v61 = vadd.f32 %v2383_v41, %v2361_v57  ;;  %v2366_v56 = vadd.f32 %v2364_v51, %v2342_v34  ;;  %v2367_v23 = vadd.f32 %v2365_v53, %v2343_v28  ;;  %v2373_v31 = vadd.f32 %v2371_v45, %v2349_v54 }
 0x1e4   : > { %v2378_v32 = vadd.f32 %v2376_v33, %v2354_v20  ;;  %v2372_v38 = vadd.f32 %v2370_v40, %v2348_v52  ;;  %v2384_v46 = vadd.f32 %v2382_v62, %v2360_v49  ;;  %v1209_v37 = vstv %s5831_s21  ;;  %s6103_s21 = sld [smem:[#allocation2 + $0x8f]] }
 0x1e5   : > { %v1215_v35 = vstv %s5833_s16  ;;  %v1221_v2 = vstv %s5841_s12  ;;  %v1227_v36 = vstv %s5843_s20  ;;  %v3590_v30 = vunpack.i.h.bf16 %v3588_v0  ;;  %s6117_s16 = sld [smem:[#allocation2 + $0x1f]]  ;;  %s6132_s12 = sld [smem:[#allocation2 + $0x22]] }
 0x1e6   : > { %v3589_v4 = vunpack.i.l.bf16 %v3588_v0  ;;  %v2387_v47 = vstv %s5845_s30  ;;  %v2393_v12 = vstv %s5847_s27  ;;  %v2399_v27 = vstv %s5857_s1  ;;  %s6134_s20 = sld [smem:[#allocation2 + $0x23]]  ;;  %s6146_s30 = sld [smem:[#allocation2 + $0x67]] }
 0x1e7   : > { %v2405_v50 = vstv %s5859_s29  ;;  %v401_v24 = vsel %vm189_vm2, 0.0, %v3590_v30  ;;  %v1257_v60 = vstv %s5863_s11  ;;  %v1269_v13 = vstv %s5865_s8  ;;  %s6157_s27 = sld [smem:[#allocation2 + $0x6a]]  ;;  %s6159_s1 = sld [smem:[#allocation2 + $0x6b]] }
 0x1e8   : > { %v400_v9 = vsel %vm189_vm2, 0.0, %v3589_v4  ;;  %v1211_v26 = vmul.f32 %v1209_v37, %v401_v24  ;;  %v1223_v39 = vmul.f32 %v1221_v2, %v401_v24  ;;  %v2435_v15 = vstv %s5867_s3  ;;  %s6164_s29 = sld [smem:[#allocation2 + $0xd3]]  ;;  %s6192_s11 = sld [smem:[#allocation2 + $0xaf]] }
 0x1e9   : > { %v2441_v42 = vstv %s5869_s19  ;;  %v2389_v43 = vmul.f32 %v2387_v47, %v401_v24  ;;  %v2401_v63 = vmul.f32 %v2399_v27, %v401_v24  ;;  %v2447_v18 = vstv %s5873_s22  ;;  %s6196_s8 = sld [smem:[#allocation2 + $0xd6]]  ;;  %s6198_s3 = sld [smem:[#allocation2 + $0xd7]] }
 0x1ea   : > { %v2453_v14 = vstv %s5875_s23  ;;  %v5901_v6 = vmul.f32 %v1215_v35, %v401_v24  ;;  %v5903_v34 = vmul.f32 %v1227_v36, %v401_v24  ;;  %v2407_v28 = vmul.f32 %v2405_v50, %v401_v24  ;;  %s6205_s19 = sld [smem:[#allocation2 + $0xb2]]  ;;  %s6224_s22 = sld [smem:[#allocation2 + $0x11b]] }
 0x1eb   : > { %v1210_v53 = vmul.f32 %v1209_v37, %v400_v9  ;;  %v2395_v45 = vmul.f32 %v2393_v12, %v401_v24  ;;  %v5906_v5 = vadd.f32 %v1211_v26, %v5851_v25  ;;  %v5908_v41 = vmul.f32 %v1215_v35, %v400_v9  ;;  %s6229_s23 = sld [smem:[#allocation2 + $0xb3]] }
 0x1ec   : > { %v1222_v19 = vmul.f32 %v1221_v2, %v400_v9  ;;  %v5911_v54 = vadd.f32 %v1223_v39, %v5861_v48  ;;  %v5913_v20 = vmul.f32 %v1227_v36, %v400_v9  ;;  %v2388_v8 = vmul.f32 %v2387_v47, %v400_v9  ;;  %v3603_v47 = vpop.permute.xlu1 %3602 }
 0x1ed   : > { %v2394_v52 = vmul.f32 %v2393_v12, %v400_v9  ;;  %v5915_v49 = vadd.f32 %v2389_v43, %v2367_v23  ;;  %v2400_v57 = vmul.f32 %v2399_v27, %v400_v9  ;;  %v5917_v51 = vadd.f32 %v2401_v63, %v2379_v59 }
 0x1ee   : > { %v2406_v40 = vmul.f32 %v2405_v50, %v400_v9  ;;  %v5923_v25 = vadd.f32 %v1210_v53, %v1188_v17  ;;  %v5925_v48 = vadd.f32 %v2407_v28, %v2385_v61  ;;  %v3595_v33 = vunpack.i.h.bf16 %v3593_v16 }
 0x1ef   : > { %7236 = vst [vmem:[#allocation89_spill] sm:$0xff] %v5915_v49  ;;  %7237 = vst [vmem:[#allocation78_spill] sm:$0xff] %v5917_v51  ;;  %v3594_v62 = vunpack.i.l.bf16 %v3593_v16  ;;  %v5927_v0 = vadd.f32 %v1222_v19, %v1200_v10  ;;  %v5929_v23 = vadd.f32 %v2395_v45, %v2373_v31  ;;  %v5931_v59 = vadd.f32 %v2400_v57, %v2378_v32  ;;  %v3598_v32 = vpop.permute.xlu0 %3597  ;;  %v7254_v51 = vld [vmem:[#allocation22_spill] sm:$0xff] }
 0x1f0   : > { %7238 = vst [vmem:[#allocation189_spill] sm:$0xff] %v5925_v48  ;;  %v5933_v37 = vadd.f32 %v2406_v40, %v2384_v46  ;;  %v5935_v35 = vadd.f32 %v2388_v8, %v2366_v56  ;;  %v5937_v2 = vadd.f32 %v2394_v52, %v2372_v38  ;;  %v5940_v17 = vsel %vm198_vm3, %v3595_v33, 0.0 }
 0x1f1   : > { %7239 = vst [vmem:[#allocation90_spill] sm:$0xff] %v5931_v59  ;;  %v5943_v61 = vsel %vm198_vm3, %v3594_v62, 0.0  ;;  %v1281_v10 = vstv %s5891_s14  ;;  %v1293_v36 = vstv %s5893_s26  ;;  %v2459_v31 = vstv %s5897_s5  ;;  %s6231_s14 = sld [smem:[#allocation2 + $0x11e]]  ;;  %s6253_s26 = sld [smem:[#allocation2 + $0x11f]] }
 0x1f2   : > { %7240 = vst [vmem:[#allocation79_spill] sm:$0xff] %v5933_v37  ;;  %7241 = vst [vmem:[#allocation190_spill] sm:$0xff] %v5935_v35  ;;  %v2465_v30 = vstv %s5899_s2  ;;  %v5950_v46 = vmul.f32 %v1257_v60, %v5940_v17  ;;  %v5953_v56 = vmul.f32 %v1269_v13, %v5940_v17  ;;  %v5956_v38 = vmul.f32 %v2435_v15, %v5940_v17  ;;  %s6262_s5 = sld [smem:[#allocation2 + $0xf7]]  ;;  %s6270_s2 = sld [smem:[#allocation2 + $0xfa]] }
 0x1f3   : > { %v5959_v4 = vmul.f32 %v2441_v42, %v5940_v17  ;;  %v5966_v12 = vmul.f32 %v2447_v18, %v5940_v17  ;;  %v5971_v27 = vmul.f32 %v2453_v14, %v5940_v17  ;;  %v5974_v50 = vmul.f32 %v1257_v60, %v5943_v61 }
 0x1f4   : > { %7242 = vst [vmem:[#allocation92_spill] sm:$0xff] %v5956_v38  ;;  %v5977_v24 = vmul.f32 %v1269_v13, %v5943_v61  ;;  %v5984_v9 = vmul.f32 %v2435_v15, %v5943_v61  ;;  %v5987_v26 = vmul.f32 %v2441_v42, %v5943_v61  ;;  %v3600_v39 = vunpack.i.h.bf16 %v3598_v32 }
 0x1f5   : > { %7243 = vst [vmem:[#allocation83_spill] sm:$0xff] %v5966_v12  ;;  %7244 = vst [vmem:[#allocation93_spill] sm:$0xff] %v5971_v27  ;;  %v3599_v43 = vunpack.i.l.bf16 %v3598_v32  ;;  %v6626_v60 = vstv %s5919_s28  ;;  %v6627_v63 = vstv %s5921_s6  ;;  %v3605_v13 = vunpack.i.h.bf16 %v3603_v47  ;;  %v7253_v12 = vld [vmem:[#allocation21_spill] sm:$0xff] }
 0x1f6   : > { %7245 = vst [vmem:[#allocation84_spill] sm:$0xff] %v5984_v9  ;;  %v5994_v28 = vsel %vm189_vm2, 0.0, %v3600_v39  ;;  %v6628_v45 = vmov 0.0   ;;  %v433_v15 = vlaneseq  ;;  %v6004_v42 = vmul.f32 %v2447_v18, %v5943_v61 }
 0x1f7   : > { %v5997_v53 = vsel %vm189_vm2, 0.0, %v3599_v43  ;;  %3333 = vmatprep.subr.bf16.mxu0 %v6628_v45  ;;  %3345 = vmatprep.subr.bf16.mxu1 %v6628_v45  ;;  %v6009_v19 = vmul.f32 %v2453_v14, %v5943_v61  ;;  %v3604_v16 = vunpack.i.l.bf16 %v3603_v47  ;;  %v6016_v8 = vmul.f32 %v1281_v10, %v5994_v28 }
 0x1f8   : > { %7246 = vst [vmem:[#allocation94_spill] sm:$0xff] %v6004_v42  ;;  %3335 = vmatprep.mubr.msk.bf16.mxu0 %vm3693_vm4, %v6628_v45  ;;  %v6019_v52 = vmul.f32 %v1293_v36, %v5994_v28  ;;  %v6022_v18 = vmul.f32 %v2459_v31, %v5994_v28  ;;  %v6025_v14 = vmul.f32 %v2465_v30, %v5994_v28  ;;  %v6054_v39 = vsel %vm198_vm3, %v3605_v13, 0.0 }
 0x1f9   : > { %7247 = vst [vmem:[#allocation87_spill] sm:$0xff] %v6009_v19  ;;  %3347 = vmatprep.mubr.msk.bf16.mxu1 %vm3693_vm4, %v6628_v45  ;;  %v6032_v57 = vmul.f32 %v6626_v60, %v5994_v28  ;;  %v6037_v40 = vmul.f32 %v6627_v63, %v5994_v28  ;;  %v6040_v33 = vmul.f32 %v1281_v10, %v5997_v53  ;;  %v6056_v43 = vshrl.u32 %v433_v15, 7 }
 0x1fa   : > { %7248 = vst [vmem:[#allocation95_spill] sm:$0xff] %v6022_v18  ;;  %7249 = vst [vmem:[#allocation88_spill] sm:$0xff] %v6025_v14  ;;  %v6043_v62 = vmul.f32 %v1293_v36, %v5997_v53  ;;  %v6048_v32 = vmul.f32 %v2459_v31, %v5997_v53  ;;  %v6051_v47 = vmul.f32 %v2465_v30, %v5997_v53  ;;  %v6060_v10 = vand.u32 127, %v433_v15 }
 0x1fb   : > { %7250 = vst [vmem:[#allocation107_spill] sm:$0xff] %v6032_v57  ;;  %7251 = vst [vmem:[#allocation101_spill] sm:$0xff] %v6037_v40  ;;  %v1167_v36 = vstv %s5961_s15  ;;  %v1239_v60 = vstv %s5979_s7  ;;  %v1263_v63 = vstv %s5981_s10  ;;  %v6070_v31 = vadd.s32 8, %v6056_v43  ;;  %s6280_s15 = sld [smem:[#allocation2 + $0xfb]] }
 0x1fc   : > { %7252 = vst [vmem:[#allocation108_spill] sm:$0xff] %v6048_v32  ;;  %v6630_v30 = vmul.u32 2, %v6056_v43  ;;  %v1168_v13 = vmul.f32 %v1167_v36, %v7234_v55  ;;  %v1287_v45 = vstv %s5989_s25  ;;  %v6078_v15 = vsel %vm198_vm3, %v3604_v16, 0.0  ;;  %s7289_s25 = sld [smem:[#allocation12_spill]] }
 0x1fd   : > { %v1169_v57 = vmul.f32 %v1167_v36, %v7235_v21  ;;  %v1240_v42 = vmul.f32 %v7253_v12, %v1239_v60  ;;  %v1241_v59 = vmul.f32 %v7254_v51, %v1239_v60  ;;  %v6631_v40 = vmul.u32 2, %v6070_v31 }
 0x1fe   : > { %v447_v27 = vadd.s32 1, %v6630_v30  ;;  %v1170_v19 = vadd.f32 %v1168_v13, %v5791_v29  ;;  %v1264_v48 = vmul.f32 %v1263_v63, %v5943_v61  ;;  %v1265_v16 = vmul.f32 %v1263_v63, %v5940_v17  ;;  %v7255_v63 = vld [vmem:[#allocation31_spill] sm:$0xff]  ;;  %v7256_v30 = vld [vmem:[#allocation32_spill] sm:$0xff] }
 0x1ff   : > { %v1171_v37 = vadd.f32 %v1169_v57, %v5783_v11  ;;  %v1288_v36 = vmul.f32 %v1287_v45, %v5997_v53  ;;  %v1311_v18 = vstv %s6013_s0  ;;  %v448_v60 = vadd.s32 1, %v6631_v40 }
 0x200   : > { %vm449_vm5 = vcmp.eq.s32.totalorder %v6060_v10, %v447_v27  ;;  %v1194_v29 = vadd.f32 %v5855_v1, %v1170_v19  ;;  %v1289_v13 = vmul.f32 %v1287_v45, %v5994_v28  ;;  %v1312_v57 = vmul.f32 %v1311_v18, %v7255_v63 }
 0x201   : > { %v1195_v11 = vadd.f32 %v5837_v44, %v1171_v37  ;;  %v1313_v32 = vmul.f32 %v1311_v18, %v7256_v30  ;;  %v1335_v38 = vstv %s6045_s17  ;;  %vm450_vm6 = vcmp.eq.s32.totalorder %v6060_v10, %v448_v60 }
 0x202   : > { %v1218_v40 = vadd.f32 %v5908_v41, %v1194_v29  ;;  %v1336_v27 = vmul.f32 %v1335_v38, %v6078_v15  ;;  %v1337_v1 = vmul.f32 %v1335_v38, %v6054_v39  ;;  %vm6109_vm7 = vmpackc.low %vm450_vm6, %vm449_vm5  ;;  %v1179_v37 = vstv %s6058_s18  ;;  %s3285_s0 = sshll.u32 %s7289_s25, 9 }
 0x203   : > { %v1219_v44 = vadd.f32 %v5901_v6, %v1195_v11  ;;  %v1251_v19 = vstv %s6065_s4  ;;  %v1275_v18 = vstv %s6067_s13  ;;  %v6632_v9 = vmov 1.0|1.0  }
 0x204   : > { %3334 = vmatpush3.bf16.msk.msra.mxu0 %vm6109_vm7, %v6632_v9  ;;  %3346 = vmatpush3.bf16.msk.msra.mxu1 %vm6109_vm7, %v6632_v9  ;;  %v1242_v41 = vadd.f32 %v1240_v42, %v1218_v40  ;;  %v1180_v38 = vmul.f32 %v1179_v37, %v7234_v55  ;;  %v1181_v60 = vmul.f32 %v1179_v37, %v7235_v21  ;;  %v1299_v6 = vstv %s6075_s24  ;;  %s7291_s24 = sld [smem:[#allocation193_spill]] }
 0x205   : > { %v1243_v29 = vadd.f32 %v1241_v59, %v1219_v44  ;;  %v1252_v11 = vmul.f32 %v7253_v12, %v1251_v19  ;;  %v1253_v49 = vmul.f32 %v7254_v51, %v1251_v19  ;;  %v1276_v35 = vmul.f32 %v1275_v18, %v5943_v61 }
 0x206   : > { %v7259_v14 = vmov 0.0   ;;  %v1266_v42 = vadd.f32 %v1264_v48, %v1242_v41  ;;  %v1182_v55 = vadd.f32 %v1180_v38, %v5800_v7  ;;  %v1183_v21 = vadd.f32 %v1181_v60, %v5787_v3 }
 0x207   : > { %3351 = vmatprep.subr.bf16.mxu1 %v7259_v14  ;;  %v1277_v59 = vmul.f32 %v1275_v18, %v5940_v17  ;;  %3339 = vmatprep.subr.bf16.mxu0 %v7259_v14  ;;  %v1267_v40 = vadd.f32 %v1265_v16, %v1243_v29  ;;  %v1300_v61 = vmul.f32 %v1299_v6, %v5997_v53  ;;  %v1323_v37 = vstv %s6092_s9 }
 0x208   : > { %v1301_v44 = vmul.f32 %v1299_v6, %v5994_v28  ;;  %v1290_v19 = vadd.f32 %v1288_v36, %v1266_v42  ;;  %v1206_v9 = vadd.f32 %v5871_v58, %v1182_v55  ;;  %v1207_v48 = vadd.f32 %v5839_v22, %v1183_v21 }
 0x209   : > { %v1324_v41 = vmul.f32 %v1323_v37, %v7255_v63  ;;  %v1291_v3 = vadd.f32 %v1289_v13, %v1267_v40  ;;  %v1325_v7 = vmul.f32 %v1323_v37, %v7256_v30  ;;  %v1347_v17 = vstv %s6103_s21 }
 0x20a   : > { %v7260_v16 = vmul.u32 2, %v6056_v43  ;;  %v1314_v22 = vadd.f32 %v1312_v57, %v1290_v19  ;;  %v1230_v58 = vadd.f32 %v5913_v20, %v1206_v9  ;;  %v1231_v36 = vadd.f32 %v5903_v34, %v1207_v48  ;;  %s6389_s9 = scalar_lea.hbm %s7291_s24, %s3285_s0 }
 0x20b   : > { %v1348_v13 = vmul.f32 %v1347_v17, %v6078_v15  ;;  %v1315_v18 = vadd.f32 %v1313_v32, %v1291_v3  ;;  %v1349_v38 = vmul.f32 %v1347_v17, %v6054_v39  ;;  %v7263_v60 = vmul.u32 2, %v6070_v31 }
 0x20c   : > { %vm6153_vm9 = vcmp.eq.s32.totalorder %v6060_v10, %v7260_v16  ;;  %v1233_v57 = vstv %s6117_s16  ;;  %v1338_v29 = vadd.f32 %v1336_v27, %v1314_v22  ;;  %v1254_v42 = vadd.f32 %v1252_v11, %v1230_v58 }
 0x20d   : > { %vm6170_vm10 = vcmp.eq.s32.totalorder %v6060_v10, %v7263_v60  ;;  %v1255_v20 = vadd.f32 %v1253_v49, %v1231_v36  ;;  %v1234_v34 = vmul.f32 %v7253_v12, %v1233_v57  ;;  %v1339_v9 = vadd.f32 %v1337_v1, %v1315_v18 }
 0x20e   : > { %v1235_v55 = vmul.f32 %v7254_v51, %v1233_v57  ;;  %v1305_v21 = vstv %s6132_s12  ;;  %v1329_v32 = vstv %s6134_s20  ;;  %v1278_v40 = vadd.f32 %v1276_v35, %v1254_v42  ;;  %vm6185_vm11 = vmpackc.low %vm6170_vm10, %vm6153_vm9  ;;  %s3695_s12 = smov [#allocation5]  }
 0x20f   : > { %v1279_v37 = vadd.f32 %v1277_v59, %v1255_v20  ;;  %v1236_v19 = vadd.f32 %v1234_v34, %v5923_v25  ;;  %v1306_v48 = vmul.f32 %v1305_v21, %v7255_v63  ;;  %v1353_v3 = vpack.c.bf16 %v1339_v9, %v1338_v29  ;;  %s3625_s20 = sshll.u32 %s3695_s12, 4  ;;  %s3626_s20 = int_to_ptr.vmem [resolvable:$false] %s3625_s20 }
 0x210   : > { %v1237_v27 = vadd.f32 %v1235_v55, %v5906_v5  ;;  %v1307_v35 = vmul.f32 %v1305_v21, %v7256_v30  ;;  %v1330_v25 = vmul.f32 %v1329_v32, %v6078_v15  ;;  %v1302_v1 = vadd.f32 %v1300_v61, %v1278_v40 }
 0x211   : > { %v1303_v11 = vadd.f32 %v1301_v44, %v1279_v37  ;;  %v1260_v59 = vadd.f32 %v5974_v50, %v1236_v19  ;;  %v1331_v17 = vmul.f32 %v1329_v32, %v6054_v39  ;;  %3336 = vmatmul.mubr.msk.bf16.vlgmr.msra.gmra.mrb[0].mxu0 %vm1356_vm8, %v1353_v3  ;;  %v1245_v16 = vstv %s6146_s30  ;;  %s3627_s30 = scalar_lea.vmem %s3626_s20, 1024 }
 0x212   : > { %v1261_v5 = vadd.f32 %v5950_v46, %v1237_v27  ;;  %v1317_v28 = vstv %s6157_s27  ;;  %v1341_v22 = vstv %s6159_s1  ;;  %v1326_v61 = vadd.f32 %v1324_v41, %v1302_v1  ;;  %3341 = vmatprep.mubr.msk.bf16.mxu0 %vm3693_vm4, %v7259_v14 }
 0x213   : > { %v1327_v44 = vadd.f32 %v1325_v7, %v1303_v11  ;;  %v7268_v58 = vmov 1.0|1.0   ;;  %v1284_v50 = vadd.f32 %v6040_v33, %v1260_v59  ;;  %v2417_v36 = vstv %s6164_s29 }
 0x214   : > { %3340 = vmatpush3.bf16.msk.msra.mxu0 %vm6185_vm11, %v7268_v58  ;;  %v1285_v18 = vadd.f32 %v6016_v8, %v1261_v5  ;;  %v1246_v46 = vmul.f32 %v7253_v12, %v1245_v16  ;;  %v1247_v60 = vmul.f32 %v7254_v51, %v1245_v16  ;;  %v1318_v6 = vmul.f32 %v1317_v28, %v7255_v63 }
 0x215   : > { %v1350_v41 = vadd.f32 %v1348_v13, %v1326_v61  ;;  %v1351_v7 = vadd.f32 %v1349_v38, %v1327_v44  ;;  %v1308_v57 = vadd.f32 %v1306_v48, %v1284_v50  ;;  %v1319_v29 = vmul.f32 %v1317_v28, %v7256_v30 }
 0x216   : > { %v1309_v42 = vadd.f32 %v1307_v35, %v1285_v18  ;;  %v1248_v20 = vadd.f32 %v1246_v46, %v5927_v0  ;;  %v1249_v33 = vadd.f32 %v1247_v60, %v5911_v54  ;;  %v1342_v8 = vmul.f32 %v1341_v22, %v6078_v15 }
 0x217   : > { %v1355_v34 = vpack.c.bf16 %v1351_v7, %v1350_v41  ;;  %v1332_v9 = vadd.f32 %v1330_v25, %v1308_v57  ;;  %v1343_v55 = vmul.f32 %v1341_v22, %v6054_v39  ;;  %v2418_v13 = vmul.f32 %v7253_v12, %v2417_v36 }
 0x218   : > { %v1333_v38 = vadd.f32 %v1331_v17, %v1309_v42  ;;  %v1272_v21 = vadd.f32 %v5977_v24, %v1248_v20  ;;  %v1273_v0 = vadd.f32 %v5953_v56, %v1249_v33  ;;  %v2419_v54 = vmul.f32 %v7254_v51, %v2417_v36  ;;  %v7271_v36 = vld [vmem:[#allocation89_spill] sm:$0xff]  ;;  %v7273_v20 = vld [vmem:[#allocation92_spill] sm:$0xff] }
 0x219   : > { %3348 = vmatmul.mubr.msk.bf16.vlgmr.msra.gmra.mrb[0].mxu1 %vm1356_vm8, %v1355_v34  ;;  %v2420_v32 = vadd.f32 %v2418_v13, %v5937_v2  ;;  %v2489_v40 = vstv %s6196_s8  ;;  %v2513_v37 = vstv %s6198_s3  ;;  %v2411_v19 = vstv %s6192_s11 }
 0x21a   : > { %3352 = vmatpush3.bf16.msk.msra.mxu1 %vm6185_vm11, %v7268_v58  ;;  %3353 = vmatprep.mubr.msk.bf16.mxu1 %vm3693_vm4, %v7259_v14  ;;  %v1352_v56 = vpack.c.bf16 %v1333_v38, %v1332_v9  ;;  %v1296_v24 = vadd.f32 %v6043_v62, %v1272_v21  ;;  %v1297_v48 = vadd.f32 %v6019_v52, %v1273_v0  ;;  %v2483_v3 = vstv %s6205_s19  ;;  %v7275_v21 = vld [vmem:[#allocation108_spill] sm:$0xff] }
 0x21b   : > { %3369 = vmatprep.subr.bf16.mxu1 %v7259_v14  ;;  %v2421_v2 = vadd.f32 %v2419_v54, %v5929_v23  ;;  %v2444_v27 = vadd.f32 %v5987_v26, %v2420_v32  ;;  %v2490_v35 = vmul.f32 %v2489_v40, %v7255_v63  ;;  %v2491_v25 = vmul.f32 %v2489_v40, %v7256_v30  ;;  %v7276_v54 = vld [vmem:[#allocation95_spill] sm:$0xff] }
 0x21c   : > { %v1320_v1 = vadd.f32 %v1318_v6, %v1296_v24  ;;  %v1321_v11 = vadd.f32 %v1319_v29, %v1297_v48  ;;  %v2514_v59 = vmul.f32 %v2513_v37, %v6078_v15  ;;  %v2515_v17 = vmul.f32 %v2513_v37, %v6054_v39  ;;  %v7272_v29 = vld [vmem:[#allocation84_spill] sm:$0xff]  ;;  %v7277_v37 = vld [vmem:[#allocation79_spill] sm:$0xff] }
 0x21d   : > { %v2445_v52 = vadd.f32 %v5959_v4, %v2421_v2  ;;  %v2468_v23 = vadd.f32 %v6051_v47, %v2444_v27  ;;  %v2412_v26 = vmul.f32 %v7253_v12, %v2411_v19  ;;  %v2413_v62 = vmul.f32 %v7254_v51, %v2411_v19  ;;  %3342 = vmatmul.mubr.msk.bf16.vlgmr.msra.gmra.mrb[0].mxu0 %vm1356_vm8, %v1352_v56  ;;  %v7269_v4 = vld [vmem:[#allocation88_spill] sm:$0xff]  ;;  %v7278_v56 = vld [vmem:[#allocation189_spill] sm:$0xff] }
 0x21e   : > { %v1344_v5 = vadd.f32 %v1342_v8, %v1320_v1  ;;  %v1345_v16 = vadd.f32 %v1343_v55, %v1321_v11  ;;  %v2484_v28 = vmul.f32 %v2483_v3, %v7255_v63  ;;  %v2485_v22 = vmul.f32 %v2483_v3, %v7256_v30  ;;  %v7270_v47 = vld [vmem:[#allocation190_spill] sm:$0xff]  ;;  %v7279_v1 = vld [vmem:[#allocation87_spill] sm:$0xff] }
 0x21f   : > { %v2469_v61 = vadd.f32 %v7269_v4, %v2445_v52  ;;  %v2492_v44 = vadd.f32 %v2490_v35, %v2468_v23  ;;  %v2414_v50 = vadd.f32 %v2412_v26, %v7270_v47  ;;  %v2415_v18 = vadd.f32 %v2413_v62, %v7271_v36 }
 0x220   : > { %v1354_v46 = vpack.c.bf16 %v1345_v16, %v1344_v5  ;;  %v2507_v60 = vstv %s6229_s23  ;;  %v2429_v6 = vstv %s6224_s22  ;;  %v2501_v41 = vstv %s6231_s14 }
 0x221   : > { %v2493_v7 = vadd.f32 %v2491_v25, %v2469_v61  ;;  %v2516_v57 = vadd.f32 %v2514_v59, %v2492_v44  ;;  %v2438_v42 = vadd.f32 %v7272_v29, %v2414_v50  ;;  %v2439_v33 = vadd.f32 %v7273_v20, %v2415_v18  ;;  %v7280_v59 = vld [vmem:[#allocation93_spill] sm:$0xff]  ;;  %v7283_v18 = vld [vmem:[#allocation90_spill] sm:$0xff] }
 0x222   : > { %v7274_v8 = vstv %s5921_s6  ;;  %v2508_v9 = vmul.f32 %v2507_v60, %v6078_v15  ;;  %v2430_v55 = vmul.f32 %v7253_v12, %v2429_v6  ;;  %v2431_v13 = vmul.f32 %v7254_v51, %v2429_v6 }
 0x223   : > { %v2478_v34 = vmul.f32 %v7274_v8, %v5997_v53  ;;  %v2517_v38 = vadd.f32 %v2515_v17, %v2493_v7  ;;  %v2462_v0 = vadd.f32 %v7275_v21, %v2438_v42  ;;  %v2463_v32 = vadd.f32 %v7276_v54, %v2439_v33 }
 0x224   : > { %v2509_v40 = vmul.f32 %v2507_v60, %v6054_v39  ;;  %v2432_v19 = vadd.f32 %v2430_v55, %v7277_v37  ;;  %v2433_v24 = vadd.f32 %v2431_v13, %v7278_v56  ;;  %v2502_v48 = vmul.f32 %v2501_v41, %v7255_v63  ;;  %v7284_v60 = vld [vmem:[#allocation78_spill] sm:$0xff] }
 0x225   : > { %v2525_v3 = vstv %s6253_s26  ;;  %3354 = vmatmul.mubr.msk.bf16.vlgmr.msra.gmra.mrb[0].mxu1 %vm1356_vm8, %v1354_v46  ;;  %v2531_v2 = vpack.c.bf16 %v2517_v38, %v2516_v57  ;;  %v2486_v27 = vadd.f32 %v2484_v28, %v2462_v0  ;;  %v2487_v35 = vadd.f32 %v2485_v22, %v2463_v32  ;;  %v7281_v22 = vld [vmem:[#allocation101_spill] sm:$0xff] }
 0x226   : > { %v2503_v25 = vmul.f32 %v2501_v41, %v7256_v30  ;;  %3370 = vmatpush3.bf16.msk.msra.mxu1 %vm6109_vm7, %v7268_v58  ;;  %3371 = vmatprep.mubr.msk.bf16.mxu1 %vm3693_vm4, %v7259_v14  ;;  %v2456_v11 = vadd.f32 %v7279_v1, %v2432_v19  ;;  %v2457_v17 = vadd.f32 %v7280_v59, %v2433_v24  ;;  %v2423_v23 = vstv %s6262_s5 }
 0x227   : > { %v2526_v52 = vmul.f32 %v2525_v3, %v6078_v15  ;;  %3375 = vmatprep.subr.bf16.mxu1 %v7259_v14  ;;  %v2510_v26 = vadd.f32 %v2508_v9, %v2486_v27  ;;  %v2511_v62 = vadd.f32 %v2509_v40, %v2487_v35  ;;  %v2424_v5 = vmul.f32 %v7253_v12, %v2423_v23  ;;  %v7285_v12 = vld [vmem:[#allocation94_spill] sm:$0xff]  ;;  %v7287_v9 = vld [vmem:[#allocation107_spill] sm:$0xff] }
 0x228   : > { %v2425_v16 = vmul.f32 %v7254_v51, %v2423_v23  ;;  %v2480_v28 = vadd.f32 %v2478_v34, %v2456_v11  ;;  %v2481_v4 = vadd.f32 %v7281_v22, %v2457_v17  ;;  %v2527_v61 = vmul.f32 %v2525_v3, %v6054_v39  ;;  %v7286_v51 = vld [vmem:[#allocation83_spill] sm:$0xff] }
 0x229   : > { %v2495_v44 = vstv %s6270_s2  ;;  %v7282_v47 = vstv %s5919_s28  ;;  %v2530_v36 = vpack.c.bf16 %v2511_v62, %v2510_v26  ;;  %v2426_v46 = vadd.f32 %v2424_v5, %v7283_v18  ;;  %s7288_s28 = sld [smem:[#allocation9_spill]] }
 0x22a   : > { %v2472_v50 = vmul.f32 %v7282_v47, %v5997_v53  ;;  %v2427_v6 = vadd.f32 %v2425_v16, %v7284_v60  ;;  %v2504_v41 = vadd.f32 %v2502_v48, %v2480_v28  ;;  %v2505_v7 = vadd.f32 %v2503_v25, %v2481_v4 }
 0x22b   : > { %v2519_v57 = vstv %s6280_s15  ;;  %v2450_v29 = vadd.f32 %v7285_v12, %v2426_v46  ;;  %v2496_v20 = vmul.f32 %v2495_v44, %v7255_v63  ;;  %v2497_v33 = vmul.f32 %v2495_v44, %v7256_v30 }
 0x22c   : > { %v2451_v42 = vadd.f32 %v7286_v51, %v2427_v6  ;;  %v6316_v8 = vadd.f32 %v2526_v52, %v2504_v41  ;;  %v6318_v34 = vadd.f32 %v2527_v61, %v2505_v7  ;;  %v2520_v13 = vmul.f32 %v2519_v57, %v6078_v15 }
 0x22d   : > { %3372 = vmatmul.mubr.msk.bf16.vlgmr.msra.gmra.mrb[4].mxu1 %vm1356_vm8, %v2531_v2  ;;  %v2474_v53 = vadd.f32 %v2472_v50, %v2450_v29  ;;  %v2521_v38 = vmul.f32 %v2519_v57, %v6054_v39  ;;  %v458_v15 = vmul.u32 2, %v6060_v10  ;;  %v456_v3 = vadd.s32 16, %v6056_v43 }
 0x22e   : > { %v2475_v55 = vadd.f32 %v7287_v9, %v2451_v42  ;;  %3376 = vmatpush3.bf16.msk.msra.mxu1 %vm6185_vm11, %v7268_v58  ;;  %3377 = vmatprep.mubr.msk.bf16.mxu1 %vm3693_vm4, %v7259_v14  ;;  %v2533_v30 = vpack.c.bf16 %v6318_v34, %v6316_v8  ;;  %v457_v10 = vadd.s32 24, %v6056_v43  ;;  %vm1661_vm5 = vcmask 257024  }
 0x22f   : > { %v2498_v63 = vadd.f32 %v2496_v20, %v2474_v53  ;;  %v473_v39 = vadd.s32 1, %v458_v15  ;;  %vm459_vm0 = vcmp.eq.s32.totalorder %v6056_v43, %v458_v15  ;;  %vm460_vm1 = vcmp.eq.s32.totalorder %v6070_v31, %v458_v15  ;;  %s148_s6 = sand.u32 1, %s7288_s28  }
 0x230   : > { %v2499_v21 = vadd.f32 %v2497_v33, %v2475_v55  ;;  %v2932_v23 = vsel %vm459_vm0, 1.0, %v7259_v14  ;;  %v2933_v26 = vsel %vm460_vm1, 1.0, %v7259_v14  ;;  %vm461_vm2 = vcmp.eq.s32.totalorder %v456_v3, %v458_v15  ;;  %s2925_s7 = sshll.u32 %s148_s6, 5  ;;  %s6401_s21 = scalar_lea.sflag [#allocation3], %s148_s6 }
 0x231   : > { %v2522_v0 = vadd.f32 %v2520_v13, %v2498_v63  ;;  %vm474_vm12 = vcmp.eq.s32.totalorder %v6056_v43, %v473_v39  ;;  %vm475_vm13 = vcmp.eq.s32.totalorder %v6070_v31, %v473_v39  ;;  %vm476_vm14 = vcmp.eq.s32.totalorder %v456_v3, %v473_v39  ;;  %s6369_s10 = scalar_lea.vmem [#allocation5], %s2925_s7 }
 0x232   : > { %v2523_v54 = vadd.f32 %v2521_v38, %v2499_v21  ;;  %v2936_v40 = vsel %vm474_vm12, 1.0, %v7259_v14  ;;  %v2937_v37 = vsel %vm475_vm13, 1.0, %v7259_v14  ;;  %vm477_vm15 = vcmp.eq.s32.totalorder %v457_v10, %v473_v39  ;;  %s2845_s17 = sshll.u32 %s6369_s10, 4  ;;  %s6391_s17 = int_to_ptr.vmem [resolvable:$true] %s2845_s17 }
 0x233   : > { %v486_v19 = vpack.c.bf16 %v2937_v37, %v2936_v40  ;;  %v2938_v11 = vsel %vm476_vm14, 1.0, %v7259_v14  ;;  %v2939_v59 = vsel %vm477_vm15, 1.0, %v7259_v14  ;;  %v471_v5 = vpack.c.bf16 %v2933_v26, %v2932_v23  ;;  %s3621_s16 = scalar_lea.vmem %s6391_s17, 512  ;;  %p3628_p13 = scmp.lt.s32.totalorder %s6391_s17, %s3626_s20 }
 0x234   : > { %v2532_v32 = vpack.c.bf16 %v2523_v54, %v2522_v0  ;;  %v487_v62 = vpack.c.bf16 %v2939_v59, %v2938_v11  ;;  %vm462_vm3 = vcmp.eq.s32.totalorder %v457_v10, %v458_v15  ;;  %v2934_v43 = vsel %vm461_vm2, 1.0, %v7259_v14  ;;  %p3622_p9 = scmp.ne.s32.totalorder %s6391_s17, %s3621_s16  ;;  %p3629_p0 = scmp.lt.s32.totalorder %s3627_s30, %s3621_s16 }
 0x235   : > { %3359 = vmatprep.mubr.msk.bf16.mxu0 %vm1356_vm8, %v486_v19  ;;  %v2935_v31 = vsel %vm462_vm3, 1.0, %v7259_v14 }
 0x236   : > { %v472_v16 = vpack.c.bf16 %v2935_v31, %v2934_v43  ;;  %p3623_p10 = pnand %p3622_p9, %p3751_p5  ;;  %p3630_p1 = por %p3629_p0, %p3628_p13 }
 0x238   : > { %p3624_p12 = pneg %p3623_p10 }
 0x239   : > { %3378 = vmatmul.mubr.msk.bf16.vlgmr.msra.gmra.mrb[4].mxu1 %vm1356_vm8, %v2530_v36 }
 0x23a   : > { %3395 = vmatprep.mubr.msk.bf16.mxu1 %vm1356_vm8, %v486_v19  ;;  %p3631_p2 = pnand %p3630_p1, %p3624_p12 }
 0x2f0   : > { %v1438_v56 = vpop.f32.mrb[0].mxu0 }
 0x2f1   : > { %v3343_v24 = vpop.f32.mrb[1].mxu0 }
 0x2f2   : > { %v1441_v48 = vpop.f32.mrb[2].mxu0 }
 0x2f3   : > { %v1533_v2 = vpack.c.bf16 %v1441_v48, %v1438_v56  ;;  %v3344_v27 = vpop.f32.mrb[3].mxu0 }
 0x2f8   : > { %v1526_v35 = vpop.f32.mrb[0].mxu1 }
 0x2f9   : > { %v3355_v25 = vpop.f32.mrb[1].mxu1 }
 0x2fa   : > { %v1529_v1 = vpop.f32.mrb[2].mxu1 }
 0x2fb   : > { %v1534_v17 = vpack.c.bf16 %v1529_v1, %v1526_v35  ;;  %v3356_v52 = vpop.f32.mrb[3].mxu1 }
 0x2fd   : > { %3357 = vmatprep.subr.bf16.mxu0 %v1534_v17 }
 0x2fe   : > { %3358 = vmatpush3.bf16.msra.mxu0 %v1534_v17 }
 0x2ff   : > { %3363 = vmatprep.subr.bf16.mxu0 %v1533_v2 }
 0x301   : > { %3360 = vmatmul.mubr.msk.bf16.vlgmr.msra.gmra.mrb[4].mxu0 %vm1356_vm8, %v487_v62 }
 0x302   : > { %3364 = vmatpush3.bf16.msra.mxu0 %v1533_v2  ;;  %3365 = vmatprep.mubr.msk.bf16.mxu0 %vm1356_vm8, %v471_v5 }
 0x303   : > { %3381 = vmatprep.subr.bf16.mxu0 %v7259_v14 }
 0x30c   : > { %v2615_v28 = vpop.f32.mrb[4].mxu1 }
 0x30d   : > { %3366 = vmatmul.mubr.msk.bf16.vlgmr.msra.gmra.mrb[4].mxu0 %vm1356_vm8, %v472_v16  ;;  %v3379_v22 = vpop.f32.mrb[5].mxu1 }
 0x30e   : > { %v2618_v4 = vpop.f32.mrb[6].mxu1  ;;  %3382 = vmatpush3.bf16.msk.msra.mxu0 %vm6109_vm7, %v7268_v58  ;;  %3383 = vmatprep.mubr.msk.bf16.mxu0 %vm3693_vm4, %v7259_v14 }
 0x30f   : > { %v2710_v61 = vpack.c.bf16 %v2618_v4, %v2615_v28  ;;  %v3380_v44 = vpop.f32.mrb[7].mxu1  ;;  %3387 = vmatprep.subr.bf16.mxu0 %v7259_v14 }
 0x315   : > { %3384 = vmatmul.mubr.msk.bf16.vlgmr.msra.gmra.mrb[8].mxu0 %vm1356_vm8, %v2533_v30 }
 0x316   : > { %3388 = vmatpush3.bf16.msk.msra.mxu0 %vm6185_vm11, %v7268_v58  ;;  %3389 = vmatprep.mubr.msk.bf16.mxu0 %vm3693_vm4, %v7259_v14 }
 0x321   : > { %3390 = vmatmul.mubr.msk.bf16.vlgmr.msra.gmra.mrb[8].mxu0 %vm1356_vm8, %v2532_v32 }
 0x3e0   : > { %v3367_v45 = vpop.f32.mrb[4].mxu0 }
 0x3e1   : > { %v3279_v47 = vpack.c.bf16 %v3367_v45, %v3367_v45  ;;  %v1630_v50 = vpop.f32.mrb[5].mxu0 }
 0x3e2   : > { %v3277_v36 = vpack.c.bf16 %v1630_v50, %v1630_v50  ;;  %v3368_v18 = vpop.f32.mrb[6].mxu0 }
 0x3e3   : > { %1664 = vst.msk [vmem:[%s6369_s10 + $0x8] sm:$0xf] %vm1661_vm5, %v3279_v47  ;;  %v3280_v14 = vpack.c.bf16 %v3368_v18, %v3368_v18  ;;  %v1633_v49 = vpop.f32.mrb[7].mxu0 }
 0x3e4   : > { %1662 = vst.msk [vmem:[%s6369_s10] sm:$0xf] %vm1661_vm5, %v3277_v36  ;;  %v3278_v58 = vpack.c.bf16 %v1633_v49, %v1633_v49 }
 0x3e5   : > { %1665 = vst.msk [vmem:[%s6369_s10 + $0xc] sm:$0xf] %vm1661_vm5, %v3280_v14 }
 0x3e6   : > { %1663 = vst.msk [vmem:[%s6369_s10 + $0x4] sm:$0xf] %vm1661_vm5, %v3278_v58 }
 0x3f4   : > { %v2703_v46 = vpop.f32.mrb[8].mxu0 }
 0x3f5   : > { %v3391_v60 = vpop.f32.mrb[9].mxu0 }
 0x3f6   : > { %v2706_v6 = vpop.f32.mrb[10].mxu0 }
 0x3f7   : > { %v2711_v41 = vpack.c.bf16 %v2706_v6, %v2703_v46  ;;  %v3392_v7 = vpop.f32.mrb[11].mxu0 }
 0x3f9   : > { %3393 = vmatprep.subr.bf16.mxu1 %v2711_v41 }
 0x3fa   : > { %3394 = vmatpush3.bf16.msra.mxu1 %v2711_v41 }
 0x3fb   : > { %3399 = vmatprep.subr.bf16.mxu1 %v2710_v61 }
 0x3fd   : > { %3396 = vmatmul.mubr.msk.bf16.vlgmr.msra.gmra.mrb[8].mxu1 %vm1356_vm8, %v487_v62 }
 0x3fe   : > { %3400 = vmatpush3.bf16.msra.mxu1 %v2710_v61  ;;  %3401 = vmatprep.mubr.msk.bf16.mxu1 %vm1356_vm8, %v471_v5 }
 0x409   : > { %3402 = vmatmul.mubr.msk.bf16.vlgmr.msra.gmra.mrb[8].mxu1 %vm1356_vm8, %v472_v16 }
 0x4dc   : > { %v3403_v57 = vpop.f32.mrb[8].mxu1 }
 0x4dd   : > { %v3283_v12 = vpack.c.bf16 %v3403_v57, %v3403_v57  ;;  %v2795_v29 = vpop.f32.mrb[9].mxu1 }
 0x4de   : > { %v3281_v51 = vpack.c.bf16 %v2795_v29, %v2795_v29  ;;  %v3404_v42 = vpop.f32.mrb[10].mxu1 }
 0x4df   : > { %3269 = vst.msk [vmem:[%s6369_s10 + $0x18] sm:$0xf] %vm1661_vm5, %v3283_v12  ;;  %v3284_v20 = vpack.c.bf16 %v3404_v42, %v3404_v42  ;;  %v2798_v33 = vpop.f32.mrb[11].mxu1 }
 0x4e0   : > { %3267 = vst.msk [vmem:[%s6369_s10 + $0x10] sm:$0xf] %vm1661_vm5, %v3281_v51  ;;  %v3282_v8 = vpack.c.bf16 %v2798_v33, %v2798_v33 }
 0x4e1   : > { %3270 = vst.msk [vmem:[%s6369_s10 + $0x1c] sm:$0xf] %vm1661_vm5, %v3284_v20 }
 0x4e2   : > { %3268 = vst.msk [vmem:[%s6369_s10 + $0x14] sm:$0xf] %vm1661_vm5, %v3282_v8 }
 0x4e3   : > { %3634 = shalt.err (!%p3631_p2)
}
 0x4e4   : > { %s3635_s27 = scalar_lea.hbm %s6389_s9, 512  ;;  %s3639_s11 = scalar_lea.hbm %s7291_s24, 1024 }
 0x4e5   : > { %p3636_p3 = scmp.ne.s32.totalorder %s6389_s9, %s3635_s27  ;;  %p3640_p8 = scmp.lt.u32.totalorder %s6389_s9, %s7291_s24 }
 0x4e6   : > { %p3641_p11 = scmp.lt.u32.totalorder %s3639_s11, %s3635_s27  ;;  %p3643_p10 = scmp.lt.u32.totalorder %s3635_s27, %s6389_s9 }
 0x4e7   : > { %p3637_p4 = pnand %p3636_p3, %p3751_p5 }
 0x4e8   : > { %p3642_p9 = por %p3641_p11, %p3640_p8 }
 0x4e9   : > { %p3638_p7 = pneg %p3637_p4 }
 0x4ea   : > { %p3644_p12 = por %p3643_p10, %p3642_p9 }
 0x4ec   : > { %p3645_p13 = pnand %p3644_p12, %p3638_p7 }
 0x4ee   : > { %3648 = shalt.err (!%p3645_p13)
}
 0x4ef   : > { %s3696_s19 = smov 64   ;;  %s3697_s22 = smov 4  }
 0x4f0   : > { %3433 = dma.vmem_to_hbm [thread:$0]  (%p3751_p5), %s6391_s17, 512, %s6389_s9, %s6401_s21, %s3696_s19, %s3696_s19, %s3697_s22  }
 0x4f1 PF: > { %s7292_s23 = sld [smem:[#allocation11_spill]]  ;;  %s7293_s14 = sld [smem:[#allocation8_spill]] }
 0x4f7   : > { %p3445_p0 = scmp.ge.s32.totalorder %s7292_s23, 2  ;;  %s2860_s5 = sand.u32 1, %s7293_s14  }
 0x4f8   : > { %s2861_s2 = scalar_lea.sflag [#allocation3], %s2860_s5 }
 0x4f9   : > { %p3440_p1 = pnand %p3445_p0, %p3755_p6 }
 0x4fb   : > { %3670 = dma.done.wait (!%p3440_p1), %s2861_s2, 512  }
 0x4fc   : > { %3672 = vsyncadd (!%p3440_p1), %s2861_s2, 4294966784  ;;  %s7295_s12 = sld [smem:[#allocation13_spill]]  ;;  %s7296_s9 = sld [smem:[#allocation9_spill]] }
 0x4fd   : > { %s7297_s10 = sld [smem:[#allocation10_spill]]  ;;  %s7298_s11 = sld [smem:[#allocation14_spill]] }
 0x502   : > { %p13_p2 = scmp.ge.s32.totalorder %s7295_s12, 4  }
 0x504   :  { %15 = sbr.rel (!%p13_p2) target bundleno = 8 (0x8), region = 69 }
 0x50b   :  { %2866 = vsyncpa [#allocation3], 1 }
 0x50c   :  { %2868 = vsyncpa [#allocation3 + $0x1], 1 }
 0x50d   :  { %2869 = vsyncpa [#allocation4], 1 }
 0x50e   :  { %2871 = vsyncpa [#allocation4 + $0x1], 1 }

</bundles_post_ra>
